<compile_context>
chip_gen: v7x
topology: tpu7x:2x2x1
jax: 0.10.0
libtpu: 0.0.40
codegen_flags: <defaults>
</compile_context>

<pallas_src>
import jax
import jax.numpy as jnp
from jax.experimental import pallas as pl
from jax.experimental.pallas import tpu as pltpu

IN_DIM = 784
HID_DIM = 1200
OUT_DIM = 10

HID_PAD = 1280   # 10 * 128 lanes
OUT_PAD = 128    # 1 * 128 lanes (lane-dense output store)

DEFAULT_BLOCK_B = 512


def _round_up(x, m):
    return (x + m - 1) // m * m


def _dnet_kernel(x_ref, w1_ref, b1_ref, w2_ref, b2_ref, w3_ref, b3_ref, o_ref):
    # All dots: bf16 operands, f32 MXU accumulation.  Dropout == identity.
    x = x_ref[...].astype(jnp.bfloat16)                       # in-kernel cast
    # Layer 1: Linear(784 -> 1200) + ReLU  (K=784 unpadded).
    h1 = jnp.dot(x, w1_ref[...], preferred_element_type=jnp.float32)
    h1 = jnp.maximum(h1 + b1_ref[...], 0.0)
    # Layer 2: Linear(1200 -> 1200) + ReLU.
    h2 = jnp.dot(h1.astype(jnp.bfloat16), w2_ref[...],
                 preferred_element_type=jnp.float32)
    h2 = jnp.maximum(h2 + b2_ref[...], 0.0)
    # Layer 3: Linear(1200 -> 10) (output padded to 128 lanes; pad cols are 0).
    o = jnp.dot(h2.astype(jnp.bfloat16), w3_ref[...],
                preferred_element_type=jnp.float32)
    o_ref[...] = o + b3_ref[...]


def _prepare_params(params):
    """Pad weights to lane-aligned N (and K for layers 2/3); cast weights to bf16.

    Biases stay f32 (added to the f32 accumulator).  Padding is zero, so padded
    rows/cols contribute nothing numerically.
    """
    w1, b1, w2, b2, w3, b3 = params

    def pad_w(w, k_pad, n_pad):
        k, n = w.shape
        return jnp.pad(w.astype(jnp.float32),
                       ((0, k_pad - k), (0, n_pad - n))).astype(jnp.bfloat16)

    def pad_b(bv, n_pad):
        bv = bv.reshape(1, -1).astype(jnp.float32)
        return jnp.pad(bv, ((0, 0), (0, n_pad - bv.shape[1])))

    return (pad_w(w1, IN_DIM, HID_PAD), pad_b(b1, HID_PAD),
            pad_w(w2, HID_PAD, HID_PAD), pad_b(b2, HID_PAD),
            pad_w(w3, HID_PAD, OUT_PAD), pad_b(b3, OUT_PAD))


def _batch_tiling(b, block_b):
    """Balanced batch tiles; >= 2 grid steps whenever B > 8 (v7x megacore)."""
    if b <= 8:
        nb = 1
    else:
        nb = max(2, pl.cdiv(b, block_b))
    tb = _round_up(pl.cdiv(b, nb), 8)
    return nb, tb


def dnet_forward(x, params, *, block_b=DEFAULT_BLOCK_B):
    """x: [B, ...] with prod(trailing dims) == 784.  Returns [B, 10] float32."""
    b = x.shape[0]
    x_flat = x.astype(jnp.float32).reshape(b, -1)   # nn.Flatten + .float()
    assert x_flat.shape[1] == IN_DIM, (
        f"expected {IN_DIM} features, got {x_flat.shape[1]}")

    nb, tb = _batch_tiling(b, block_b)
    b_pad = nb * tb
    if b_pad != b:      # only pad awkward batch sizes (no-op for B = k * tb)
        x_flat = jnp.pad(x_flat, ((0, b_pad - b), (0, 0)))

    w1, b1, w2, b2, w3, b3 = _prepare_params(params)

    # Constant block index -> DMA'd once, VMEM-resident across all grid steps;
    # Buffered(1) -> single buffer (no pointless double-buffering of weights).
    resident = lambda shape: pl.BlockSpec(shape, lambda i: (0, 0),
                                          pipeline_mode=pl.Buffered(1))

    out_padded = pl.pallas_call(
        _dnet_kernel,
        out_shape=jax.ShapeDtypeStruct((b_pad, OUT_PAD), jnp.float32),
        grid_spec=pltpu.PrefetchScalarGridSpec(
            num_scalar_prefetch=0,
            grid=(nb,),
            in_specs=[
                pl.BlockSpec((tb, IN_DIM), lambda i: (i, 0)),  # x f32 (pipelined)
                resident((IN_DIM, HID_PAD)),                   # w1 (bf16, resident)
                resident((1, HID_PAD)),                        # b1
                resident((HID_PAD, HID_PAD)),                  # w2
                resident((1, HID_PAD)),                        # b2
                resident((HID_PAD, OUT_PAD)),                  # w3
                resident((1, OUT_PAD)),                        # b3
            ],
            out_specs=pl.BlockSpec((tb, OUT_PAD), lambda i: (i, 0)),
        ),
        compiler_params=pltpu.CompilerParams(
            dimension_semantics=("parallel",),
            vmem_limit_bytes=48 << 20,
        ),
    )(x_flat, w1, b1, w2, b2, w3, b3)

    return out_padded[:b, :OUT_DIM]


def init_params(key):
    """Deterministic init mimicking PyTorch Linear default (U(+-1/sqrt(fan_in)))."""
    ks = jax.random.split(key, 6)

    def linear(kw, kb, fan_in, fan_out):
        bound = 1.0 / jnp.sqrt(jnp.float32(fan_in))
        w = jax.random.uniform(kw, (fan_in, fan_out), jnp.float32, -bound, bound)
        b = jax.random.uniform(kb, (1, fan_out), jnp.float32, -bound, bound)
        return w, b

    w1, b1 = linear(ks[0], ks[1], IN_DIM, HID_DIM)
    w2, b2 = linear(ks[2], ks[3], HID_DIM, HID_DIM)
    w3, b3 = linear(ks[4], ks[5], HID_DIM, OUT_DIM)
    return (w1, b1, w2, b2, w3, b3)


def dnet_reference_bf16(x, params):
    """Pure-JAX reference mirroring the kernel's bf16-in / f32-accumulate math."""
    w1, b1, w2, b2, w3, b3 = params
    bf = lambda a: a.astype(jnp.bfloat16)
    h = x.astype(jnp.float32).reshape(x.shape[0], -1)
    h = jnp.dot(bf(h), bf(w1), preferred_element_type=jnp.float32) + b1.reshape(1, -1)
    h = jnp.maximum(h, 0.0)
    h = jnp.dot(bf(h), bf(w2), preferred_element_type=jnp.float32) + b2.reshape(1, -1)
    h = jnp.maximum(h, 0.0)
    return jnp.dot(bf(h), bf(w3), preferred_element_type=jnp.float32) + b3.reshape(1, -1)


def dnet_reference_f32(x, params):
    """Full-f32 reference matching the original PyTorch DNet (eval mode)."""
    w1, b1, w2, b2, w3, b3 = params
    h = x.astype(jnp.float32).reshape(x.shape[0], -1)
    h = jnp.maximum(h @ w1 + b1.reshape(1, -1), 0.0)
    h = jnp.maximum(h @ w2 + b2.reshape(1, -1), 0.0)
    return h @ w3 + b3.reshape(1, -1)


if __name__ == "__main__":
    key = jax.random.PRNGKey(0)
    k_x, k_p = jax.random.split(key)

    # MNIST-like input: batch=2, 1x28x28 -> 784 features (required by Linear(784, ...)).
    x = jax.random.normal(k_x, (2, 1, 28, 28), dtype=jnp.float32)
    params = init_params(k_p)

    out = jax.block_until_ready(dnet_forward(x, params))

    assert out.shape == (2, OUT_DIM), out.shape

    # Exact-math parity with a bf16-mirroring reference (tight tolerance)...
    ref_bf16 = dnet_reference_bf16(x, params)
    assert jnp.allclose(out, ref_bf16, atol=2e-3, rtol=2e-3), "mismatch vs bf16 ref"

    # ...and sanity check against the true f32 model (bf16 rounding tolerance).
    ref_f32 = dnet_reference_f32(x, params)
    assert float(jnp.max(jnp.abs(out - ref_f32))) < 1e-1, "mismatch vs f32 ref"

    print("KERNEL_OK")
</pallas_src>

<mosaic_0001>
module attributes {stable_mosaic.version = 11 : i64} {
  func.func @_dnet_kernel(%arg0: i32, %arg1: memref<8x784xf32, #tpu.memory_space<vmem>>, %arg2: memref<784x1280xbf16, #tpu.memory_space<vmem>>, %arg3: memref<1x1280xf32, #tpu.memory_space<vmem>>, %arg4: memref<1280x1280xbf16, #tpu.memory_space<vmem>>, %arg5: memref<1x1280xf32, #tpu.memory_space<vmem>>, %arg6: memref<1280x128xbf16, #tpu.memory_space<vmem>>, %arg7: memref<1x128xf32, #tpu.memory_space<vmem>>, %arg8: memref<8x128xf32, #tpu.memory_space<vmem>>) attributes {dimension_semantics = [#tpu.dimension_semantics<parallel>], iteration_bounds = array<i64: 1>, scalar_prefetch = 0 : i64, scratch_operands = 0 : i64, tpu.core_type = #tpu.core_type<tc>, window_params = [{transform_indices = @transform_0, window_bounds = array<i64: 8, 784>}, {pipeline_mode = #tpu.pipeline_mode<synchronous>, transform_indices = @transform_1, window_bounds = array<i64: 784, 1280>}, {pipeline_mode = #tpu.pipeline_mode<synchronous>, transform_indices = @transform_2, window_bounds = array<i64: 1, 1280>}, {pipeline_mode = #tpu.pipeline_mode<synchronous>, transform_indices = @transform_3, window_bounds = array<i64: 1280, 1280>}, {pipeline_mode = #tpu.pipeline_mode<synchronous>, transform_indices = @transform_4, window_bounds = array<i64: 1, 1280>}, {pipeline_mode = #tpu.pipeline_mode<synchronous>, transform_indices = @transform_5, window_bounds = array<i64: 1280, 128>}, {pipeline_mode = #tpu.pipeline_mode<synchronous>, transform_indices = @transform_6, window_bounds = array<i64: 1, 128>}, {transform_indices = @transform_7, window_bounds = array<i64: 8, 128>}]} {
    %c0 = arith.constant 0 : index
    %c0_0 = arith.constant 0 : index
    %0 = vector.load %arg1[%c0, %c0_0] : memref<8x784xf32, #tpu.memory_space<vmem>>, vector<8x784xf32>
    %1 = arith.truncf %0 : vector<8x784xf32> to vector<8x784xbf16>
    %c0_1 = arith.constant 0 : index
    %c0_2 = arith.constant 0 : index
    %2 = vector.load %arg2[%c0_1, %c0_2] : memref<784x1280xbf16, #tpu.memory_space<vmem>>, vector<784x1280xbf16>
    %cst = arith.constant dense<0.000000e+00> : vector<8x1280xf32>
    %3 = tpu.matmul %1, %2, %cst {dimension_numbers = #tpu.dot_dimension_numbers<[1], [0], [0], [1], [0, 0, 1, 1], [], []>} : vector<8x784xbf16>, vector<784x1280xbf16>, vector<8x1280xf32> -> vector<8x1280xf32>
    %c0_3 = arith.constant 0 : index
    %c0_4 = arith.constant 0 : index
    %4 = vector.load %arg3[%c0_3, %c0_4] : memref<1x1280xf32, #tpu.memory_space<vmem>>, vector<1x1280xf32>
    %5 = vector.broadcast %4 : vector<1x1280xf32> to vector<8x1280xf32>
    %6 = arith.addf %3, %5 : vector<8x1280xf32>
    %cst_5 = arith.constant 0.000000e+00 : f32
    %7 = vector.broadcast %cst_5 : f32 to vector<8x1280xf32>
    %8 = arith.maximumf %6, %7 : vector<8x1280xf32>
    %9 = arith.truncf %8 : vector<8x1280xf32> to vector<8x1280xbf16>
    %c0_6 = arith.constant 0 : index
    %c0_7 = arith.constant 0 : index
    %10 = vector.load %arg4[%c0_6, %c0_7] : memref<1280x1280xbf16, #tpu.memory_space<vmem>>, vector<1280x1280xbf16>
    %cst_8 = arith.constant dense<0.000000e+00> : vector<8x1280xf32>
    %11 = tpu.matmul %9, %10, %cst_8 {dimension_numbers = #tpu.dot_dimension_numbers<[1], [0], [0], [1], [0, 0, 1, 1], [], []>} : vector<8x1280xbf16>, vector<1280x1280xbf16>, vector<8x1280xf32> -> vector<8x1280xf32>
    %c0_9 = arith.constant 0 : index
    %c0_10 = arith.constant 0 : index
    %12 = vector.load %arg5[%c0_9, %c0_10] : memref<1x1280xf32, #tpu.memory_space<vmem>>, vector<1x1280xf32>
    %13 = vector.broadcast %12 : vector<1x1280xf32> to vector<8x1280xf32>
    %14 = arith.addf %11, %13 : vector<8x1280xf32>
    %cst_11 = arith.constant 0.000000e+00 : f32
    %15 = vector.broadcast %cst_11 : f32 to vector<8x1280xf32>
    %16 = arith.maximumf %14, %15 : vector<8x1280xf32>
    %17 = arith.truncf %16 : vector<8x1280xf32> to vector<8x1280xbf16>
    %c0_12 = arith.constant 0 : index
    %c0_13 = arith.constant 0 : index
    %18 = vector.load %arg6[%c0_12, %c0_13] : memref<1280x128xbf16, #tpu.memory_space<vmem>>, vector<1280x128xbf16>
    %cst_14 = arith.constant dense<0.000000e+00> : vector<8x128xf32>
    %19 = tpu.matmul %17, %18, %cst_14 {dimension_numbers = #tpu.dot_dimension_numbers<[1], [0], [0], [1], [0, 0, 1, 1], [], []>} : vector<8x1280xbf16>, vector<1280x128xbf16>, vector<8x128xf32> -> vector<8x128xf32>
    %c0_15 = arith.constant 0 : index
    %c0_16 = arith.constant 0 : index
    %20 = vector.load %arg7[%c0_15, %c0_16] : memref<1x128xf32, #tpu.memory_space<vmem>>, vector<1x128xf32>
    %21 = vector.broadcast %20 : vector<1x128xf32> to vector<8x128xf32>
    %22 = arith.addf %19, %21 : vector<8x128xf32>
    %c0_17 = arith.constant 0 : index
    %c0_18 = arith.constant 0 : index
    %23 = vector.load %arg8[%c0_17, %c0_18] : memref<8x128xf32, #tpu.memory_space<vmem>>, vector<8x128xf32>
    tpu.vector_store %arg8[%c0_17, %c0_18], %22 {strides = array<i32>} : memref<8x128xf32, #tpu.memory_space<vmem>>, vector<8x128xf32>,
    return
  }
  func.func @transform_0(%arg0: i32) -> (i32, i32) {
    %c0_i32 = arith.constant 0 : i32
    %c0_i32_0 = arith.constant 0 : i32
    return %arg0, %c0_i32 : i32, i32
  }
  func.func @transform_1(%arg0: i32) -> (i32, i32) {
    %c0_i32 = arith.constant 0 : i32
    %c0_i32_0 = arith.constant 0 : i32
    %c0_i32_1 = arith.constant 0 : i32
    return %c0_i32, %c0_i32_0 : i32, i32
  }
  func.func @transform_2(%arg0: i32) -> (i32, i32) {
    %c0_i32 = arith.constant 0 : i32
    %c0_i32_0 = arith.constant 0 : i32
    %c0_i32_1 = arith.constant 0 : i32
    return %c0_i32, %c0_i32_0 : i32, i32
  }
  func.func @transform_3(%arg0: i32) -> (i32, i32) {
    %c0_i32 = arith.constant 0 : i32
    %c0_i32_0 = arith.constant 0 : i32
    %c0_i32_1 = arith.constant 0 : i32
    return %c0_i32, %c0_i32_0 : i32, i32
  }
  func.func @transform_4(%arg0: i32) -> (i32, i32) {
    %c0_i32 = arith.constant 0 : i32
    %c0_i32_0 = arith.constant 0 : i32
    %c0_i32_1 = arith.constant 0 : i32
    return %c0_i32, %c0_i32_0 : i32, i32
  }
  func.func @transform_5(%arg0: i32) -> (i32, i32) {
    %c0_i32 = arith.constant 0 : i32
    %c0_i32_0 = arith.constant 0 : i32
    %c0_i32_1 = arith.constant 0 : i32
    return %c0_i32, %c0_i32_0 : i32, i32
  }
  func.func @transform_6(%arg0: i32) -> (i32, i32) {
    %c0_i32 = arith.constant 0 : i32
    %c0_i32_0 = arith.constant 0 : i32
    %c0_i32_1 = arith.constant 0 : i32
    return %c0_i32, %c0_i32_0 : i32, i32
  }
  func.func @transform_7(%arg0: i32) -> (i32, i32) {
    %c0_i32 = arith.constant 0 : i32
    %c0_i32_0 = arith.constant 0 : i32
    return %arg0, %c0_i32 : i32, i32
  }
}

</mosaic_0001>

<bundles_post_ra>
// kernel: tpu_custom_call.1
= control target key start
LH: loop header
LB: loop body
LE: loop exit
PB: predicated region body
PF: predicated region fallthrough
CT: control target
= control target key end

     0   :  { %12 = vsyncpa [#allocation3], 0  ;;  %s14961_s0 = inlined_call_operand.hbm [shape: f32[8,784], index: 0, kind: input, shape index: {}]   ;;  %s14962_s1 = inlined_call_operand.hbm [shape: bf16[784,1280], index: 1, kind: input, shape index: {}]   ;;  %s14963_s2 = inlined_call_operand.hbm [shape: f32[1,1280], index: 2, kind: input, shape index: {}]   ;;  %s14964_s3 = inlined_call_operand.hbm [shape: bf16[1280,1280], index: 3, kind: input, shape index: {}]   ;;  %s14965_s4 = inlined_call_operand.hbm [shape: f32[1,1280], index: 4, kind: input, shape index: {}]   ;;  %s14966_s5 = inlined_call_operand.hbm [shape: bf16[1280,128], index: 5, kind: input, shape index: {}]   ;;  %s14967_s6 = inlined_call_operand.hbm [shape: f32[1,128], index: 6, kind: input, shape index: {}]   ;;  %s14968_s7 = inlined_call_operand.hbm [shape: f32[8,128], index: 7, kind: output, shape index: {}]  }
   0x1   :  { %13 = vsyncpa [#allocation6], 0 }
   0x2   :  { %14 = vsyncpa [#allocation9], 0 }
   0x3   :  { %15 = vsyncpa [#allocation12], 0 }
   0x4   :  { %16 = vsyncpa [#allocation4], 0  ;;  %s14591_s24 = smov [#allocation5]   ;;  %s14405_s28 = scalar_lea.hbm %s14962_s1, 62720 }
   0x5   :  { %s32_s25 = sshll.u32 %s14591_s24, 4  ;;  %p14406_p0 = scmp.ne.s32.totalorder %s14962_s1, %s14405_s28  ;;  %s33_s25 = int_to_ptr.vmem [resolvable:$true] %s32_s25 }
   0x6   :  { %p14409_p1 = scmp.lt.u32.totalorder %s14405_s28, %s14962_s1 }
   0x8   :  { %p14411_p2 = pnand %p14409_p1, %p14406_p0 }
   0xa   :  { %14414 = shalt.err (!%p14411_p2)
}
   0xb   :  { %s14415_s10 = scalar_lea.vmem %s33_s25, 62720  ;;  %p14420_p4 = scmp.lt.s32.totalorder %s33_s25, %s33_s25 }
   0xc   :  { %p14416_p3 = scmp.ne.s32.totalorder %s33_s25, %s14415_s10  ;;  %p14421_p5 = scmp.lt.s32.totalorder %s14415_s10, %s14415_s10 }
   0xe   :  { %p14422_p6 = por %p14421_p5, %p14420_p4 }
  0x10   :  { %p14423_p7 = pnand %p14422_p6, %p14416_p3 }
  0x12   :  { %14426 = shalt.err (!%p14423_p7)
}
  0x13   :  { %s14592_s11 = smov 640   ;;  %s14593_s12 = smov 40  }
  0x14   :  { %38 = dma.hbm_to_vmem [thread:$0]  %s14962_s1, 62720, %s33_s25, [#allocation6], %s14592_s11, %s14592_s11, %s14593_s12  }
  0x15   :  { %s14594_s15 = smov [#allocation8]   ;;  %s14595_s17 = smov [#allocation11]  }
  0x16   :  { %s54_s16 = sshll.u32 %s14594_s15, 4  ;;  %s76_s18 = sshll.u32 %s14595_s17, 4  ;;  %s55_s16 = int_to_ptr.vmem [resolvable:$true] %s54_s16  ;;  %s77_s18 = int_to_ptr.vmem [resolvable:$true] %s76_s18 }
  0x17   :  { %s14427_s21 = scalar_lea.hbm %s14964_s3, 102400 }
  0x18   :  { %p14428_p8 = scmp.ne.s32.totalorder %s14964_s3, %s14427_s21  ;;  %p14431_p9 = scmp.lt.u32.totalorder %s14427_s21, %s14964_s3 }
  0x1a   :  { %p14433_p10 = pnand %p14431_p9, %p14428_p8 }
  0x1c   :  { %14436 = shalt.err (!%p14433_p10)
}
  0x1d   :  { %s14437_s1 = scalar_lea.vmem %s55_s16, 102400  ;;  %p14442_p12 = scmp.lt.s32.totalorder %s55_s16, %s55_s16 }
  0x1e   :  { %p14438_p11 = scmp.ne.s32.totalorder %s55_s16, %s14437_s1  ;;  %p14443_p13 = scmp.lt.s32.totalorder %s14437_s1, %s14437_s1 }
  0x20   :  { %p14444_p0 = por %p14443_p13, %p14442_p12 }
  0x22   :  { %p14445_p1 = pnand %p14444_p0, %p14438_p11 }
  0x24   :  { %14448 = shalt.err (!%p14445_p1)
}
  0x25   :  { %60 = dma.hbm_to_vmem [thread:$0]  %s14964_s3, 102400, %s55_s16, [#allocation9], %s14592_s11, %s14592_s11, %s14593_s12  }
  0x26   :  { %s14449_s30 = scalar_lea.hbm %s14966_s5, 10240 }
  0x27   :  { %p14450_p2 = scmp.ne.s32.totalorder %s14966_s5, %s14449_s30  ;;  %p14453_p3 = scmp.lt.u32.totalorder %s14449_s30, %s14966_s5 }
  0x29   :  { %p14455_p4 = pnand %p14453_p3, %p14450_p2 }
  0x2b   :  { %14458 = shalt.err (!%p14455_p4)
}
  0x2c   :  { %s14459_s14 = scalar_lea.vmem %s77_s18, 10240  ;;  %p14464_p6 = scmp.lt.s32.totalorder %s77_s18, %s77_s18 }
  0x2d   :  { %p14460_p5 = scmp.ne.s32.totalorder %s77_s18, %s14459_s14  ;;  %p14465_p7 = scmp.lt.s32.totalorder %s14459_s14, %s14459_s14 }
  0x2f   :  { %p14466_p8 = por %p14465_p7, %p14464_p6 }
  0x31   :  { %p14467_p9 = pnand %p14466_p8, %p14460_p5 }
  0x33   :  { %14470 = shalt.err (!%p14467_p9)
}
  0x34   :  { %s14596_s3 = smov 64   ;;  %s14597_s11 = smov 4  }
  0x35   :  { %82 = dma.hbm_to_vmem [thread:$0]  %s14966_s5, 10240, %s77_s18, [#allocation12], %s14596_s3, %s14596_s3, %s14597_s11  }
  0x36   :  { %s14598_s16 = smov [#allocation2]   ;;  %s14599_s19 = smov [#allocation7]  }
  0x37   :  { %s23_s17 = sshll.u32 %s14598_s16, 4  ;;  %s45_s20 = sshll.u32 %s14599_s19, 4  ;;  %s24_s17 = int_to_ptr.vmem [resolvable:$true] %s23_s17  ;;  %s46_s20 = int_to_ptr.vmem [resolvable:$true] %s45_s20 }
  0x38   :  { %s14471_s23 = scalar_lea.hbm %s14961_s0, 896 }
  0x39   :  { %p14472_p10 = scmp.ne.s32.totalorder %s14961_s0, %s14471_s23  ;;  %p14475_p11 = scmp.lt.u32.totalorder %s14471_s23, %s14961_s0 }
  0x3b   :  { %p14477_p12 = pnand %p14475_p11, %p14472_p10 }
  0x3d   :  { %14480 = shalt.err (!%p14477_p12)
}
  0x3e   :  { %s14481_s5 = scalar_lea.vmem %s24_s17, 896  ;;  %p14486_p0 = scmp.lt.s32.totalorder %s24_s17, %s24_s17 }
  0x3f   :  { %p14482_p13 = scmp.ne.s32.totalorder %s24_s17, %s14481_s5  ;;  %p14487_p1 = scmp.lt.s32.totalorder %s14481_s5, %s14481_s5 }
  0x41   :  { %p14488_p2 = por %p14487_p1, %p14486_p0 }
  0x43   :  { %p14489_p3 = pnand %p14488_p2, %p14482_p13 }
  0x45   :  { %14492 = shalt.err (!%p14489_p3)
}
  0x46   :  { %26 = dma.hbm_to_vmem [thread:$0]  %s14961_s0, 896, %s24_s17, [#allocation3]  }
  0x47   :  { %s14493_s30 = scalar_lea.hbm %s14963_s2, 160 }
  0x48   :  { %p14494_p4 = scmp.ne.s32.totalorder %s14963_s2, %s14493_s30  ;;  %p14497_p5 = scmp.lt.u32.totalorder %s14493_s30, %s14963_s2 }
  0x4a   :  { %p14499_p6 = pnand %p14497_p5, %p14494_p4 }
  0x4c   :  { %14502 = shalt.err (!%p14499_p6)
}
  0x4d   :  { %s14503_s14 = scalar_lea.vmem %s46_s20, 160  ;;  %p14508_p8 = scmp.lt.s32.totalorder %s46_s20, %s46_s20 }
  0x4e   :  { %p14504_p7 = scmp.ne.s32.totalorder %s46_s20, %s14503_s14  ;;  %p14509_p9 = scmp.lt.s32.totalorder %s14503_s14, %s14503_s14 }
  0x50   :  { %p14510_p10 = por %p14509_p9, %p14508_p8 }
  0x52   :  { %p14511_p11 = pnand %p14510_p10, %p14504_p7 }
  0x54   :  { %14514 = shalt.err (!%p14511_p11)
}
  0x55   :  { %48 = dma.hbm_to_vmem [thread:$0]  %s14963_s2, 160, %s46_s20, [#allocation6]  }
  0x56   :  { %s14600_s11 = smov [#allocation10]   ;;  %s14601_s15 = smov [#allocation13]  }
  0x57   :  { %s67_s12 = sshll.u32 %s14600_s11, 4  ;;  %s89_s16 = sshll.u32 %s14601_s15, 4  ;;  %s68_s12 = int_to_ptr.vmem [resolvable:$true] %s67_s12  ;;  %s90_s16 = int_to_ptr.vmem [resolvable:$true] %s89_s16 }
  0x58   :  { %s14515_s21 = scalar_lea.hbm %s14965_s4, 160 }
  0x59   :  { %p14516_p12 = scmp.ne.s32.totalorder %s14965_s4, %s14515_s21  ;;  %p14519_p13 = scmp.lt.u32.totalorder %s14515_s21, %s14965_s4 }
  0x5b   :  { %p14521_p0 = pnand %p14519_p13, %p14516_p12 }
  0x5d   :  { %14524 = shalt.err (!%p14521_p0)
}
  0x5e   :  { %s14525_s2 = scalar_lea.vmem %s68_s12, 160  ;;  %p14530_p2 = scmp.lt.s32.totalorder %s68_s12, %s68_s12 }
  0x5f   :  { %p14526_p1 = scmp.ne.s32.totalorder %s68_s12, %s14525_s2  ;;  %p14531_p3 = scmp.lt.s32.totalorder %s14525_s2, %s14525_s2 }
  0x61   :  { %p14532_p4 = por %p14531_p3, %p14530_p2 }
  0x63   :  { %p14533_p5 = pnand %p14532_p4, %p14526_p1 }
  0x65   :  { %14536 = shalt.err (!%p14533_p5)
}
  0x66   :  { %70 = dma.hbm_to_vmem [thread:$0]  %s14965_s4, 160, %s68_s12, [#allocation9]  }
  0x67   :  { %s14537_s18 = scalar_lea.hbm %s14967_s6, 16 }
  0x68   :  { %p14538_p6 = scmp.ne.s32.totalorder %s14967_s6, %s14537_s18  ;;  %p14541_p7 = scmp.lt.u32.totalorder %s14537_s18, %s14967_s6 }
  0x6a   :  { %p14543_p8 = pnand %p14541_p7, %p14538_p6 }
  0x6c   :  { %14546 = shalt.err (!%p14543_p8)
}
  0x6d   :  { %s14547_s8 = scalar_lea.vmem %s90_s16, 16  ;;  %s14551_s9 = scalar_lea.vmem %s90_s16, 32 }
  0x6e   :  { %p14548_p9 = scmp.ne.s32.totalorder %s90_s16, %s14547_s8  ;;  %p14552_p10 = scmp.lt.s32.totalorder %s90_s16, %s90_s16 }
  0x6f   :  { %p14553_p11 = scmp.lt.s32.totalorder %s14551_s9, %s14547_s8 }
  0x71   :  { %p14554_p12 = por %p14553_p11, %p14552_p10 }
  0x73   :  { %p14555_p13 = pnand %p14554_p12, %p14548_p9 }
  0x75   :  { %14558 = shalt.err (!%p14555_p13)
}
  0x76   :  { %92 = dma.hbm_to_vmem [thread:$0]  %s14967_s6, 16, %s90_s16, [#allocation12]  }
  0x77   :  { %14581 = dma.done.wait [#allocation3], 896  }
  0x78   :  { %14582 = vsyncadd [#allocation3], 4294966400 }
  0x79   :  { %14583 = dma.done.wait [#allocation6], 62880  }
  0x7a   :  { %14584 = vsyncadd [#allocation6], 4294904416 }
  0x7b   :  { %14585 = dma.done.wait [#allocation9], 102560  }
  0x7c   :  { %14586 = vsyncadd [#allocation9], 4294864736 }
  0x7d   :  { %14587 = dma.done.wait [#allocation12], 10256  }
  0x7e   :  { %14588 = vsyncadd [#allocation12], 4294957040  ;;  %v12389_v0 = vld [vmem:[#allocation5 + $0x4] ss:$40 sps:$4 sm:$0xff]   ;;  %v12393_v2 = vld [vmem:[#allocation5] ss:$40 sps:$4 sm:$0xff]  }
  0x7f   :  { %v12391_v1 = vld [vmem:[#allocation5 + $0xc] ss:$40 sps:$4 sm:$0xff]   ;;  %3127 = vmatprep.subr.bf16.mxu0 %v12389_v0  ;;  %v12394_v3 = vld [vmem:[#allocation5 + $0x8] ss:$40 sps:$4 sm:$0xff]   ;;  %v12397_v5 = vld [vmem:[#allocation5 + $0x5c] ss:$40 sps:$4 sm:$0xff]  }
  0x80   :  { %3291 = vmatprep.subr.bf16.mxu1 %v12391_v1  ;;  %v12395_v4 = vld [vmem:[#allocation5 + $0x54] ss:$40 sps:$4 sm:$0xff]   ;;  %3128 = vmatpush1.bf16.msra.mxu0 %v12393_v2  ;;  %v12399_v6 = vld [vmem:[#allocation5 + $0x50] ss:$40 sps:$4 sm:$0xff]   ;;  %v12401_v8 = vld [vmem:[#allocation5 + $0xa4] ss:$40 sps:$4 sm:$0xff]  }
  0x81   :  { %3292 = vmatpush1.bf16.msra.mxu1 %v12394_v3  ;;  %3129 = vmatprep.subr.bf16.mxu0 %v12395_v4  ;;  %v12400_v7 = vld [vmem:[#allocation5 + $0x58] ss:$40 sps:$4 sm:$0xff]   ;;  %v12403_v9 = vld [vmem:[#allocation5 + $0xac] ss:$40 sps:$4 sm:$0xff]   ;;  %v12406_v11 = vld [vmem:[#allocation5 + $0xa8] ss:$40 sps:$4 sm:$0xff]  }
  0x82   :  { %3293 = vmatprep.subr.bf16.mxu1 %v12397_v5  ;;  %v12405_v10 = vld [vmem:[#allocation5 + $0xa0] ss:$40 sps:$4 sm:$0xff]   ;;  %v12407_v12 = vld [vmem:[#allocation5 + $0xf4] ss:$40 sps:$4 sm:$0xff]   ;;  %v12411_v14 = vld [vmem:[#allocation5 + $0xf0] ss:$40 sps:$4 sm:$0xff]  }
  0x83   :  { %v12409_v13 = vld [vmem:[#allocation5 + $0xfc] ss:$40 sps:$4 sm:$0xff]   ;;  %v12412_v15 = vld [vmem:[#allocation5 + $0xf8] ss:$40 sps:$4 sm:$0xff]   ;;  %v12415_v17 = vld [vmem:[#allocation5 + $0x14c] ss:$40 sps:$4 sm:$0xff]  }
  0x84   :  { %3130 = vmatpush1.bf16.msra.mxu0 %v12399_v6  ;;  %v12413_v16 = vld [vmem:[#allocation5 + $0x144] ss:$40 sps:$4 sm:$0xff]   ;;  %v12417_v18 = vld [vmem:[#allocation5 + $0x140] ss:$40 sps:$4 sm:$0xff]   ;;  %v12419_v20 = vld [vmem:[#allocation5 + $0x194] ss:$40 sps:$4 sm:$0xff]  }
  0x85   :  { %3294 = vmatpush1.bf16.msra.mxu1 %v12400_v7  ;;  %3131 = vmatprep.subr.bf16.mxu0 %v12401_v8  ;;  %v12418_v19 = vld [vmem:[#allocation5 + $0x148] ss:$40 sps:$4 sm:$0xff]   ;;  %v12421_v21 = vld [vmem:[#allocation5 + $0x19c] ss:$40 sps:$4 sm:$0xff]   ;;  %v12424_v23 = vld [vmem:[#allocation5 + $0x198] ss:$40 sps:$4 sm:$0xff]  }
  0x86   :  { %3295 = vmatprep.subr.bf16.mxu1 %v12403_v9  ;;  %v12423_v22 = vld [vmem:[#allocation5 + $0x190] ss:$40 sps:$4 sm:$0xff]   ;;  %v12425_v24 = vld [vmem:[#allocation5 + $0x1e4] ss:$40 sps:$4 sm:$0xff]   ;;  %v12429_v26 = vld [vmem:[#allocation5 + $0x1e0] ss:$40 sps:$4 sm:$0xff]  }
  0x87   :  { %v12427_v25 = vld [vmem:[#allocation5 + $0x1ec] ss:$40 sps:$4 sm:$0xff]   ;;  %v12430_v27 = vld [vmem:[#allocation5 + $0x1e8] ss:$40 sps:$4 sm:$0xff]   ;;  %v12433_v29 = vld [vmem:[#allocation5 + $0x23c] ss:$40 sps:$4 sm:$0xff]  }
  0x88   :  { %3132 = vmatpush1.bf16.msra.mxu0 %v12405_v10  ;;  %v12431_v28 = vld [vmem:[#allocation5 + $0x234] ss:$40 sps:$4 sm:$0xff]   ;;  %v12435_v30 = vld [vmem:[#allocation5 + $0x230] ss:$40 sps:$4 sm:$0xff]   ;;  %v12437_v32 = vld [vmem:[#allocation5 + $0x284] ss:$40 sps:$4 sm:$0xff]  }
  0x89   :  { %3296 = vmatpush1.bf16.msra.mxu1 %v12406_v11  ;;  %3133 = vmatprep.subr.bf16.mxu0 %v12407_v12  ;;  %v12436_v31 = vld [vmem:[#allocation5 + $0x238] ss:$40 sps:$4 sm:$0xff]   ;;  %v12439_v33 = vld [vmem:[#allocation5 + $0x28c] ss:$40 sps:$4 sm:$0xff]   ;;  %v12442_v35 = vld [vmem:[#allocation5 + $0x288] ss:$40 sps:$4 sm:$0xff]  }
  0x8a   :  { %3297 = vmatprep.subr.bf16.mxu1 %v12409_v13  ;;  %v12441_v34 = vld [vmem:[#allocation5 + $0x280] ss:$40 sps:$4 sm:$0xff]   ;;  %v12443_v36 = vld [vmem:[#allocation5 + $0x2d4] ss:$40 sps:$4 sm:$0xff]   ;;  %v12447_v38 = vld [vmem:[#allocation5 + $0x2d0] ss:$40 sps:$4 sm:$0xff]  }
  0x8b   :  { %v12445_v37 = vld [vmem:[#allocation5 + $0x2dc] ss:$40 sps:$4 sm:$0xff]   ;;  %v12448_v39 = vld [vmem:[#allocation5 + $0x2d8] ss:$40 sps:$4 sm:$0xff]   ;;  %v12451_v41 = vld [vmem:[#allocation5 + $0x32c] ss:$40 sps:$4 sm:$0xff]  }
  0x8c   :  { %3134 = vmatpush1.bf16.msra.mxu0 %v12411_v14  ;;  %v12449_v40 = vld [vmem:[#allocation5 + $0x324] ss:$40 sps:$4 sm:$0xff]   ;;  %v12453_v42 = vld [vmem:[#allocation5 + $0x320] ss:$40 sps:$4 sm:$0xff]   ;;  %v12455_v44 = vld [vmem:[#allocation5 + $0x374] ss:$40 sps:$4 sm:$0xff]  }
  0x8d   :  { %3298 = vmatpush1.bf16.msra.mxu1 %v12412_v15  ;;  %3135 = vmatprep.subr.bf16.mxu0 %v12413_v16  ;;  %v12454_v43 = vld [vmem:[#allocation5 + $0x328] ss:$40 sps:$4 sm:$0xff]   ;;  %v12457_v45 = vld [vmem:[#allocation5 + $0x37c] ss:$40 sps:$4 sm:$0xff]   ;;  %v12460_v49 = vld [vmem:[#allocation5 + $0x378] ss:$40 sps:$4 sm:$0xff]  }
  0x8e   :  { %3299 = vmatprep.subr.bf16.mxu1 %v12415_v17  ;;  %v116_v46 = vld [vmem:[#allocation2 + $0x8] sm:$0xff]  ;;  %v12461_v50 = vld [vmem:[#allocation5 + $0x3c4] ss:$40 sps:$4 sm:$0xff]   ;;  %v12465_v52 = vld [vmem:[#allocation5 + $0x3c0] ss:$40 sps:$4 sm:$0xff]   ;;  %vm3123_vm0 = vcmask 130048  }
  0x8f   :  { %v12459_v47 = vld [vmem:[#allocation5 + $0x370] ss:$40 sps:$4 sm:$0xff]   ;;  %v14728_v48 = vpack.c.bf16 %v116_v46, %v116_v46  ;;  %v12463_v51 = vld [vmem:[#allocation5 + $0x3cc] ss:$40 sps:$4 sm:$0xff]   ;;  %v12469_v55 = vld [vmem:[#allocation5 + $0x41c] ss:$40 sps:$4 sm:$0xff]  }
  0x90   :  { %3136 = vmatpush1.bf16.msra.mxu0 %v12417_v18  ;;  %v12466_v53 = vld [vmem:[#allocation5 + $0x3c8] ss:$40 sps:$4 sm:$0xff]   ;;  %v12467_v54 = vld [vmem:[#allocation5 + $0x414] ss:$40 sps:$4 sm:$0xff]   ;;  %v12472_v57 = vld [vmem:[#allocation5 + $0x418] ss:$40 sps:$4 sm:$0xff]  }
  0x91   :  { %3300 = vmatpush1.bf16.msra.mxu1 %v12418_v19  ;;  %3137 = vmatprep.subr.bf16.mxu0 %v12419_v20  ;;  %v12471_v56 = vld [vmem:[#allocation5 + $0x410] ss:$40 sps:$4 sm:$0xff]   ;;  %v12473_v58 = vld [vmem:[#allocation5 + $0x464] ss:$40 sps:$4 sm:$0xff]   ;;  %v12477_v60 = vld [vmem:[#allocation5 + $0x460] ss:$40 sps:$4 sm:$0xff]  }
  0x92   :  { %3301 = vmatprep.subr.bf16.mxu1 %v12421_v21  ;;  %3159 = vmatprep.mubr.bf16.mxu0 %v14728_v48  ;;  %v12475_v59 = vld [vmem:[#allocation5 + $0x46c] ss:$40 sps:$4 sm:$0xff]   ;;  %v12478_v61 = vld [vmem:[#allocation5 + $0x468] ss:$40 sps:$4 sm:$0xff]   ;;  %v12481_v63 = vld [vmem:[#allocation5 + $0x4bc] ss:$40 sps:$4 sm:$0xff]  }
  0x93   :  { %3323 = vmatprep.mubr.bf16.mxu1 %v14728_v48  ;;  %v12479_v62 = vld [vmem:[#allocation5 + $0x4b4] ss:$40 sps:$4 sm:$0xff]   ;;  %v12483_v0 = vld [vmem:[#allocation5 + $0x4b0] ss:$40 sps:$4 sm:$0xff]   ;;  %v115_v2 = vld [vmem:[#allocation2] sm:$0xff]  ;;  %s14603_s6 = smov [#allocation14]  }
  0x94   :  { %3138 = vmatpush1.bf16.msra.mxu0 %v12423_v22  ;;  %v12484_v1 = vld [vmem:[#allocation5 + $0x4b8] ss:$40 sps:$4 sm:$0xff]   ;;  %v12487_v3 = vld [vmem:[#allocation5 + $0x504] ss:$40 sps:$4 sm:$0xff]   ;;  %v14732_v5 = vpack.c.bf16 %v115_v2, %v115_v2  ;;  %v12488_v7 = vld [vmem:[#allocation5 + $0x508] ss:$40 sps:$4 sm:$0xff]  }
  0x95   :  { %3302 = vmatpush1.bf16.msra.mxu1 %v12424_v23  ;;  %3139 = vmatprep.subr.bf16.mxu0 %v12425_v24  ;;  %v12490_v4 = vld [vmem:[#allocation5 + $0x50c] ss:$40 sps:$4 sm:$0xff]   ;;  %v12485_v6 = vld [vmem:[#allocation5 + $0x500] ss:$40 sps:$4 sm:$0xff]   ;;  %v12496_v9 = vld [vmem:[#allocation5 + $0x55c] ss:$40 sps:$4 sm:$0xff]  }
  0x96   :  { %3303 = vmatprep.subr.bf16.mxu1 %v12427_v25  ;;  %v12493_v8 = vld [vmem:[#allocation5 + $0x554] ss:$40 sps:$4 sm:$0xff]   ;;  %v12491_v10 = vld [vmem:[#allocation5 + $0x550] ss:$40 sps:$4 sm:$0xff]   ;;  %v12499_v12 = vld [vmem:[#allocation5 + $0x5a4] ss:$40 sps:$4 sm:$0xff]  }
  0x97   :  { %v12494_v11 = vld [vmem:[#allocation5 + $0x558] ss:$40 sps:$4 sm:$0xff]   ;;  %v12502_v13 = vld [vmem:[#allocation5 + $0x5ac] ss:$40 sps:$4 sm:$0xff]   ;;  %v12500_v15 = vld [vmem:[#allocation5 + $0x5a8] ss:$40 sps:$4 sm:$0xff]  }
  0x98   :  { %3140 = vmatpush1.bf16.msra.mxu0 %v12429_v26  ;;  %v12497_v14 = vld [vmem:[#allocation5 + $0x5a0] ss:$40 sps:$4 sm:$0xff]   ;;  %v12505_v16 = vld [vmem:[#allocation5 + $0x5f4] ss:$40 sps:$4 sm:$0xff]   ;;  %v12503_v18 = vld [vmem:[#allocation5 + $0x5f0] ss:$40 sps:$4 sm:$0xff]  }
  0x99   :  { %3304 = vmatpush1.bf16.msra.mxu1 %v12430_v27  ;;  %3141 = vmatprep.subr.bf16.mxu0 %v12431_v28  ;;  %v12508_v17 = vld [vmem:[#allocation5 + $0x5fc] ss:$40 sps:$4 sm:$0xff]   ;;  %v12506_v19 = vld [vmem:[#allocation5 + $0x5f8] ss:$40 sps:$4 sm:$0xff]   ;;  %v12514_v21 = vld [vmem:[#allocation5 + $0x64c] ss:$40 sps:$4 sm:$0xff]  }
  0x9a   :  { %3305 = vmatprep.subr.bf16.mxu1 %v12433_v29  ;;  %v12511_v20 = vld [vmem:[#allocation5 + $0x644] ss:$40 sps:$4 sm:$0xff]   ;;  %v12509_v22 = vld [vmem:[#allocation5 + $0x640] ss:$40 sps:$4 sm:$0xff]   ;;  %v12517_v24 = vld [vmem:[#allocation5 + $0x694] ss:$40 sps:$4 sm:$0xff]  }
  0x9b   :  { %v12512_v23 = vld [vmem:[#allocation5 + $0x648] ss:$40 sps:$4 sm:$0xff]   ;;  %v12520_v25 = vld [vmem:[#allocation5 + $0x69c] ss:$40 sps:$4 sm:$0xff]   ;;  %v12518_v27 = vld [vmem:[#allocation5 + $0x698] ss:$40 sps:$4 sm:$0xff]  }
  0x9c   :  { %3142 = vmatpush1.bf16.msra.mxu0 %v12435_v30  ;;  %v12515_v26 = vld [vmem:[#allocation5 + $0x690] ss:$40 sps:$4 sm:$0xff]   ;;  %v12523_v28 = vld [vmem:[#allocation5 + $0x6e4] ss:$40 sps:$4 sm:$0xff]   ;;  %s10720_s13 = sshll.u32 %s14603_s6, 4  ;;  %s10721_s13 = int_to_ptr.vmem [resolvable:$true] %s10720_s13 }
  0x9d   :  { %3306 = vmatpush1.bf16.msra.mxu1 %v12436_v31  ;;  %3143 = vmatprep.subr.bf16.mxu0 %v12437_v32  ;;  %v12526_v29 = vld [vmem:[#allocation5 + $0x6ec] ss:$40 sps:$4 sm:$0xff]   ;;  %v118_v30 = vld [vmem:[#allocation2 + $0x18] sm:$0xff]  ;;  %v12572_v2 = vld [vmem:[#allocation5 + $0x968] ss:$40 sps:$4 sm:$0xff]   ;;  %s14559_s14 = scalar_lea.vmem %s10721_s13, 128  ;;  %p14564_p1 = scmp.lt.s32.totalorder %s10721_s13, %s10721_s13 }
  0x9e   :  { %3307 = vmatprep.subr.bf16.mxu1 %v12439_v33  ;;  %v12521_v31 = vld [vmem:[#allocation5 + $0x6e0] ss:$40 sps:$4 sm:$0xff]   ;;  %v14736_v32 = vpack.c.bf16 %v118_v30, %v118_v30  ;;  %v12547_v46 = vld [vmem:[#allocation5 + $0x824] ss:$40 sps:$4 sm:$0xff]   ;;  %p14560_p0 = scmp.ne.s32.totalorder %s10721_s13, %s14559_s14  ;;  %p14565_p2 = scmp.lt.s32.totalorder %s14559_s14, %s14559_s14 }
  0x9f   :  { %v12524_v33 = vld [vmem:[#allocation5 + $0x6e8] ss:$40 sps:$4 sm:$0xff]  }
  0xa0   :  { %3144 = vmatpush1.bf16.msra.mxu0 %v12441_v34  ;;  %v12529_v34 = vld [vmem:[#allocation5 + $0x734] ss:$40 sps:$4 sm:$0xff]   ;;  %v12605_v30 = vld [vmem:[#allocation5 + $0xb40] ss:$40 sps:$4 sm:$0xff]   ;;  %p14566_p3 = por %p14565_p2, %p14564_p1 }
  0xa1   :  { %3308 = vmatpush1.bf16.msra.mxu1 %v12442_v35  ;;  %3145 = vmatprep.subr.bf16.mxu0 %v12443_v36  ;;  %v12532_v35 = vld [vmem:[#allocation5 + $0x73c] ss:$40 sps:$4 sm:$0xff]   ;;  %v12527_v36 = vld [vmem:[#allocation5 + $0x730] ss:$40 sps:$4 sm:$0xff]  }
  0xa2   :  { %3309 = vmatprep.subr.bf16.mxu1 %v12445_v37  ;;  %v12530_v37 = vld [vmem:[#allocation5 + $0x738] ss:$40 sps:$4 sm:$0xff]   ;;  %p14567_p4 = pnand %p14566_p3, %p14560_p0 }
  0xa4   :  { %3146 = vmatpush1.bf16.msra.mxu0 %v12447_v38  ;;  %v12535_v38 = vld [vmem:[#allocation5 + $0x784] ss:$40 sps:$4 sm:$0xff]  }
  0xa5   :  { %3310 = vmatpush1.bf16.msra.mxu1 %v12448_v39  ;;  %3147 = vmatprep.subr.bf16.mxu0 %v12449_v40  ;;  %v12538_v39 = vld [vmem:[#allocation5 + $0x78c] ss:$40 sps:$4 sm:$0xff]   ;;  %v12533_v40 = vld [vmem:[#allocation5 + $0x780] ss:$40 sps:$4 sm:$0xff]  }
  0xa6   :  { %3311 = vmatprep.subr.bf16.mxu1 %v12451_v41  ;;  %v12536_v41 = vld [vmem:[#allocation5 + $0x788] ss:$40 sps:$4 sm:$0xff]  }
  0xa8   :  { %3148 = vmatpush1.bf16.msra.mxu0 %v12453_v42  ;;  %v12541_v42 = vld [vmem:[#allocation5 + $0x7d4] ss:$40 sps:$4 sm:$0xff]  }
  0xa9   :  { %3312 = vmatpush1.bf16.msra.mxu1 %v12454_v43  ;;  %3149 = vmatprep.subr.bf16.mxu0 %v12455_v44  ;;  %v12544_v43 = vld [vmem:[#allocation5 + $0x7dc] ss:$40 sps:$4 sm:$0xff]   ;;  %v12539_v44 = vld [vmem:[#allocation5 + $0x7d0] ss:$40 sps:$4 sm:$0xff]  }
  0xaa   :  { %3313 = vmatprep.subr.bf16.mxu1 %v12457_v45  ;;  %v12542_v45 = vld [vmem:[#allocation5 + $0x7d8] ss:$40 sps:$4 sm:$0xff]  }
  0xac   :  { %3150 = vmatpush1.bf16.msra.mxu0 %v12459_v47  ;;  %v12550_v47 = vld [vmem:[#allocation5 + $0x82c] ss:$40 sps:$4 sm:$0xff]  }
  0xad   :  { %3314 = vmatpush1.bf16.msra.mxu1 %v12460_v49  ;;  %3151 = vmatprep.subr.bf16.mxu0 %v12461_v50  ;;  %v12545_v49 = vld [vmem:[#allocation5 + $0x820] ss:$40 sps:$4 sm:$0xff]  }
  0xae   :  { %3315 = vmatprep.subr.bf16.mxu1 %v12463_v51  ;;  %v12548_v50 = vld [vmem:[#allocation5 + $0x828] ss:$40 sps:$4 sm:$0xff]   ;;  %v12553_v51 = vld [vmem:[#allocation5 + $0x874] ss:$40 sps:$4 sm:$0xff]  }
  0xb0   :  { %3152 = vmatpush1.bf16.msra.mxu0 %v12465_v52  ;;  %v12556_v52 = vld [vmem:[#allocation5 + $0x87c] ss:$40 sps:$4 sm:$0xff]  }
  0xb1   :  { %3316 = vmatpush1.bf16.msra.mxu1 %v12466_v53  ;;  %3153 = vmatprep.subr.bf16.mxu0 %v12467_v54  ;;  %v12551_v53 = vld [vmem:[#allocation5 + $0x870] ss:$40 sps:$4 sm:$0xff]  }
  0xb2   :  { %3317 = vmatprep.subr.bf16.mxu1 %v12469_v55  ;;  %v12554_v54 = vld [vmem:[#allocation5 + $0x878] ss:$40 sps:$4 sm:$0xff]   ;;  %v12559_v55 = vld [vmem:[#allocation5 + $0x8c4] ss:$40 sps:$4 sm:$0xff]  }
  0xb4   :  { %3154 = vmatpush1.bf16.msra.mxu0 %v12471_v56  ;;  %v12562_v56 = vld [vmem:[#allocation5 + $0x8cc] ss:$40 sps:$4 sm:$0xff]  }
  0xb5   :  { %3318 = vmatpush1.bf16.msra.mxu1 %v12472_v57  ;;  %3155 = vmatprep.subr.bf16.mxu0 %v12473_v58  ;;  %v12557_v57 = vld [vmem:[#allocation5 + $0x8c0] ss:$40 sps:$4 sm:$0xff]  }
  0xb6   :  { %3319 = vmatprep.subr.bf16.mxu1 %v12475_v59  ;;  %v12560_v58 = vld [vmem:[#allocation5 + $0x8c8] ss:$40 sps:$4 sm:$0xff]   ;;  %v12565_v59 = vld [vmem:[#allocation5 + $0x914] ss:$40 sps:$4 sm:$0xff]  }
  0xb8   :  { %3156 = vmatpush1.bf16.msra.mxu0 %v12477_v60  ;;  %v12568_v60 = vld [vmem:[#allocation5 + $0x91c] ss:$40 sps:$4 sm:$0xff]  }
  0xb9   :  { %3320 = vmatpush1.bf16.msra.mxu1 %v12478_v61  ;;  %3157 = vmatprep.subr.bf16.mxu0 %v12479_v62  ;;  %v12563_v61 = vld [vmem:[#allocation5 + $0x910] ss:$40 sps:$4 sm:$0xff]  }
  0xba   :  { %3321 = vmatprep.subr.bf16.mxu1 %v12481_v63  ;;  %v12566_v62 = vld [vmem:[#allocation5 + $0x918] ss:$40 sps:$4 sm:$0xff]   ;;  %v12571_v63 = vld [vmem:[#allocation5 + $0x964] ss:$40 sps:$4 sm:$0xff]  }
  0xbc   :  { %3158 = vmatpush1.bf16.msra.mxu0 %v12483_v0  ;;  %v12574_v0 = vld [vmem:[#allocation5 + $0x96c] ss:$40 sps:$4 sm:$0xff]  }
  0xbd   :  { %3322 = vmatpush1.bf16.msra.mxu1 %v12484_v1  ;;  %3168 = vmatprep.subr.bf16.mxu0 %v12487_v3  ;;  %v12569_v1 = vld [vmem:[#allocation5 + $0x960] ss:$40 sps:$4 sm:$0xff]   ;;  %v12577_v3 = vld [vmem:[#allocation5 + $0x9b4] ss:$40 sps:$4 sm:$0xff]  }
  0xbe   :  { %3332 = vmatprep.subr.bf16.mxu1 %v12490_v4  ;;  %v12580_v4 = vld [vmem:[#allocation5 + $0x9bc] ss:$40 sps:$4 sm:$0xff]  }
  0xbf   :  { %3160 = vmatmul.mubr.bf16.vlgmr.msra.gmra.mrb[0].mxu0 %v14732_v5 }
  0xc0   :  { %3324 = vmatmul.mubr.bf16.vlgmr.msra.gmra.mrb[0].mxu1 %v14732_v5  ;;  %3169 = vmatpush1.bf16.msra.mxu0 %v12485_v6  ;;  %v12575_v6 = vld [vmem:[#allocation5 + $0x9b0] ss:$40 sps:$4 sm:$0xff]  }
  0xc1   :  { %3333 = vmatpush1.bf16.msra.mxu1 %v12488_v7  ;;  %3170 = vmatprep.subr.bf16.mxu0 %v12493_v8  ;;  %v12578_v7 = vld [vmem:[#allocation5 + $0x9b8] ss:$40 sps:$4 sm:$0xff]   ;;  %v12583_v8 = vld [vmem:[#allocation5 + $0xa04] ss:$40 sps:$4 sm:$0xff]  }
  0xc2   :  { %3334 = vmatprep.subr.bf16.mxu1 %v12496_v9  ;;  %3200 = vmatprep.mubr.bf16.mxu0 %v14736_v32  ;;  %v117_v9 = vld [vmem:[#allocation2 + $0x10] sm:$0xff] }
  0xc3   :  { %3364 = vmatprep.mubr.bf16.mxu1 %v14736_v32 }
  0xc4   :  { %3171 = vmatpush1.bf16.msra.mxu0 %v12491_v10  ;;  %v12586_v10 = vld [vmem:[#allocation5 + $0xa0c] ss:$40 sps:$4 sm:$0xff]  }
  0xc5   :  { %3335 = vmatpush1.bf16.msra.mxu1 %v12494_v11  ;;  %3172 = vmatprep.subr.bf16.mxu0 %v12499_v12  ;;  %v12581_v11 = vld [vmem:[#allocation5 + $0xa00] ss:$40 sps:$4 sm:$0xff]   ;;  %v14740_v12 = vpack.c.bf16 %v117_v9, %v117_v9 }
  0xc6   :  { %3336 = vmatprep.subr.bf16.mxu1 %v12502_v13  ;;  %v12584_v13 = vld [vmem:[#allocation5 + $0xa08] ss:$40 sps:$4 sm:$0xff]  }
  0xc7   :  { %v12665_v9 = vld [vmem:[#allocation5 + $0xe60] ss:$40 sps:$4 sm:$0xff]  }
  0xc8   :  { %3173 = vmatpush1.bf16.msra.mxu0 %v12497_v14  ;;  %v12589_v14 = vld [vmem:[#allocation5 + $0xa54] ss:$40 sps:$4 sm:$0xff]  }
  0xc9   :  { %3337 = vmatpush1.bf16.msra.mxu1 %v12500_v15  ;;  %3174 = vmatprep.subr.bf16.mxu0 %v12505_v16  ;;  %v12592_v15 = vld [vmem:[#allocation5 + $0xa5c] ss:$40 sps:$4 sm:$0xff]   ;;  %v120_v16 = vld [vmem:[#allocation2 + $0x28] sm:$0xff] }
  0xca   :  { %3338 = vmatprep.subr.bf16.mxu1 %v12508_v17  ;;  %v14742_v17 = vpack.c.bf16 %v120_v16, %v120_v16  ;;  %v119_v16 = vld [vmem:[#allocation2 + $0x20] sm:$0xff] }
  0xcc   :  { %3175 = vmatpush1.bf16.msra.mxu0 %v12503_v18  ;;  %v12587_v18 = vld [vmem:[#allocation5 + $0xa50] ss:$40 sps:$4 sm:$0xff]  }
  0xcd   :  { %3339 = vmatpush1.bf16.msra.mxu1 %v12506_v19  ;;  %3176 = vmatprep.subr.bf16.mxu0 %v12511_v20  ;;  %v12590_v19 = vld [vmem:[#allocation5 + $0xa58] ss:$40 sps:$4 sm:$0xff]   ;;  %v12595_v20 = vld [vmem:[#allocation5 + $0xaa4] ss:$40 sps:$4 sm:$0xff]  }
  0xce   :  { %3340 = vmatprep.subr.bf16.mxu1 %v12514_v21  ;;  %v12598_v21 = vld [vmem:[#allocation5 + $0xaac] ss:$40 sps:$4 sm:$0xff]  }
  0xd0   :  { %3177 = vmatpush1.bf16.msra.mxu0 %v12509_v22  ;;  %v12593_v22 = vld [vmem:[#allocation5 + $0xaa0] ss:$40 sps:$4 sm:$0xff]  }
  0xd1   :  { %3341 = vmatpush1.bf16.msra.mxu1 %v12512_v23  ;;  %3178 = vmatprep.subr.bf16.mxu0 %v12517_v24  ;;  %v12596_v23 = vld [vmem:[#allocation5 + $0xaa8] ss:$40 sps:$4 sm:$0xff]   ;;  %v12601_v24 = vld [vmem:[#allocation5 + $0xaf4] ss:$40 sps:$4 sm:$0xff]  }
  0xd2   :  { %3342 = vmatprep.subr.bf16.mxu1 %v12520_v25  ;;  %v12604_v25 = vld [vmem:[#allocation5 + $0xafc] ss:$40 sps:$4 sm:$0xff]  }
  0xd4   :  { %3179 = vmatpush1.bf16.msra.mxu0 %v12515_v26  ;;  %v12599_v26 = vld [vmem:[#allocation5 + $0xaf0] ss:$40 sps:$4 sm:$0xff]  }
  0xd5   :  { %3343 = vmatpush1.bf16.msra.mxu1 %v12518_v27  ;;  %3180 = vmatprep.subr.bf16.mxu0 %v12523_v28  ;;  %v12602_v27 = vld [vmem:[#allocation5 + $0xaf8] ss:$40 sps:$4 sm:$0xff]   ;;  %v12607_v28 = vld [vmem:[#allocation5 + $0xb44] ss:$40 sps:$4 sm:$0xff]  }
  0xd6   :  { %3344 = vmatprep.subr.bf16.mxu1 %v12526_v29  ;;  %v12610_v29 = vld [vmem:[#allocation5 + $0xb4c] ss:$40 sps:$4 sm:$0xff]  }
  0xd8   :  { %3181 = vmatpush1.bf16.msra.mxu0 %v12521_v31  ;;  %v12608_v31 = vld [vmem:[#allocation5 + $0xb48] ss:$40 sps:$4 sm:$0xff]  }
  0xd9   :  { %3345 = vmatpush1.bf16.msra.mxu1 %v12524_v33  ;;  %3182 = vmatprep.subr.bf16.mxu0 %v12529_v34  ;;  %v12613_v33 = vld [vmem:[#allocation5 + $0xb94] ss:$40 sps:$4 sm:$0xff]  }
  0xda   :  { %3346 = vmatprep.subr.bf16.mxu1 %v12532_v35  ;;  %v12616_v34 = vld [vmem:[#allocation5 + $0xb9c] ss:$40 sps:$4 sm:$0xff]   ;;  %v12611_v35 = vld [vmem:[#allocation5 + $0xb90] ss:$40 sps:$4 sm:$0xff]  }
  0xdc   :  { %3183 = vmatpush1.bf16.msra.mxu0 %v12527_v36  ;;  %v12614_v36 = vld [vmem:[#allocation5 + $0xb98] ss:$40 sps:$4 sm:$0xff]  }
  0xdd   :  { %3347 = vmatpush1.bf16.msra.mxu1 %v12530_v37  ;;  %3184 = vmatprep.subr.bf16.mxu0 %v12535_v38  ;;  %v12619_v37 = vld [vmem:[#allocation5 + $0xbe4] ss:$40 sps:$4 sm:$0xff]  }
  0xde   :  { %3348 = vmatprep.subr.bf16.mxu1 %v12538_v39  ;;  %v12622_v38 = vld [vmem:[#allocation5 + $0xbec] ss:$40 sps:$4 sm:$0xff]   ;;  %v12617_v39 = vld [vmem:[#allocation5 + $0xbe0] ss:$40 sps:$4 sm:$0xff]  }
  0xe0   :  { %3185 = vmatpush1.bf16.msra.mxu0 %v12533_v40  ;;  %v12620_v40 = vld [vmem:[#allocation5 + $0xbe8] ss:$40 sps:$4 sm:$0xff]  }
  0xe1   :  { %3349 = vmatpush1.bf16.msra.mxu1 %v12536_v41  ;;  %3186 = vmatprep.subr.bf16.mxu0 %v12541_v42  ;;  %v12625_v41 = vld [vmem:[#allocation5 + $0xc34] ss:$40 sps:$4 sm:$0xff]  }
  0xe2   :  { %3350 = vmatprep.subr.bf16.mxu1 %v12544_v43  ;;  %v12628_v42 = vld [vmem:[#allocation5 + $0xc3c] ss:$40 sps:$4 sm:$0xff]   ;;  %v12623_v43 = vld [vmem:[#allocation5 + $0xc30] ss:$40 sps:$4 sm:$0xff]  }
  0xe4   :  { %3187 = vmatpush1.bf16.msra.mxu0 %v12539_v44  ;;  %v12626_v44 = vld [vmem:[#allocation5 + $0xc38] ss:$40 sps:$4 sm:$0xff]  }
  0xe5   :  { %3351 = vmatpush1.bf16.msra.mxu1 %v12542_v45  ;;  %3188 = vmatprep.subr.bf16.mxu0 %v12547_v46  ;;  %v12631_v45 = vld [vmem:[#allocation5 + $0xc84] ss:$40 sps:$4 sm:$0xff]  }
  0xe6   :  { %3352 = vmatprep.subr.bf16.mxu1 %v12550_v47  ;;  %v12634_v46 = vld [vmem:[#allocation5 + $0xc8c] ss:$40 sps:$4 sm:$0xff]   ;;  %v12629_v47 = vld [vmem:[#allocation5 + $0xc80] ss:$40 sps:$4 sm:$0xff]  }
  0xe8   :  { %3189 = vmatpush1.bf16.msra.mxu0 %v12545_v49  ;;  %v12632_v49 = vld [vmem:[#allocation5 + $0xc88] ss:$40 sps:$4 sm:$0xff]  }
  0xe9   :  { %3353 = vmatpush1.bf16.msra.mxu1 %v12548_v50  ;;  %3190 = vmatprep.subr.bf16.mxu0 %v12553_v51  ;;  %v12637_v50 = vld [vmem:[#allocation5 + $0xcd4] ss:$40 sps:$4 sm:$0xff]  }
  0xea   :  { %3354 = vmatprep.subr.bf16.mxu1 %v12556_v52  ;;  %v12640_v51 = vld [vmem:[#allocation5 + $0xcdc] ss:$40 sps:$4 sm:$0xff]   ;;  %v12635_v52 = vld [vmem:[#allocation5 + $0xcd0] ss:$40 sps:$4 sm:$0xff]  }
  0xec   :  { %3191 = vmatpush1.bf16.msra.mxu0 %v12551_v53  ;;  %v12638_v53 = vld [vmem:[#allocation5 + $0xcd8] ss:$40 sps:$4 sm:$0xff]  }
  0xed   :  { %3355 = vmatpush1.bf16.msra.mxu1 %v12554_v54  ;;  %3192 = vmatprep.subr.bf16.mxu0 %v12559_v55  ;;  %v12643_v54 = vld [vmem:[#allocation5 + $0xd24] ss:$40 sps:$4 sm:$0xff]  }
  0xee   :  { %3356 = vmatprep.subr.bf16.mxu1 %v12562_v56  ;;  %v12646_v55 = vld [vmem:[#allocation5 + $0xd2c] ss:$40 sps:$4 sm:$0xff]   ;;  %v12641_v56 = vld [vmem:[#allocation5 + $0xd20] ss:$40 sps:$4 sm:$0xff]  }
  0xf0   :  { %3193 = vmatpush1.bf16.msra.mxu0 %v12557_v57  ;;  %v12644_v57 = vld [vmem:[#allocation5 + $0xd28] ss:$40 sps:$4 sm:$0xff]  }
  0xf1   :  { %3357 = vmatpush1.bf16.msra.mxu1 %v12560_v58  ;;  %3194 = vmatprep.subr.bf16.mxu0 %v12565_v59  ;;  %v12649_v58 = vld [vmem:[#allocation5 + $0xd74] ss:$40 sps:$4 sm:$0xff]  }
  0xf2   :  { %3358 = vmatprep.subr.bf16.mxu1 %v12568_v60  ;;  %v12652_v59 = vld [vmem:[#allocation5 + $0xd7c] ss:$40 sps:$4 sm:$0xff]   ;;  %v12647_v60 = vld [vmem:[#allocation5 + $0xd70] ss:$40 sps:$4 sm:$0xff]  }
  0xf4   :  { %3195 = vmatpush1.bf16.msra.mxu0 %v12563_v61  ;;  %v12650_v61 = vld [vmem:[#allocation5 + $0xd78] ss:$40 sps:$4 sm:$0xff]  }
  0xf5   :  { %3359 = vmatpush1.bf16.msra.mxu1 %v12566_v62  ;;  %3196 = vmatprep.subr.bf16.mxu0 %v12571_v63  ;;  %v12655_v62 = vld [vmem:[#allocation5 + $0xdc4] ss:$40 sps:$4 sm:$0xff]  }
  0xf6   :  { %3360 = vmatprep.subr.bf16.mxu1 %v12574_v0  ;;  %v12658_v63 = vld [vmem:[#allocation5 + $0xdcc] ss:$40 sps:$4 sm:$0xff]   ;;  %v12653_v0 = vld [vmem:[#allocation5 + $0xdc0] ss:$40 sps:$4 sm:$0xff]  }
  0xf8   :  { %3197 = vmatpush1.bf16.msra.mxu0 %v12569_v1  ;;  %v12656_v1 = vld [vmem:[#allocation5 + $0xdc8] ss:$40 sps:$4 sm:$0xff]  }
  0xf9   :  { %3361 = vmatpush1.bf16.msra.mxu1 %v12572_v2  ;;  %3198 = vmatprep.subr.bf16.mxu0 %v12577_v3  ;;  %v12661_v2 = vld [vmem:[#allocation5 + $0xe14] ss:$40 sps:$4 sm:$0xff]  }
  0xfa   :  { %3362 = vmatprep.subr.bf16.mxu1 %v12580_v4  ;;  %v12664_v3 = vld [vmem:[#allocation5 + $0xe1c] ss:$40 sps:$4 sm:$0xff]   ;;  %v12659_v4 = vld [vmem:[#allocation5 + $0xe10] ss:$40 sps:$4 sm:$0xff]  }
  0xfc   :  { %3199 = vmatpush1.bf16.msra.mxu0 %v12575_v6  ;;  %v12662_v6 = vld [vmem:[#allocation5 + $0xe18] ss:$40 sps:$4 sm:$0xff]  }
  0xfd   :  { %3363 = vmatpush1.bf16.msra.mxu1 %v12578_v7  ;;  %3209 = vmatprep.subr.bf16.mxu0 %v12583_v8  ;;  %v12667_v7 = vld [vmem:[#allocation5 + $0xe64] ss:$40 sps:$4 sm:$0xff]  }
  0xfe   :  { %3373 = vmatprep.subr.bf16.mxu1 %v12586_v10  ;;  %v12670_v8 = vld [vmem:[#allocation5 + $0xe6c] ss:$40 sps:$4 sm:$0xff]   ;;  %v12668_v10 = vld [vmem:[#allocation5 + $0xe68] ss:$40 sps:$4 sm:$0xff]  }
  0xff   :  { %3201 = vmatmul.mubr.bf16.vlgmr.msra.gmra.mrb[0].mxu0 %v14740_v12 }
 0x100   :  { %3365 = vmatmul.mubr.bf16.vlgmr.msra.gmra.mrb[0].mxu1 %v14740_v12  ;;  %3210 = vmatpush1.bf16.msra.mxu0 %v12581_v11  ;;  %v12673_v11 = vld [vmem:[#allocation5 + $0xeb4] ss:$40 sps:$4 sm:$0xff]  }
 0x101   :  { %3374 = vmatpush1.bf16.msra.mxu1 %v12584_v13  ;;  %3211 = vmatprep.subr.bf16.mxu0 %v12589_v14  ;;  %v12676_v13 = vld [vmem:[#allocation5 + $0xebc] ss:$40 sps:$4 sm:$0xff]   ;;  %v12671_v14 = vld [vmem:[#allocation5 + $0xeb0] ss:$40 sps:$4 sm:$0xff]  }
 0x102   :  { %3375 = vmatprep.subr.bf16.mxu1 %v12592_v15  ;;  %3241 = vmatprep.mubr.bf16.mxu0 %v14742_v17  ;;  %v12674_v15 = vld [vmem:[#allocation5 + $0xeb8] ss:$40 sps:$4 sm:$0xff]  }
 0x103   :  { %3405 = vmatprep.mubr.bf16.mxu1 %v14742_v17 }
 0x104   :  { %3212 = vmatpush1.bf16.msra.mxu0 %v12587_v18  ;;  %v12679_v18 = vld [vmem:[#allocation5 + $0xf04] ss:$40 sps:$4 sm:$0xff]  }
 0x105   :  { %3376 = vmatpush1.bf16.msra.mxu1 %v12590_v19  ;;  %3213 = vmatprep.subr.bf16.mxu0 %v12595_v20  ;;  %v12682_v19 = vld [vmem:[#allocation5 + $0x1c] ss:$40 sps:$4 sm:$0xff]   ;;  %v14748_v20 = vpack.c.bf16 %v119_v16, %v119_v16 }
 0x106   :  { %3377 = vmatprep.subr.bf16.mxu1 %v12598_v21  ;;  %v12677_v21 = vld [vmem:[#allocation5 + $0xf00] ss:$40 sps:$4 sm:$0xff]   ;;  %v12760_v16 = vld [vmem:[#allocation5 + $0x334] ss:$40 sps:$4 sm:$0xff]  }
 0x108   :  { %3214 = vmatpush1.bf16.msra.mxu0 %v12593_v22  ;;  %v12680_v22 = vld [vmem:[#allocation5 + $0x18] ss:$40 sps:$4 sm:$0xff]  }
 0x109   :  { %3378 = vmatpush1.bf16.msra.mxu1 %v12596_v23  ;;  %3215 = vmatprep.subr.bf16.mxu0 %v12601_v24  ;;  %v12685_v23 = vld [vmem:[#allocation5 + $0x6c] ss:$40 sps:$4 sm:$0xff]  }
 0x10a   :  { %3379 = vmatprep.subr.bf16.mxu1 %v12604_v25  ;;  %v12691_v24 = vld [vmem:[#allocation5 + $0xf0c] ss:$40 sps:$4 sm:$0xff]   ;;  %v12683_v25 = vld [vmem:[#allocation5 + $0x68] ss:$40 sps:$4 sm:$0xff]  }
 0x10c   :  { %3216 = vmatpush1.bf16.msra.mxu0 %v12599_v26  ;;  %v12688_v26 = vld [vmem:[#allocation5 + $0xbc] ss:$40 sps:$4 sm:$0xff]  }
 0x10d   :  { %3380 = vmatpush1.bf16.msra.mxu1 %v12602_v27  ;;  %3217 = vmatprep.subr.bf16.mxu0 %v12607_v28  ;;  %v14602_v27 = vmov 0   ;;  %v12686_v28 = vld [vmem:[#allocation5 + $0xb8] ss:$40 sps:$4 sm:$0xff]  }
 0x10e   :  { %3381 = vmatprep.subr.bf16.mxu1 %v12610_v29  ;;  %v121_v29 = vld [vmem:[#allocation2 + $0x30] sm:$0xff] }
 0x110   :  { %3218 = vmatpush1.bf16.msra.mxu0 %v12605_v30  ;;  %v12694_v30 = vld [vmem:[#allocation5 + $0x10c] ss:$40 sps:$4 sm:$0xff]  }
 0x111   :  { %3382 = vmatpush1.bf16.msra.mxu1 %v12608_v31  ;;  %3219 = vmatprep.subr.bf16.mxu0 %v12613_v33  ;;  %v14754_v31 = vpack.c.bf16 %v121_v29, %v121_v29  ;;  %v12689_v33 = vld [vmem:[#allocation5 + $0xf08] ss:$40 sps:$4 sm:$0xff]  }
 0x112   :  { %3383 = vmatprep.subr.bf16.mxu1 %v12616_v34  ;;  %v12692_v34 = vld [vmem:[#allocation5 + $0x108] ss:$40 sps:$4 sm:$0xff]  }
 0x113   :  { %v12770_v29 = vld [vmem:[#allocation5 + $0x3d0] ss:$40 sps:$4 sm:$0xff]  }
 0x114   :  { %3220 = vmatpush1.bf16.msra.mxu0 %v12611_v35  ;;  %v12697_v35 = vld [vmem:[#allocation5 + $0x15c] ss:$40 sps:$4 sm:$0xff]  }
 0x115   :  { %3384 = vmatpush1.bf16.msra.mxu1 %v12614_v36  ;;  %3221 = vmatprep.subr.bf16.mxu0 %v12619_v37  ;;  %v12700_v36 = vld [vmem:[#allocation5 + $0x14] ss:$40 sps:$4 sm:$0xff]   ;;  %v12695_v37 = vld [vmem:[#allocation5 + $0x158] ss:$40 sps:$4 sm:$0xff]  }
 0x116   :  { %3385 = vmatprep.subr.bf16.mxu1 %v12622_v38  ;;  %v12703_v38 = vld [vmem:[#allocation5 + $0x1ac] ss:$40 sps:$4 sm:$0xff]  }
 0x118   :  { %3222 = vmatpush1.bf16.msra.mxu0 %v12617_v39  ;;  %v12698_v39 = vld [vmem:[#allocation5 + $0x10] ss:$40 sps:$4 sm:$0xff]  }
 0x119   :  { %3386 = vmatpush1.bf16.msra.mxu1 %v12620_v40  ;;  %3223 = vmatprep.subr.bf16.mxu0 %v12625_v41  ;;  %v12701_v40 = vld [vmem:[#allocation5 + $0x1a8] ss:$40 sps:$4 sm:$0xff]   ;;  %v12706_v41 = vld [vmem:[#allocation5 + $0x64] ss:$40 sps:$4 sm:$0xff]  }
 0x11a   :  { %3387 = vmatprep.subr.bf16.mxu1 %v12628_v42  ;;  %v12709_v42 = vld [vmem:[#allocation5 + $0x1fc] ss:$40 sps:$4 sm:$0xff]  }
 0x11c   :  { %3224 = vmatpush1.bf16.msra.mxu0 %v12623_v43  ;;  %v12704_v43 = vld [vmem:[#allocation5 + $0x60] ss:$40 sps:$4 sm:$0xff]  }
 0x11d   :  { %3388 = vmatpush1.bf16.msra.mxu1 %v12626_v44  ;;  %3225 = vmatprep.subr.bf16.mxu0 %v12631_v45  ;;  %v12707_v44 = vld [vmem:[#allocation5 + $0x1f8] ss:$40 sps:$4 sm:$0xff]   ;;  %v12712_v45 = vld [vmem:[#allocation5 + $0xb4] ss:$40 sps:$4 sm:$0xff]  }
 0x11e   :  { %3389 = vmatprep.subr.bf16.mxu1 %v12634_v46  ;;  %v12715_v46 = vld [vmem:[#allocation5 + $0x24c] ss:$40 sps:$4 sm:$0xff]  }
 0x120   :  { %3226 = vmatpush1.bf16.msra.mxu0 %v12629_v47  ;;  %v12710_v47 = vld [vmem:[#allocation5 + $0xb0] ss:$40 sps:$4 sm:$0xff]  }
 0x121   :  { %3390 = vmatpush1.bf16.msra.mxu1 %v12632_v49  ;;  %3227 = vmatprep.subr.bf16.mxu0 %v12637_v50  ;;  %v12713_v49 = vld [vmem:[#allocation5 + $0x248] ss:$40 sps:$4 sm:$0xff]   ;;  %v12718_v50 = vld [vmem:[#allocation5 + $0x104] ss:$40 sps:$4 sm:$0xff]  }
 0x122   :  { %3391 = vmatprep.subr.bf16.mxu1 %v12640_v51  ;;  %v12721_v51 = vld [vmem:[#allocation5 + $0x29c] ss:$40 sps:$4 sm:$0xff]  }
 0x124   :  { %3228 = vmatpush1.bf16.msra.mxu0 %v12635_v52  ;;  %v12716_v52 = vld [vmem:[#allocation5 + $0x100] ss:$40 sps:$4 sm:$0xff]  }
 0x125   :  { %3392 = vmatpush1.bf16.msra.mxu1 %v12638_v53  ;;  %3229 = vmatprep.subr.bf16.mxu0 %v12643_v54  ;;  %v12719_v53 = vld [vmem:[#allocation5 + $0x298] ss:$40 sps:$4 sm:$0xff]   ;;  %v12724_v54 = vld [vmem:[#allocation5 + $0x154] ss:$40 sps:$4 sm:$0xff]  }
 0x126   :  { %3393 = vmatprep.subr.bf16.mxu1 %v12646_v55  ;;  %v12727_v55 = vld [vmem:[#allocation5 + $0x2ec] ss:$40 sps:$4 sm:$0xff]  }
 0x128   :  { %3230 = vmatpush1.bf16.msra.mxu0 %v12641_v56  ;;  %v12722_v56 = vld [vmem:[#allocation5 + $0x150] ss:$40 sps:$4 sm:$0xff]  }
 0x129   :  { %3394 = vmatpush1.bf16.msra.mxu1 %v12644_v57  ;;  %3231 = vmatprep.subr.bf16.mxu0 %v12649_v58  ;;  %v12725_v57 = vld [vmem:[#allocation5 + $0x2e8] ss:$40 sps:$4 sm:$0xff]   ;;  %v12730_v58 = vld [vmem:[#allocation5 + $0x1a4] ss:$40 sps:$4 sm:$0xff]  }
 0x12a   :  { %3395 = vmatprep.subr.bf16.mxu1 %v12652_v59  ;;  %v12733_v59 = vld [vmem:[#allocation5 + $0x33c] ss:$40 sps:$4 sm:$0xff]  }
 0x12c   :  { %3232 = vmatpush1.bf16.msra.mxu0 %v12647_v60  ;;  %v12728_v60 = vld [vmem:[#allocation5 + $0x1a0] ss:$40 sps:$4 sm:$0xff]  }
 0x12d   :  { %3396 = vmatpush1.bf16.msra.mxu1 %v12650_v61  ;;  %3233 = vmatprep.subr.bf16.mxu0 %v12655_v62  ;;  %v12731_v61 = vld [vmem:[#allocation5 + $0x338] ss:$40 sps:$4 sm:$0xff]   ;;  %v12736_v62 = vld [vmem:[#allocation5 + $0x1f4] ss:$40 sps:$4 sm:$0xff]  }
 0x12e   :  { %3397 = vmatprep.subr.bf16.mxu1 %v12658_v63  ;;  %v12739_v63 = vld [vmem:[#allocation5 + $0x38c] ss:$40 sps:$4 sm:$0xff]  }
 0x130   :  { %3234 = vmatpush1.bf16.msra.mxu0 %v12653_v0  ;;  %v12734_v0 = vld [vmem:[#allocation5 + $0x1f0] ss:$40 sps:$4 sm:$0xff]  }
 0x131   :  { %3398 = vmatpush1.bf16.msra.mxu1 %v12656_v1  ;;  %3235 = vmatprep.subr.bf16.mxu0 %v12661_v2  ;;  %v12737_v1 = vld [vmem:[#allocation5 + $0x388] ss:$40 sps:$4 sm:$0xff]   ;;  %v12742_v2 = vld [vmem:[#allocation5 + $0x244] ss:$40 sps:$4 sm:$0xff]  }
 0x132   :  { %3399 = vmatprep.subr.bf16.mxu1 %v12664_v3  ;;  %v12745_v3 = vld [vmem:[#allocation5 + $0x3dc] ss:$40 sps:$4 sm:$0xff]  }
 0x134   :  { %3236 = vmatpush1.bf16.msra.mxu0 %v12659_v4  ;;  %v12740_v4 = vld [vmem:[#allocation5 + $0x240] ss:$40 sps:$4 sm:$0xff]  }
 0x135   :  { %3400 = vmatpush1.bf16.msra.mxu1 %v12662_v6  ;;  %3237 = vmatprep.subr.bf16.mxu0 %v12667_v7  ;;  %v12743_v6 = vld [vmem:[#allocation5 + $0x3d8] ss:$40 sps:$4 sm:$0xff]   ;;  %v12748_v7 = vld [vmem:[#allocation5 + $0x294] ss:$40 sps:$4 sm:$0xff]  }
 0x136   :  { %3401 = vmatprep.subr.bf16.mxu1 %v12670_v8  ;;  %v12751_v8 = vld [vmem:[#allocation5 + $0x42c] ss:$40 sps:$4 sm:$0xff]  }
 0x138   :  { %3238 = vmatpush1.bf16.msra.mxu0 %v12665_v9  ;;  %v12746_v9 = vld [vmem:[#allocation5 + $0x290] ss:$40 sps:$4 sm:$0xff]  }
 0x139   :  { %3402 = vmatpush1.bf16.msra.mxu1 %v12668_v10  ;;  %3239 = vmatprep.subr.bf16.mxu0 %v12673_v11  ;;  %v12749_v10 = vld [vmem:[#allocation5 + $0x428] ss:$40 sps:$4 sm:$0xff]   ;;  %v12754_v11 = vld [vmem:[#allocation5 + $0x2e4] ss:$40 sps:$4 sm:$0xff]  }
 0x13a   :  { %3403 = vmatprep.subr.bf16.mxu1 %v12676_v13  ;;  %v12757_v13 = vld [vmem:[#allocation5 + $0x47c] ss:$40 sps:$4 sm:$0xff]  }
 0x13c   :  { %3240 = vmatpush1.bf16.msra.mxu0 %v12671_v14  ;;  %v12752_v14 = vld [vmem:[#allocation5 + $0x2e0] ss:$40 sps:$4 sm:$0xff]  }
 0x13d   :  { %3404 = vmatpush1.bf16.msra.mxu1 %v12674_v15  ;;  %3250 = vmatprep.subr.bf16.mxu0 %v12679_v18  ;;  %v12755_v15 = vld [vmem:[#allocation5 + $0x478] ss:$40 sps:$4 sm:$0xff]   ;;  %v12763_v18 = vld [vmem:[#allocation5 + $0x4cc] ss:$40 sps:$4 sm:$0xff]  }
 0x13e   :  { %3619 = vmatprep.subr.bf16.mxu1 %v12682_v19  ;;  %v12758_v19 = vld [vmem:[#allocation5 + $0x330] ss:$40 sps:$4 sm:$0xff]  }
 0x13f   :  { %3242 = vmatmul.mubr.bf16.vlgmr.msra.gmra.mrb[0].mxu0 %v14748_v20 }
 0x140   :  { %3406 = vmatmul.mubr.bf16.vlgmr.msra.gmra.mrb[0].mxu1 %v14748_v20  ;;  %3251 = vmatpush1.bf16.msra.mxu0 %v12677_v21  ;;  %v12761_v21 = vld [vmem:[#allocation5 + $0x4c8] ss:$40 sps:$4 sm:$0xff]  }
 0x141   :  { %3620 = vmatpush1.bf16.msra.mxu1 %v12680_v22  ;;  %3282 = vmatprep.mubr.bf16.mxu0 %v14602_v27  ;;  %v12766_v22 = vld [vmem:[#allocation5 + $0x384] ss:$40 sps:$4 sm:$0xff]  }
 0x142   :  { %3621 = vmatprep.subr.bf16.mxu1 %v12685_v23  ;;  %3414 = vmatprep.subr.bf16.mxu0 %v12691_v24  ;;  %v12769_v23 = vld [vmem:[#allocation5 + $0x51c] ss:$40 sps:$4 sm:$0xff]   ;;  %v12764_v24 = vld [vmem:[#allocation5 + $0x380] ss:$40 sps:$4 sm:$0xff]  }
 0x143   :  { %3651 = vmatprep.mubr.bf16.mxu1 %v14728_v48 }
 0x145   :  { %3622 = vmatpush1.bf16.msra.mxu1 %v12683_v25  ;;  %v12767_v25 = vld [vmem:[#allocation5 + $0x518] ss:$40 sps:$4 sm:$0xff]  }
 0x146   :  { %3623 = vmatprep.subr.bf16.mxu1 %v12688_v26  ;;  %v12772_v26 = vld [vmem:[#allocation5 + $0x3d4] ss:$40 sps:$4 sm:$0xff]  }
 0x149   :  { %3624 = vmatpush1.bf16.msra.mxu1 %v12686_v28  ;;  %v12775_v28 = vld [vmem:[#allocation5 + $0x56c] ss:$40 sps:$4 sm:$0xff]  }
 0x14a   :  { %3625 = vmatprep.subr.bf16.mxu1 %v12694_v30  ;;  %v12773_v30 = vld [vmem:[#allocation5 + $0x568] ss:$40 sps:$4 sm:$0xff]  }
 0x14b   :  { %11222 = vmatmul.mubr.msk.bf16.vlgmr.msra.gmra.mrb[0].mxu0 %vm3123_vm0, %v14754_v31 }
 0x14c   :  { %3415 = vmatpush1.bf16.msra.mxu0 %v12689_v33  ;;  %3446 = vmatprep.mubr.bf16.mxu0 %v14602_v27  ;;  %v12778_v33 = vld [vmem:[#allocation5 + $0x424] ss:$40 sps:$4 sm:$0xff]  }
 0x14d   :  { %3626 = vmatpush1.bf16.msra.mxu1 %v12692_v34  ;;  %3455 = vmatprep.subr.bf16.mxu0 %v12700_v36  ;;  %v12781_v34 = vld [vmem:[#allocation5 + $0x5bc] ss:$40 sps:$4 sm:$0xff]   ;;  %v12779_v36 = vld [vmem:[#allocation5 + $0x5b8] ss:$40 sps:$4 sm:$0xff]  }
 0x14e   :  { %3627 = vmatprep.subr.bf16.mxu1 %v12697_v35  ;;  %v12776_v35 = vld [vmem:[#allocation5 + $0x420] ss:$40 sps:$4 sm:$0xff]  }
 0x151   :  { %3628 = vmatpush1.bf16.msra.mxu1 %v12695_v37  ;;  %v12784_v37 = vld [vmem:[#allocation5 + $0x474] ss:$40 sps:$4 sm:$0xff]  }
 0x152   :  { %3629 = vmatprep.subr.bf16.mxu1 %v12703_v38  ;;  %v12787_v38 = vld [vmem:[#allocation5 + $0x60c] ss:$40 sps:$4 sm:$0xff]  }
 0x153   :  { %11223 = vmatmul.mubr.msk.bf16.vlgmr.msra.gmra.mrb[4].mxu0 %vm3123_vm0, %v14754_v31 }
 0x154   :  { %3456 = vmatpush1.bf16.msra.mxu0 %v12698_v39  ;;  %3487 = vmatprep.mubr.bf16.mxu0 %v14728_v48  ;;  %v12782_v39 = vld [vmem:[#allocation5 + $0x470] ss:$40 sps:$4 sm:$0xff]  }
 0x155   :  { %3630 = vmatpush1.bf16.msra.mxu1 %v12701_v40  ;;  %3457 = vmatprep.subr.bf16.mxu0 %v12706_v41  ;;  %v12785_v40 = vld [vmem:[#allocation5 + $0x608] ss:$40 sps:$4 sm:$0xff]   ;;  %v12790_v41 = vld [vmem:[#allocation5 + $0x4c4] ss:$40 sps:$4 sm:$0xff]  }
 0x156   :  { %3631 = vmatprep.subr.bf16.mxu1 %v12709_v42  ;;  %v12793_v42 = vld [vmem:[#allocation5 + $0x65c] ss:$40 sps:$4 sm:$0xff]  }
 0x158   :  { %3458 = vmatpush1.bf16.msra.mxu0 %v12704_v43  ;;  %v12788_v43 = vld [vmem:[#allocation5 + $0x4c0] ss:$40 sps:$4 sm:$0xff]  }
 0x159   :  { %3632 = vmatpush1.bf16.msra.mxu1 %v12707_v44  ;;  %3459 = vmatprep.subr.bf16.mxu0 %v12712_v45  ;;  %v12791_v44 = vld [vmem:[#allocation5 + $0x658] ss:$40 sps:$4 sm:$0xff]   ;;  %v12796_v45 = vld [vmem:[#allocation5 + $0x514] ss:$40 sps:$4 sm:$0xff]  }
 0x15a   :  { %3633 = vmatprep.subr.bf16.mxu1 %v12715_v46  ;;  %v12799_v46 = vld [vmem:[#allocation5 + $0x6ac] ss:$40 sps:$4 sm:$0xff]  }
 0x15c   :  { %3460 = vmatpush1.bf16.msra.mxu0 %v12710_v47  ;;  %v12794_v47 = vld [vmem:[#allocation5 + $0x510] ss:$40 sps:$4 sm:$0xff]  }
 0x15d   :  { %3634 = vmatpush1.bf16.msra.mxu1 %v12713_v49  ;;  %3461 = vmatprep.subr.bf16.mxu0 %v12718_v50  ;;  %v12797_v49 = vld [vmem:[#allocation5 + $0x6a8] ss:$40 sps:$4 sm:$0xff]   ;;  %v12802_v50 = vld [vmem:[#allocation5 + $0x564] ss:$40 sps:$4 sm:$0xff]  }
 0x15e   :  { %3635 = vmatprep.subr.bf16.mxu1 %v12721_v51  ;;  %v12805_v51 = vld [vmem:[#allocation5 + $0x6fc] ss:$40 sps:$4 sm:$0xff]  }
 0x160   :  { %3462 = vmatpush1.bf16.msra.mxu0 %v12716_v52  ;;  %v12800_v52 = vld [vmem:[#allocation5 + $0x560] ss:$40 sps:$4 sm:$0xff]  }
 0x161   :  { %3636 = vmatpush1.bf16.msra.mxu1 %v12719_v53  ;;  %3463 = vmatprep.subr.bf16.mxu0 %v12724_v54  ;;  %v12803_v53 = vld [vmem:[#allocation5 + $0x6f8] ss:$40 sps:$4 sm:$0xff]   ;;  %v12808_v54 = vld [vmem:[#allocation5 + $0x5b4] ss:$40 sps:$4 sm:$0xff]  }
 0x162   :  { %3637 = vmatprep.subr.bf16.mxu1 %v12727_v55  ;;  %v12811_v55 = vld [vmem:[#allocation5 + $0x74c] ss:$40 sps:$4 sm:$0xff]  }
 0x164   :  { %3464 = vmatpush1.bf16.msra.mxu0 %v12722_v56  ;;  %v12806_v56 = vld [vmem:[#allocation5 + $0x5b0] ss:$40 sps:$4 sm:$0xff]  }
 0x165   :  { %3638 = vmatpush1.bf16.msra.mxu1 %v12725_v57  ;;  %3465 = vmatprep.subr.bf16.mxu0 %v12730_v58  ;;  %v12809_v57 = vld [vmem:[#allocation5 + $0x748] ss:$40 sps:$4 sm:$0xff]   ;;  %v12814_v58 = vld [vmem:[#allocation5 + $0x604] ss:$40 sps:$4 sm:$0xff]  }
 0x166   :  { %3639 = vmatprep.subr.bf16.mxu1 %v12733_v59  ;;  %v12817_v59 = vld [vmem:[#allocation5 + $0x79c] ss:$40 sps:$4 sm:$0xff]  }
 0x168   :  { %3466 = vmatpush1.bf16.msra.mxu0 %v12728_v60  ;;  %v12812_v60 = vld [vmem:[#allocation5 + $0x600] ss:$40 sps:$4 sm:$0xff]  }
 0x169   :  { %3640 = vmatpush1.bf16.msra.mxu1 %v12731_v61  ;;  %3467 = vmatprep.subr.bf16.mxu0 %v12736_v62  ;;  %v12815_v61 = vld [vmem:[#allocation5 + $0x798] ss:$40 sps:$4 sm:$0xff]   ;;  %v12820_v62 = vld [vmem:[#allocation5 + $0x654] ss:$40 sps:$4 sm:$0xff]  }
 0x16a   :  { %3641 = vmatprep.subr.bf16.mxu1 %v12739_v63  ;;  %v12823_v63 = vld [vmem:[#allocation5 + $0x7ec] ss:$40 sps:$4 sm:$0xff]  }
 0x16c   :  { %3468 = vmatpush1.bf16.msra.mxu0 %v12734_v0  ;;  %v12818_v0 = vld [vmem:[#allocation5 + $0x650] ss:$40 sps:$4 sm:$0xff]  }
 0x16d   :  { %3642 = vmatpush1.bf16.msra.mxu1 %v12737_v1  ;;  %3469 = vmatprep.subr.bf16.mxu0 %v12742_v2  ;;  %v12821_v1 = vld [vmem:[#allocation5 + $0x7e8] ss:$40 sps:$4 sm:$0xff]   ;;  %v12826_v2 = vld [vmem:[#allocation5 + $0x6a4] ss:$40 sps:$4 sm:$0xff]  }
 0x16e   :  { %3643 = vmatprep.subr.bf16.mxu1 %v12745_v3  ;;  %v12829_v3 = vld [vmem:[#allocation5 + $0x83c] ss:$40 sps:$4 sm:$0xff]  }
 0x170   :  { %3470 = vmatpush1.bf16.msra.mxu0 %v12740_v4  ;;  %v12824_v4 = vld [vmem:[#allocation5 + $0x6a0] ss:$40 sps:$4 sm:$0xff]  }
 0x171   :  { %3644 = vmatpush1.bf16.msra.mxu1 %v12743_v6  ;;  %3471 = vmatprep.subr.bf16.mxu0 %v12748_v7  ;;  %v12827_v6 = vld [vmem:[#allocation5 + $0x838] ss:$40 sps:$4 sm:$0xff]   ;;  %v12832_v7 = vld [vmem:[#allocation5 + $0x6f4] ss:$40 sps:$4 sm:$0xff]  }
 0x172   :  { %3645 = vmatprep.subr.bf16.mxu1 %v12751_v8  ;;  %v12835_v8 = vld [vmem:[#allocation5 + $0x88c] ss:$40 sps:$4 sm:$0xff]  }
 0x174   :  { %3472 = vmatpush1.bf16.msra.mxu0 %v12746_v9  ;;  %v12830_v9 = vld [vmem:[#allocation5 + $0x6f0] ss:$40 sps:$4 sm:$0xff]  }
 0x175   :  { %3646 = vmatpush1.bf16.msra.mxu1 %v12749_v10  ;;  %3473 = vmatprep.subr.bf16.mxu0 %v12754_v11  ;;  %v12833_v10 = vld [vmem:[#allocation5 + $0x888] ss:$40 sps:$4 sm:$0xff]   ;;  %v12838_v11 = vld [vmem:[#allocation5 + $0x744] ss:$40 sps:$4 sm:$0xff]  }
 0x176   :  { %3647 = vmatprep.subr.bf16.mxu1 %v12757_v13  ;;  %v12841_v13 = vld [vmem:[#allocation5 + $0x8dc] ss:$40 sps:$4 sm:$0xff]  }
 0x178   :  { %3474 = vmatpush1.bf16.msra.mxu0 %v12752_v14  ;;  %v12836_v14 = vld [vmem:[#allocation5 + $0x740] ss:$40 sps:$4 sm:$0xff]  }
 0x179   :  { %3648 = vmatpush1.bf16.msra.mxu1 %v12755_v15  ;;  %3475 = vmatprep.subr.bf16.mxu0 %v12760_v16  ;;  %v12839_v15 = vld [vmem:[#allocation5 + $0x8d8] ss:$40 sps:$4 sm:$0xff]   ;;  %v12844_v16 = vld [vmem:[#allocation5 + $0x794] ss:$40 sps:$4 sm:$0xff]  }
 0x17a   :  { %3649 = vmatprep.subr.bf16.mxu1 %v12763_v18  ;;  %v12847_v18 = vld [vmem:[#allocation5 + $0x92c] ss:$40 sps:$4 sm:$0xff]  }
 0x17c   :  { %3476 = vmatpush1.bf16.msra.mxu0 %v12758_v19  ;;  %v12842_v19 = vld [vmem:[#allocation5 + $0x790] ss:$40 sps:$4 sm:$0xff]  }
 0x17d   :  { %3650 = vmatpush1.bf16.msra.mxu1 %v12761_v21  ;;  %3477 = vmatprep.subr.bf16.mxu0 %v12766_v22  ;;  %v12845_v21 = vld [vmem:[#allocation5 + $0x928] ss:$40 sps:$4 sm:$0xff]   ;;  %v12850_v22 = vld [vmem:[#allocation5 + $0x7e4] ss:$40 sps:$4 sm:$0xff]  }
 0x17e   :  { %3660 = vmatprep.subr.bf16.mxu1 %v12769_v23  ;;  %v12853_v23 = vld [vmem:[#allocation5 + $0x97c] ss:$40 sps:$4 sm:$0xff]  }
 0x180   :  { %3652 = vmatmul.mubr.bf16.vlgmr.msra.gmra.mrb[4].mxu1 %v14732_v5  ;;  %3478 = vmatpush1.bf16.msra.mxu0 %v12764_v24  ;;  %v12848_v24 = vld [vmem:[#allocation5 + $0x7e0] ss:$40 sps:$4 sm:$0xff]  }
 0x181   :  { %3661 = vmatpush1.bf16.msra.mxu1 %v12767_v25  ;;  %3479 = vmatprep.subr.bf16.mxu0 %v12772_v26  ;;  %v12851_v25 = vld [vmem:[#allocation5 + $0x978] ss:$40 sps:$4 sm:$0xff]   ;;  %v12856_v26 = vld [vmem:[#allocation5 + $0x834] ss:$40 sps:$4 sm:$0xff]  }
 0x182   :  { %3662 = vmatprep.subr.bf16.mxu1 %v12775_v28  ;;  %3692 = vmatprep.mubr.bf16.mxu1 %v14736_v32  ;;  %v12859_v28 = vld [vmem:[#allocation5 + $0x9cc] ss:$40 sps:$4 sm:$0xff]  }
 0x184   :  { %3480 = vmatpush1.bf16.msra.mxu0 %v12770_v29  ;;  %v12854_v29 = vld [vmem:[#allocation5 + $0x830] ss:$40 sps:$4 sm:$0xff]  }
 0x185   :  { %3663 = vmatpush1.bf16.msra.mxu1 %v12773_v30  ;;  %3481 = vmatprep.subr.bf16.mxu0 %v12778_v33  ;;  %v12857_v30 = vld [vmem:[#allocation5 + $0x9c8] ss:$40 sps:$4 sm:$0xff]   ;;  %v12862_v33 = vld [vmem:[#allocation5 + $0x884] ss:$40 sps:$4 sm:$0xff]  }
 0x186   :  { %3664 = vmatprep.subr.bf16.mxu1 %v12781_v34  ;;  %v12865_v34 = vld [vmem:[#allocation5 + $0xa1c] ss:$40 sps:$4 sm:$0xff]  }
 0x188   :  { %3482 = vmatpush1.bf16.msra.mxu0 %v12776_v35  ;;  %v12860_v35 = vld [vmem:[#allocation5 + $0x880] ss:$40 sps:$4 sm:$0xff]  }
 0x189   :  { %3665 = vmatpush1.bf16.msra.mxu1 %v12779_v36  ;;  %3483 = vmatprep.subr.bf16.mxu0 %v12784_v37  ;;  %v12863_v36 = vld [vmem:[#allocation5 + $0xa18] ss:$40 sps:$4 sm:$0xff]   ;;  %v12868_v37 = vld [vmem:[#allocation5 + $0x8d4] ss:$40 sps:$4 sm:$0xff]  }
 0x18a   :  { %3666 = vmatprep.subr.bf16.mxu1 %v12787_v38  ;;  %v12871_v38 = vld [vmem:[#allocation5 + $0xa6c] ss:$40 sps:$4 sm:$0xff]  }
 0x18c   :  { %3484 = vmatpush1.bf16.msra.mxu0 %v12782_v39  ;;  %v12866_v39 = vld [vmem:[#allocation5 + $0x8d0] ss:$40 sps:$4 sm:$0xff]  }
 0x18d   :  { %3667 = vmatpush1.bf16.msra.mxu1 %v12785_v40  ;;  %3485 = vmatprep.subr.bf16.mxu0 %v12790_v41  ;;  %v12869_v40 = vld [vmem:[#allocation5 + $0xa68] ss:$40 sps:$4 sm:$0xff]   ;;  %v12874_v41 = vld [vmem:[#allocation5 + $0x924] ss:$40 sps:$4 sm:$0xff]  }
 0x18e   :  { %3668 = vmatprep.subr.bf16.mxu1 %v12793_v42  ;;  %v12877_v42 = vld [vmem:[#allocation5 + $0xabc] ss:$40 sps:$4 sm:$0xff]  }
 0x190   :  { %3486 = vmatpush1.bf16.msra.mxu0 %v12788_v43  ;;  %v12872_v43 = vld [vmem:[#allocation5 + $0x920] ss:$40 sps:$4 sm:$0xff]  }
 0x191   :  { %3669 = vmatpush1.bf16.msra.mxu1 %v12791_v44  ;;  %3496 = vmatprep.subr.bf16.mxu0 %v12796_v45  ;;  %v12875_v44 = vld [vmem:[#allocation5 + $0xab8] ss:$40 sps:$4 sm:$0xff]   ;;  %v12880_v45 = vld [vmem:[#allocation5 + $0x974] ss:$40 sps:$4 sm:$0xff]  }
 0x192   :  { %3670 = vmatprep.subr.bf16.mxu1 %v12799_v46  ;;  %v12883_v46 = vld [vmem:[#allocation5 + $0xb0c] ss:$40 sps:$4 sm:$0xff]  }
 0x193   :  { %3488 = vmatmul.mubr.bf16.vlgmr.msra.gmra.mrb[8].mxu0 %v14732_v5 }
 0x194   :  { %3497 = vmatpush1.bf16.msra.mxu0 %v12794_v47  ;;  %3528 = vmatprep.mubr.bf16.mxu0 %v14736_v32  ;;  %v12878_v47 = vld [vmem:[#allocation5 + $0x970] ss:$40 sps:$4 sm:$0xff]  }
 0x195   :  { %3671 = vmatpush1.bf16.msra.mxu1 %v12797_v49  ;;  %3498 = vmatprep.subr.bf16.mxu0 %v12802_v50  ;;  %v12881_v49 = vld [vmem:[#allocation5 + $0xb08] ss:$40 sps:$4 sm:$0xff]   ;;  %v12886_v50 = vld [vmem:[#allocation5 + $0x9c4] ss:$40 sps:$4 sm:$0xff]  }
 0x196   :  { %3672 = vmatprep.subr.bf16.mxu1 %v12805_v51  ;;  %v12889_v51 = vld [vmem:[#allocation5 + $0xb5c] ss:$40 sps:$4 sm:$0xff]  }
 0x198   :  { %3499 = vmatpush1.bf16.msra.mxu0 %v12800_v52  ;;  %v12884_v52 = vld [vmem:[#allocation5 + $0x9c0] ss:$40 sps:$4 sm:$0xff]  }
 0x199   :  { %3673 = vmatpush1.bf16.msra.mxu1 %v12803_v53  ;;  %3500 = vmatprep.subr.bf16.mxu0 %v12808_v54  ;;  %v12887_v53 = vld [vmem:[#allocation5 + $0xb58] ss:$40 sps:$4 sm:$0xff]   ;;  %v12892_v54 = vld [vmem:[#allocation5 + $0xa14] ss:$40 sps:$4 sm:$0xff]  }
 0x19a   :  { %3674 = vmatprep.subr.bf16.mxu1 %v12811_v55  ;;  %v12895_v55 = vld [vmem:[#allocation5 + $0xbac] ss:$40 sps:$4 sm:$0xff]  }
 0x19c   :  { %3501 = vmatpush1.bf16.msra.mxu0 %v12806_v56  ;;  %v12890_v56 = vld [vmem:[#allocation5 + $0xa10] ss:$40 sps:$4 sm:$0xff]  }
 0x19d   :  { %3675 = vmatpush1.bf16.msra.mxu1 %v12809_v57  ;;  %3502 = vmatprep.subr.bf16.mxu0 %v12814_v58  ;;  %v12893_v57 = vld [vmem:[#allocation5 + $0xba8] ss:$40 sps:$4 sm:$0xff]   ;;  %v12898_v58 = vld [vmem:[#allocation5 + $0xa64] ss:$40 sps:$4 sm:$0xff]  }
 0x19e   :  { %3676 = vmatprep.subr.bf16.mxu1 %v12817_v59  ;;  %v12901_v59 = vld [vmem:[#allocation5 + $0xbfc] ss:$40 sps:$4 sm:$0xff]  }
 0x1a0   :  { %3503 = vmatpush1.bf16.msra.mxu0 %v12812_v60  ;;  %v12896_v60 = vld [vmem:[#allocation5 + $0xa60] ss:$40 sps:$4 sm:$0xff]  }
 0x1a1   :  { %3677 = vmatpush1.bf16.msra.mxu1 %v12815_v61  ;;  %3504 = vmatprep.subr.bf16.mxu0 %v12820_v62  ;;  %v12899_v61 = vld [vmem:[#allocation5 + $0xbf8] ss:$40 sps:$4 sm:$0xff]   ;;  %v12904_v62 = vld [vmem:[#allocation5 + $0xab4] ss:$40 sps:$4 sm:$0xff]  }
 0x1a2   :  { %3678 = vmatprep.subr.bf16.mxu1 %v12823_v63  ;;  %v12907_v63 = vld [vmem:[#allocation5 + $0xc4c] ss:$40 sps:$4 sm:$0xff]  }
 0x1a4   :  { %3505 = vmatpush1.bf16.msra.mxu0 %v12818_v0  ;;  %v12902_v0 = vld [vmem:[#allocation5 + $0xab0] ss:$40 sps:$4 sm:$0xff]  }
 0x1a5   :  { %3679 = vmatpush1.bf16.msra.mxu1 %v12821_v1  ;;  %3506 = vmatprep.subr.bf16.mxu0 %v12826_v2  ;;  %v12905_v1 = vld [vmem:[#allocation5 + $0xc48] ss:$40 sps:$4 sm:$0xff]   ;;  %v12910_v2 = vld [vmem:[#allocation5 + $0xb04] ss:$40 sps:$4 sm:$0xff]  }
 0x1a6   :  { %3680 = vmatprep.subr.bf16.mxu1 %v12829_v3  ;;  %v12913_v3 = vld [vmem:[#allocation5 + $0xc9c] ss:$40 sps:$4 sm:$0xff]  }
 0x1a8   :  { %3507 = vmatpush1.bf16.msra.mxu0 %v12824_v4  ;;  %v12908_v4 = vld [vmem:[#allocation5 + $0xb00] ss:$40 sps:$4 sm:$0xff]  }
 0x1a9   :  { %3681 = vmatpush1.bf16.msra.mxu1 %v12827_v6  ;;  %3508 = vmatprep.subr.bf16.mxu0 %v12832_v7  ;;  %v12911_v6 = vld [vmem:[#allocation5 + $0xc98] ss:$40 sps:$4 sm:$0xff]   ;;  %v12916_v7 = vld [vmem:[#allocation5 + $0xb54] ss:$40 sps:$4 sm:$0xff]  }
 0x1aa   :  { %3682 = vmatprep.subr.bf16.mxu1 %v12835_v8  ;;  %v12919_v8 = vld [vmem:[#allocation5 + $0xcec] ss:$40 sps:$4 sm:$0xff]  }
 0x1ac   :  { %3509 = vmatpush1.bf16.msra.mxu0 %v12830_v9  ;;  %v12914_v9 = vld [vmem:[#allocation5 + $0xb50] ss:$40 sps:$4 sm:$0xff]  }
 0x1ad   :  { %3683 = vmatpush1.bf16.msra.mxu1 %v12833_v10  ;;  %3510 = vmatprep.subr.bf16.mxu0 %v12838_v11  ;;  %v12917_v10 = vld [vmem:[#allocation5 + $0xce8] ss:$40 sps:$4 sm:$0xff]   ;;  %v12922_v11 = vld [vmem:[#allocation5 + $0xba4] ss:$40 sps:$4 sm:$0xff]  }
 0x1ae   :  { %3684 = vmatprep.subr.bf16.mxu1 %v12841_v13  ;;  %v12925_v13 = vld [vmem:[#allocation5 + $0xd3c] ss:$40 sps:$4 sm:$0xff]  }
 0x1b0   :  { %3511 = vmatpush1.bf16.msra.mxu0 %v12836_v14  ;;  %v12920_v14 = vld [vmem:[#allocation5 + $0xba0] ss:$40 sps:$4 sm:$0xff]  }
 0x1b1   :  { %3685 = vmatpush1.bf16.msra.mxu1 %v12839_v15  ;;  %3512 = vmatprep.subr.bf16.mxu0 %v12844_v16  ;;  %v12923_v15 = vld [vmem:[#allocation5 + $0xd38] ss:$40 sps:$4 sm:$0xff]   ;;  %v12928_v16 = vld [vmem:[#allocation5 + $0xbf4] ss:$40 sps:$4 sm:$0xff]  }
 0x1b2   :  { %3686 = vmatprep.subr.bf16.mxu1 %v12847_v18  ;;  %v12931_v18 = vld [vmem:[#allocation5 + $0xd8c] ss:$40 sps:$4 sm:$0xff]  }
 0x1b4   :  { %3513 = vmatpush1.bf16.msra.mxu0 %v12842_v19  ;;  %v12926_v19 = vld [vmem:[#allocation5 + $0xbf0] ss:$40 sps:$4 sm:$0xff]  }
 0x1b5   :  { %3687 = vmatpush1.bf16.msra.mxu1 %v12845_v21  ;;  %3514 = vmatprep.subr.bf16.mxu0 %v12850_v22  ;;  %v12929_v21 = vld [vmem:[#allocation5 + $0xd88] ss:$40 sps:$4 sm:$0xff]   ;;  %v12934_v22 = vld [vmem:[#allocation5 + $0xc44] ss:$40 sps:$4 sm:$0xff]  }
 0x1b6   :  { %3688 = vmatprep.subr.bf16.mxu1 %v12853_v23  ;;  %v12937_v23 = vld [vmem:[#allocation5 + $0xddc] ss:$40 sps:$4 sm:$0xff]  }
 0x1b8   :  { %3515 = vmatpush1.bf16.msra.mxu0 %v12848_v24  ;;  %v12932_v24 = vld [vmem:[#allocation5 + $0xc40] ss:$40 sps:$4 sm:$0xff]  }
 0x1b9   :  { %3689 = vmatpush1.bf16.msra.mxu1 %v12851_v25  ;;  %3516 = vmatprep.subr.bf16.mxu0 %v12856_v26  ;;  %v12935_v25 = vld [vmem:[#allocation5 + $0xdd8] ss:$40 sps:$4 sm:$0xff]   ;;  %v12940_v26 = vld [vmem:[#allocation5 + $0xc94] ss:$40 sps:$4 sm:$0xff]  }
 0x1ba   :  { %3690 = vmatprep.subr.bf16.mxu1 %v12859_v28  ;;  %v12943_v28 = vld [vmem:[#allocation5 + $0xe2c] ss:$40 sps:$4 sm:$0xff]  }
 0x1bc   :  { %3517 = vmatpush1.bf16.msra.mxu0 %v12854_v29  ;;  %v12938_v29 = vld [vmem:[#allocation5 + $0xc90] ss:$40 sps:$4 sm:$0xff]  }
 0x1bd   :  { %3691 = vmatpush1.bf16.msra.mxu1 %v12857_v30  ;;  %3518 = vmatprep.subr.bf16.mxu0 %v12862_v33  ;;  %v12941_v30 = vld [vmem:[#allocation5 + $0xe28] ss:$40 sps:$4 sm:$0xff]   ;;  %v12946_v33 = vld [vmem:[#allocation5 + $0xce4] ss:$40 sps:$4 sm:$0xff]  }
 0x1be   :  { %3701 = vmatprep.subr.bf16.mxu1 %v12865_v34  ;;  %v12949_v34 = vld [vmem:[#allocation5 + $0xe7c] ss:$40 sps:$4 sm:$0xff]  }
 0x1c0   :  { %3693 = vmatmul.mubr.bf16.vlgmr.msra.gmra.mrb[4].mxu1 %v14740_v12  ;;  %3519 = vmatpush1.bf16.msra.mxu0 %v12860_v35  ;;  %v12944_v35 = vld [vmem:[#allocation5 + $0xce0] ss:$40 sps:$4 sm:$0xff]  }
 0x1c1   :  { %3702 = vmatpush1.bf16.msra.mxu1 %v12863_v36  ;;  %3520 = vmatprep.subr.bf16.mxu0 %v12868_v37  ;;  %v12947_v36 = vld [vmem:[#allocation5 + $0xe78] ss:$40 sps:$4 sm:$0xff]   ;;  %v12952_v37 = vld [vmem:[#allocation5 + $0xd34] ss:$40 sps:$4 sm:$0xff]  }
 0x1c2   :  { %3703 = vmatprep.subr.bf16.mxu1 %v12871_v38  ;;  %3733 = vmatprep.mubr.bf16.mxu1 %v14742_v17  ;;  %v12955_v38 = vld [vmem:[#allocation5 + $0xecc] ss:$40 sps:$4 sm:$0xff]  }
 0x1c4   :  { %3521 = vmatpush1.bf16.msra.mxu0 %v12866_v39  ;;  %v12950_v39 = vld [vmem:[#allocation5 + $0xd30] ss:$40 sps:$4 sm:$0xff]  }
 0x1c5   :  { %3704 = vmatpush1.bf16.msra.mxu1 %v12869_v40  ;;  %3522 = vmatprep.subr.bf16.mxu0 %v12874_v41  ;;  %v12953_v40 = vld [vmem:[#allocation5 + $0xec8] ss:$40 sps:$4 sm:$0xff]   ;;  %v12958_v41 = vld [vmem:[#allocation5 + $0xd84] ss:$40 sps:$4 sm:$0xff]  }
 0x1c6   :  { %3705 = vmatprep.subr.bf16.mxu1 %v12877_v42  ;;  %v12967_v42 = vld [vmem:[#allocation5 + $0xf1c] ss:$40 sps:$4 sm:$0xff]  }
 0x1c8   :  { %3523 = vmatpush1.bf16.msra.mxu0 %v12872_v43  ;;  %v12956_v43 = vld [vmem:[#allocation5 + $0xd80] ss:$40 sps:$4 sm:$0xff]  }
 0x1c9   :  { %3706 = vmatpush1.bf16.msra.mxu1 %v12875_v44  ;;  %3524 = vmatprep.subr.bf16.mxu0 %v12880_v45  ;;  %v12961_v44 = vld [vmem:[#allocation5 + $0xdd4] ss:$40 sps:$4 sm:$0xff]   ;;  %v12965_v45 = vld [vmem:[#allocation5 + $0xf18] ss:$40 sps:$4 sm:$0xff]  }
 0x1ca   :  { %3707 = vmatprep.subr.bf16.mxu1 %v12883_v46  ;;  %v12973_v46 = vld [vmem:[#allocation8 + $0x4] ss:$40 sps:$4 sm:$0xff]  }
 0x1cc   :  { %3525 = vmatpush1.bf16.msra.mxu0 %v12878_v47  ;;  %v12959_v47 = vld [vmem:[#allocation5 + $0xdd0] ss:$40 sps:$4 sm:$0xff]  }
 0x1cd   :  { %3708 = vmatpush1.bf16.msra.mxu1 %v12881_v49  ;;  %3526 = vmatprep.subr.bf16.mxu0 %v12886_v50  ;;  %v12964_v49 = vld [vmem:[#allocation5 + $0xe24] ss:$40 sps:$4 sm:$0xff]   ;;  %v12962_v50 = vld [vmem:[#allocation5 + $0xe20] ss:$40 sps:$4 sm:$0xff]  }
 0x1ce   :  { %3709 = vmatprep.subr.bf16.mxu1 %v12889_v51  ;;  %v12970_v51 = vld [vmem:[#allocation5 + $0xe74] ss:$40 sps:$4 sm:$0xff]  }
 0x1d0   :  { %3527 = vmatpush1.bf16.msra.mxu0 %v12884_v52  ;;  %v12968_v52 = vld [vmem:[#allocation5 + $0xe70] ss:$40 sps:$4 sm:$0xff]  }
 0x1d1   :  { %3710 = vmatpush1.bf16.msra.mxu1 %v12887_v53  ;;  %3537 = vmatprep.subr.bf16.mxu0 %v12892_v54  ;;  %v12971_v53 = vld [vmem:[#allocation8] ss:$40 sps:$4 sm:$0xff]  }
 0x1d2   :  { %3711 = vmatprep.subr.bf16.mxu1 %v12895_v55  ;;  %v12976_v54 = vld [vmem:[#allocation5 + $0xec4] ss:$40 sps:$4 sm:$0xff]  }
 0x1d3   :  { %3529 = vmatmul.mubr.bf16.vlgmr.msra.gmra.mrb[8].mxu0 %v14740_v12  ;;  %v12979_v55 = vld [vmem:[#allocation8 + $0x54] ss:$40 sps:$4 sm:$0xff]  }
 0x1d4   :  { %3538 = vmatpush1.bf16.msra.mxu0 %v12890_v56  ;;  %3569 = vmatprep.mubr.bf16.mxu0 %v14742_v17  ;;  %v12974_v56 = vld [vmem:[#allocation5 + $0xec0] ss:$40 sps:$4 sm:$0xff]  }
 0x1d5   :  { %3712 = vmatpush1.bf16.msra.mxu1 %v12893_v57  ;;  %3539 = vmatprep.subr.bf16.mxu0 %v12898_v58  ;;  %v12977_v57 = vld [vmem:[#allocation8 + $0x50] ss:$40 sps:$4 sm:$0xff]  }
 0x1d6   :  { %3713 = vmatprep.subr.bf16.mxu1 %v12901_v59  ;;  %v12982_v58 = vld [vmem:[#allocation5 + $0xf14] ss:$40 sps:$4 sm:$0xff]  }
 0x1d7   :  { %v12985_v59 = vld [vmem:[#allocation8 + $0xa4] ss:$40 sps:$4 sm:$0xff]  }
 0x1d8   :  { %3540 = vmatpush1.bf16.msra.mxu0 %v12896_v60  ;;  %v12980_v60 = vld [vmem:[#allocation5 + $0xf10] ss:$40 sps:$4 sm:$0xff]  }
 0x1d9   :  { %3714 = vmatpush1.bf16.msra.mxu1 %v12899_v61  ;;  %3541 = vmatprep.subr.bf16.mxu0 %v12904_v62  ;;  %v12983_v61 = vld [vmem:[#allocation8 + $0xa0] ss:$40 sps:$4 sm:$0xff]   ;;  %v12988_v62 = vld [vmem:[#allocation8 + $0xf4] ss:$40 sps:$4 sm:$0xff]  }
 0x1da   :  { %3715 = vmatprep.subr.bf16.mxu1 %v12907_v63  ;;  %v12994_v63 = vld [vmem:[#allocation5 + $0x24] ss:$40 sps:$4 sm:$0xff]  }
 0x1dc   :  { %3542 = vmatpush1.bf16.msra.mxu0 %v12902_v0  ;;  %v623_v0 = vlaneseq }
 0x1dd   :  { %3716 = vmatpush1.bf16.msra.mxu1 %v12905_v1  ;;  %3543 = vmatprep.subr.bf16.mxu0 %v12910_v2 }
 0x1de   :  { %3717 = vmatprep.subr.bf16.mxu1 %v12913_v3 }
 0x1e0   :  { %3544 = vmatpush1.bf16.msra.mxu0 %v12908_v4  ;;  %v12986_v4 = vld [vmem:[#allocation8 + $0xf0] ss:$40 sps:$4 sm:$0xff]  }
 0x1e1   :  { %3718 = vmatpush1.bf16.msra.mxu1 %v12911_v6  ;;  %3545 = vmatprep.subr.bf16.mxu0 %v12916_v7  ;;  %v12991_v6 = vld [vmem:[#allocation8 + $0x144] ss:$40 sps:$4 sm:$0xff]  }
 0x1e2   :  { %3719 = vmatprep.subr.bf16.mxu1 %v12919_v8  ;;  %v14776_v8 = vshrl.u32 %v623_v0, 7  ;;  %v13031_v0 = vld [vmem:[#allocation8 + $0x370] ss:$40 sps:$4 sm:$0xff]  }
 0x1e4   :  { %3546 = vmatpush1.bf16.msra.mxu0 %v12914_v9  ;;  %v12989_v9 = vld [vmem:[#allocation8 + $0x140] ss:$40 sps:$4 sm:$0xff]  }
 0x1e5   :  { %3720 = vmatpush1.bf16.msra.mxu1 %v12917_v10  ;;  %3547 = vmatprep.subr.bf16.mxu0 %v12922_v11  ;;  %v12997_v10 = vld [vmem:[#allocation8 + $0x194] ss:$40 sps:$4 sm:$0xff]   ;;  %v14779_v11 = vsub.s32 1, %v14776_v8 }
 0x1e6   :  { %3721 = vmatprep.subr.bf16.mxu1 %v12925_v13  ;;  %v14781_v13 = vld [vmem:[#allocation7] sm:$0xff] }
 0x1e8   :  { %3548 = vmatpush1.bf16.msra.mxu0 %v12920_v14  ;;  %v12992_v14 = vld [vmem:[#allocation5 + $0x20] ss:$40 sps:$4 sm:$0xff]  }
 0x1e9   :  { %3722 = vmatpush1.bf16.msra.mxu1 %v12923_v15  ;;  %3549 = vmatprep.subr.bf16.mxu0 %v12928_v16  ;;  %v12995_v15 = vld [vmem:[#allocation8 + $0x190] ss:$40 sps:$4 sm:$0xff]   ;;  %v630_v16 = vrot.slane %v14781_v13, %v14779_v11 }
 0x1ea   :  { %3723 = vmatprep.subr.bf16.mxu1 %v12931_v18  ;;  %v13000_v18 = vld [vmem:[#allocation5 + $0x74] ss:$40 sps:$4 sm:$0xff]  }
 0x1ec   :  { %3550 = vmatpush1.bf16.msra.mxu0 %v12926_v19  ;;  %v13003_v19 = vld [vmem:[#allocation8 + $0x1e4] ss:$40 sps:$4 sm:$0xff]  }
 0x1ed   :  { %3724 = vmatpush1.bf16.msra.mxu1 %v12929_v21  ;;  %3551 = vmatprep.subr.bf16.mxu0 %v12934_v22  ;;  %v633_v21 = vsub.s32 2, %v14776_v8  ;;  %v637_v22 = vsub.s32 3, %v14776_v8 }
 0x1ee   :  { %3725 = vmatprep.subr.bf16.mxu1 %v12937_v23 }
 0x1f0   :  { %3552 = vmatpush1.bf16.msra.mxu0 %v12932_v24  ;;  %v12998_v24 = vld [vmem:[#allocation5 + $0x70] ss:$40 sps:$4 sm:$0xff]  }
 0x1f1   :  { %3726 = vmatpush1.bf16.msra.mxu1 %v12935_v25  ;;  %3553 = vmatprep.subr.bf16.mxu0 %v12940_v26  ;;  %v13001_v25 = vld [vmem:[#allocation8 + $0x1e0] ss:$40 sps:$4 sm:$0xff]  }
 0x1f2   :  { %3727 = vmatprep.subr.bf16.mxu1 %v12943_v28 }
 0x1f4   :  { %3554 = vmatpush1.bf16.msra.mxu0 %v12938_v29 }
 0x1f5   :  { %3728 = vmatpush1.bf16.msra.mxu1 %v12941_v30  ;;  %3555 = vmatprep.subr.bf16.mxu0 %v12946_v33  ;;  %v13006_v30 = vld [vmem:[#allocation5 + $0xc4] ss:$40 sps:$4 sm:$0xff]  }
 0x1f6   :  { %3729 = vmatprep.subr.bf16.mxu1 %v12949_v34  ;;  %v13009_v33 = vld [vmem:[#allocation8 + $0x234] ss:$40 sps:$4 sm:$0xff]   ;;  %v634_v34 = vrot.slane %v14781_v13, %v633_v21 }
 0x1f8   :  { %3556 = vmatpush1.bf16.msra.mxu0 %v12944_v35 }
 0x1f9   :  { %3730 = vmatpush1.bf16.msra.mxu1 %v12947_v36  ;;  %3557 = vmatprep.subr.bf16.mxu0 %v12952_v37  ;;  %v638_v36 = vrot.slane %v14781_v13, %v637_v22 }
 0x1fa   :  { %3731 = vmatprep.subr.bf16.mxu1 %v12955_v38  ;;  %v13004_v38 = vld [vmem:[#allocation5 + $0xc0] ss:$40 sps:$4 sm:$0xff]  }
 0x1fc   :  { %3558 = vmatpush1.bf16.msra.mxu0 %v12950_v39  ;;  %v13007_v39 = vld [vmem:[#allocation8 + $0x230] ss:$40 sps:$4 sm:$0xff]  }
 0x1fd   :  { %3732 = vmatpush1.bf16.msra.mxu1 %v12953_v40  ;;  %3559 = vmatprep.subr.bf16.mxu0 %v12958_v41  ;;  %v13012_v41 = vld [vmem:[#allocation5 + $0x114] ss:$40 sps:$4 sm:$0xff]  }
 0x1fe   :  { %3742 = vmatprep.subr.bf16.mxu1 %v12967_v42  ;;  %v13015_v42 = vld [vmem:[#allocation8 + $0x284] ss:$40 sps:$4 sm:$0xff]  }
 0x200   :  { %3734 = vmatmul.mubr.bf16.vlgmr.msra.gmra.mrb[4].mxu1 %v14748_v20  ;;  %3560 = vmatpush1.bf16.msra.mxu0 %v12956_v43 }
 0x201   :  { %3743 = vmatpush1.bf16.msra.mxu1 %v12965_v45  ;;  %3561 = vmatprep.subr.bf16.mxu0 %v12961_v44 }
 0x202   :  { %3774 = vmatprep.mubr.bf16.mxu1 %v14602_v27  ;;  %8821 = vmatprep.subr.bf16.mxu1 %v12973_v46  ;;  %v13010_v46 = vld [vmem:[#allocation5 + $0x110] ss:$40 sps:$4 sm:$0xff]  }
 0x204   :  { %3562 = vmatpush1.bf16.msra.mxu0 %v12959_v47  ;;  %v13013_v47 = vld [vmem:[#allocation8 + $0x280] ss:$40 sps:$4 sm:$0xff]  }
 0x205   :  { %3563 = vmatprep.subr.bf16.mxu0 %v12964_v49 }
 0x208   :  { %3564 = vmatpush1.bf16.msra.mxu0 %v12962_v50 }
 0x209   :  { %3565 = vmatprep.subr.bf16.mxu0 %v12970_v51 }
 0x20c   :  { %11225 = vmatmul.mubr.msk.bf16.vlgmr.msra.gmra.mrb[4].mxu1 %vm3123_vm0, %v14754_v31  ;;  %3566 = vmatpush1.bf16.msra.mxu0 %v12968_v52  ;;  %v13018_v52 = vld [vmem:[#allocation5 + $0x164] ss:$40 sps:$4 sm:$0xff]  }
 0x20d   :  { %8822 = vmatpush1.bf16.msra.mxu1 %v12971_v53  ;;  %3567 = vmatprep.subr.bf16.mxu0 %v12976_v54  ;;  %v13021_v53 = vld [vmem:[#allocation8 + $0x2d4] ss:$40 sps:$4 sm:$0xff]  }
 0x20e   :  { %8823 = vmatprep.subr.bf16.mxu1 %v12979_v55  ;;  %v13016_v55 = vld [vmem:[#allocation5 + $0x160] ss:$40 sps:$4 sm:$0xff]  }
 0x210   :  { %3568 = vmatpush1.bf16.msra.mxu0 %v12974_v56  ;;  %v13019_v56 = vld [vmem:[#allocation8 + $0x2d0] ss:$40 sps:$4 sm:$0xff]  }
 0x211   :  { %8824 = vmatpush1.bf16.msra.mxu1 %v12977_v57  ;;  %3578 = vmatprep.subr.bf16.mxu0 %v12982_v58  ;;  %v13024_v57 = vld [vmem:[#allocation5 + $0x1b4] ss:$40 sps:$4 sm:$0xff]  }
 0x212   :  { %8825 = vmatprep.subr.bf16.mxu1 %v12985_v59  ;;  %v13027_v58 = vld [vmem:[#allocation8 + $0x324] ss:$40 sps:$4 sm:$0xff]   ;;  %v13022_v59 = vld [vmem:[#allocation5 + $0x1b0] ss:$40 sps:$4 sm:$0xff]  }
 0x213   :  { %v3407_v1 = vpop.f32.mrb[0].mxu1  ;;  %3570 = vmatmul.mubr.bf16.vlgmr.msra.gmra.mrb[8].mxu0 %v14748_v20 }
 0x214   :  { %v3409_v2 = vpop.f32.mrb[1].mxu1  ;;  %3579 = vmatpush1.bf16.msra.mxu0 %v12980_v60  ;;  %3610 = vmatprep.mubr.bf16.mxu0 %v14602_v27  ;;  %v12220_v43 = vadd.f32 %v3407_v1, %v634_v34  ;;  %v13025_v60 = vld [vmem:[#allocation8 + $0x320] ss:$40 sps:$4 sm:$0xff]   ;;  %v13063_v34 = vld [vmem:[#allocation8 + $0x504] ss:$40 sps:$4 sm:$0xff]  }
 0x215   :  { %8826 = vmatpush1.bf16.msra.mxu1 %v12983_v61  ;;  %v3411_v3 = vpop.f32.mrb[2].mxu1  ;;  %3783 = vmatprep.subr.bf16.mxu0 %v12994_v63  ;;  %v12222_v44 = vadd.f32 %v3409_v2, %v638_v36  ;;  %v13030_v61 = vld [vmem:[#allocation5 + $0x204] ss:$40 sps:$4 sm:$0xff]   ;;  %v13028_v63 = vld [vmem:[#allocation5 + $0x200] ss:$40 sps:$4 sm:$0xff]  }
 0x216   :  { %v3412_v7 = vpop.f32.mrb[3].mxu1  ;;  %8827 = vmatprep.subr.bf16.mxu1 %v12988_v62  ;;  %v13033_v62 = vld [vmem:[#allocation8 + $0x374] ss:$40 sps:$4 sm:$0xff]   ;;  %v13039_v2 = vld [vmem:[#allocation8 + $0x3c4] ss:$40 sps:$4 sm:$0xff]  }
 0x217   :  { %v13036_v1 = vld [vmem:[#allocation5 + $0x254] ss:$40 sps:$4 sm:$0xff]   ;;  %v13034_v3 = vld [vmem:[#allocation5 + $0x250] ss:$40 sps:$4 sm:$0xff]   ;;  %v13042_v7 = vld [vmem:[#allocation5 + $0x2a4] ss:$40 sps:$4 sm:$0xff]  }
 0x218   :  { %v13058_v36 = vld [vmem:[#allocation5 + $0x390] ss:$40 sps:$4 sm:$0xff]  }
 0x219   :  { %8828 = vmatpush1.bf16.msra.mxu1 %v12986_v4  ;;  %v13037_v4 = vld [vmem:[#allocation8 + $0x3c0] ss:$40 sps:$4 sm:$0xff]  }
 0x21a   :  { %8829 = vmatprep.subr.bf16.mxu1 %v12991_v6  ;;  %v14806_v6 = vsub.s32 0, %v14776_v8 }
 0x21d   :  { %8830 = vmatpush1.bf16.msra.mxu1 %v12989_v9  ;;  %v13045_v9 = vld [vmem:[#allocation8 + $0x414] ss:$40 sps:$4 sm:$0xff]  }
 0x21e   :  { %8831 = vmatprep.subr.bf16.mxu1 %v12997_v10  ;;  %v14787_v23 = vpop.f32.mrb[0].mxu0  ;;  %v13040_v10 = vld [vmem:[#allocation5 + $0x2a0] ss:$40 sps:$4 sm:$0xff]  }
 0x21f   :  { %11224 = vmatmul.mubr.msk.bf16.vlgmr.msra.gmra.mrb[8].mxu0 %vm3123_vm0, %v14754_v31  ;;  %v3286_v26 = vpop.f32.mrb[1].mxu0 }
 0x220   :  { %3784 = vmatpush1.bf16.msra.mxu0 %v12992_v14  ;;  %v12219_v28 = vadd.f32 %v3286_v26, %v630_v16  ;;  %v3288_v29 = vpop.f32.mrb[2].mxu0  ;;  %3815 = vmatprep.mubr.bf16.mxu0 %v14728_v48  ;;  %v13043_v14 = vld [vmem:[#allocation8 + $0x410] ss:$40 sps:$4 sm:$0xff]  }
 0x221   :  { %8832 = vmatpush1.bf16.msra.mxu1 %v12995_v15  ;;  %v3289_v35 = vpop.f32.mrb[3].mxu0  ;;  %3785 = vmatprep.subr.bf16.mxu0 %v13000_v18  ;;  %v626_v15 = vrot.slane %v14781_v13, %v14806_v6  ;;  %v13048_v16 = vld [vmem:[#allocation5 + $0x2f4] ss:$40 sps:$4 sm:$0xff]   ;;  %v13054_v26 = vld [vmem:[#allocation5 + $0x344] ss:$40 sps:$4 sm:$0xff]  }
 0x222   :  { %8833 = vmatprep.subr.bf16.mxu1 %v13003_v19  ;;  %v3948_v37 = vmax.f32 %v12219_v28, 0.0  ;;  %v13051_v18 = vld [vmem:[#allocation8 + $0x464] ss:$40 sps:$4 sm:$0xff]   ;;  %v13046_v19 = vld [vmem:[#allocation5 + $0x2f0] ss:$40 sps:$4 sm:$0xff]  }
 0x223   :  { %v13057_v28 = vld [vmem:[#allocation8 + $0x4b4] ss:$40 sps:$4 sm:$0xff]   ;;  %v13052_v29 = vld [vmem:[#allocation5 + $0x340] ss:$40 sps:$4 sm:$0xff]  }
 0x224   :  { %v14798_v40 = vpack.c.bf16 %v3948_v37, %v3948_v37  ;;  %3786 = vmatpush1.bf16.msra.mxu0 %v12998_v24  ;;  %v13049_v24 = vld [vmem:[#allocation8 + $0x460] ss:$40 sps:$4 sm:$0xff]  }
 0x225   :  { %8834 = vmatpush1.bf16.msra.mxu1 %v13001_v25  ;;  %3787 = vmatprep.subr.bf16.mxu0 %v13006_v30  ;;  %v12218_v25 = vadd.f32 %v14787_v23, %v626_v15  ;;  %v13055_v30 = vld [vmem:[#allocation8 + $0x4b0] ss:$40 sps:$4 sm:$0xff]   ;;  %v13061_v37 = vld [vmem:[#allocation8 + $0x500] ss:$40 sps:$4 sm:$0xff]   ;;  %v13117_v15 = vld [vmem:[#allocation8 + $0x7d4] ss:$40 sps:$4 sm:$0xff]  }
 0x226   :  { %8835 = vmatprep.subr.bf16.mxu1 %v13009_v33  ;;  %v3448_v45 = vpop.f32.mrb[4].mxu0  ;;  %8853 = vmatprep.mubr.bf16.mxu1 %v14798_v40  ;;  %v13060_v13 = vld [vmem:[#allocation5 + $0x394] ss:$40 sps:$4 sm:$0xff]  }
 0x227   :  { %v14801_v49 = vadd.f32 %v12220_v43, %v3448_v45  ;;  %v3450_v50 = vpop.f32.mrb[5].mxu0  ;;  %v3947_v33 = vmax.f32 %v12218_v25, 0.0  ;;  %v13067_v43 = vld [vmem:[#allocation8 + $0x550] ss:$40 sps:$4 sm:$0xff]   ;;  %v13075_v45 = vld [vmem:[#allocation8 + $0x5a4] ss:$40 sps:$4 sm:$0xff]  }
 0x228   :  { %3788 = vmatpush1.bf16.msra.mxu0 %v13004_v38  ;;  %v14803_v48 = vadd.f32 %v12222_v44, %v3450_v50  ;;  %v3452_v51 = vpop.f32.mrb[6].mxu0  ;;  %v13066_v38 = vld [vmem:[#allocation5 + $0x3e4] ss:$40 sps:$4 sm:$0xff]   ;;  %v13072_v44 = vld [vmem:[#allocation5 + $0x434] ss:$40 sps:$4 sm:$0xff]  }
 0x229   :  { %8836 = vmatpush1.bf16.msra.mxu1 %v13007_v39  ;;  %v3453_v54 = vpop.f32.mrb[7].mxu0  ;;  %3789 = vmatprep.subr.bf16.mxu0 %v13012_v41  ;;  %v14812_v23 = vpack.c.bf16 %v3947_v33, %v3947_v33  ;;  %v13069_v39 = vld [vmem:[#allocation8 + $0x554] ss:$40 sps:$4 sm:$0xff]   ;;  %v13076_v51 = vld [vmem:[#allocation5 + $0x480] ss:$40 sps:$4 sm:$0xff]  }
 0x22a   :  { %8837 = vmatprep.subr.bf16.mxu1 %v13015_v42  ;;  %v3950_v35 = vmax.f32 %v14803_v48, 0.0  ;;  %v13064_v42 = vld [vmem:[#allocation5 + $0x3e0] ss:$40 sps:$4 sm:$0xff]   ;;  %v13078_v50 = vld [vmem:[#allocation5 + $0x484] ss:$40 sps:$4 sm:$0xff]  }
 0x22b   :  { %v13081_v48 = vld [vmem:[#allocation8 + $0x5f4] ss:$40 sps:$4 sm:$0xff]   ;;  %v13087_v54 = vld [vmem:[#allocation8 + $0x644] ss:$40 sps:$4 sm:$0xff]   ;;  %v13121_v25 = vld [vmem:[#allocation8 + $0x820] ss:$40 sps:$4 sm:$0xff]  }
 0x22c   :  { %3790 = vmatpush1.bf16.msra.mxu0 %v13010_v46  ;;  %v14814_v41 = vpack.c.bf16 %v3950_v35, %v3950_v35  ;;  %v13070_v46 = vld [vmem:[#allocation5 + $0x430] ss:$40 sps:$4 sm:$0xff]   ;;  %v13132_v33 = vld [vmem:[#allocation5 + $0x754] ss:$40 sps:$4 sm:$0xff]  }
 0x22d   :  { %8838 = vmatpush1.bf16.msra.mxu1 %v13013_v47  ;;  %3791 = vmatprep.subr.bf16.mxu0 %v13018_v52  ;;  %v13073_v47 = vld [vmem:[#allocation8 + $0x5a0] ss:$40 sps:$4 sm:$0xff]   ;;  %v13079_v52 = vld [vmem:[#allocation8 + $0x5f0] ss:$40 sps:$4 sm:$0xff]  }
 0x22e   :  { %8839 = vmatprep.subr.bf16.mxu1 %v13021_v53  ;;  %v13084_v53 = vld [vmem:[#allocation5 + $0x4d4] ss:$40 sps:$4 sm:$0xff]  }
 0x22f   :  { %v13133_v35 = vld [vmem:[#allocation8 + $0x8c0] ss:$40 sps:$4 sm:$0xff]  }
 0x230   :  { %3792 = vmatpush1.bf16.msra.mxu0 %v13016_v55  ;;  %v13082_v55 = vld [vmem:[#allocation5 + $0x4d0] ss:$40 sps:$4 sm:$0xff]  }
 0x231   :  { %8840 = vmatpush1.bf16.msra.mxu1 %v13019_v56  ;;  %3793 = vmatprep.subr.bf16.mxu0 %v13024_v57  ;;  %v13085_v56 = vld [vmem:[#allocation8 + $0x640] ss:$40 sps:$4 sm:$0xff]  }
 0x232   :  { %8841 = vmatprep.subr.bf16.mxu1 %v13027_v58  ;;  %v13090_v57 = vld [vmem:[#allocation5 + $0x524] ss:$40 sps:$4 sm:$0xff]  }
 0x233   :  { %v13093_v58 = vld [vmem:[#allocation8 + $0x694] ss:$40 sps:$4 sm:$0xff]  }
 0x234   :  { %3794 = vmatpush1.bf16.msra.mxu0 %v13022_v59  ;;  %v13088_v59 = vld [vmem:[#allocation5 + $0x520] ss:$40 sps:$4 sm:$0xff]  }
 0x235   :  { %8842 = vmatpush1.bf16.msra.mxu1 %v13025_v60  ;;  %3795 = vmatprep.subr.bf16.mxu0 %v13030_v61  ;;  %v13091_v60 = vld [vmem:[#allocation8 + $0x690] ss:$40 sps:$4 sm:$0xff]  }
 0x236   :  { %8843 = vmatprep.subr.bf16.mxu1 %v13033_v62  ;;  %v13096_v61 = vld [vmem:[#allocation5 + $0x574] ss:$40 sps:$4 sm:$0xff]  }
 0x237   :  { %v13099_v62 = vld [vmem:[#allocation8 + $0x6e4] ss:$40 sps:$4 sm:$0xff]  }
 0x238   :  { %3796 = vmatpush1.bf16.msra.mxu0 %v13028_v63  ;;  %v13094_v63 = vld [vmem:[#allocation5 + $0x570] ss:$40 sps:$4 sm:$0xff]  }
 0x239   :  { %8844 = vmatpush1.bf16.msra.mxu1 %v13031_v0  ;;  %3797 = vmatprep.subr.bf16.mxu0 %v13036_v1  ;;  %v13097_v0 = vld [vmem:[#allocation8 + $0x6e0] ss:$40 sps:$4 sm:$0xff]  }
 0x23a   :  { %8845 = vmatprep.subr.bf16.mxu1 %v13039_v2  ;;  %v13102_v1 = vld [vmem:[#allocation5 + $0x5c4] ss:$40 sps:$4 sm:$0xff]  }
 0x23b   :  { %v13105_v2 = vld [vmem:[#allocation8 + $0x734] ss:$40 sps:$4 sm:$0xff]  }
 0x23c   :  { %3798 = vmatpush1.bf16.msra.mxu0 %v13034_v3  ;;  %v13100_v3 = vld [vmem:[#allocation5 + $0x5c0] ss:$40 sps:$4 sm:$0xff]  }
 0x23d   :  { %8846 = vmatpush1.bf16.msra.mxu1 %v13037_v4  ;;  %3799 = vmatprep.subr.bf16.mxu0 %v13042_v7  ;;  %v13103_v4 = vld [vmem:[#allocation8 + $0x730] ss:$40 sps:$4 sm:$0xff]  }
 0x23e   :  { %8847 = vmatprep.subr.bf16.mxu1 %v13045_v9  ;;  %v13108_v7 = vld [vmem:[#allocation5 + $0x614] ss:$40 sps:$4 sm:$0xff]  }
 0x23f   :  { %v13111_v9 = vld [vmem:[#allocation8 + $0x784] ss:$40 sps:$4 sm:$0xff]  }
 0x240   :  { %3800 = vmatpush1.bf16.msra.mxu0 %v13040_v10  ;;  %v13106_v10 = vld [vmem:[#allocation5 + $0x610] ss:$40 sps:$4 sm:$0xff]  }
 0x241   :  { %8848 = vmatpush1.bf16.msra.mxu1 %v13043_v14  ;;  %3801 = vmatprep.subr.bf16.mxu0 %v13048_v16  ;;  %v13109_v14 = vld [vmem:[#allocation8 + $0x780] ss:$40 sps:$4 sm:$0xff]  }
 0x242   :  { %8849 = vmatprep.subr.bf16.mxu1 %v13051_v18  ;;  %v13112_v16 = vld [vmem:[#allocation5 + $0x660] ss:$40 sps:$4 sm:$0xff]   ;;  %v13120_v18 = vld [vmem:[#allocation5 + $0x6b4] ss:$40 sps:$4 sm:$0xff]  }
 0x244   :  { %3802 = vmatpush1.bf16.msra.mxu0 %v13046_v19  ;;  %v13123_v19 = vld [vmem:[#allocation8 + $0x824] ss:$40 sps:$4 sm:$0xff]  }
 0x245   :  { %8850 = vmatpush1.bf16.msra.mxu1 %v13049_v24  ;;  %3803 = vmatprep.subr.bf16.mxu0 %v13054_v26  ;;  %v13118_v24 = vld [vmem:[#allocation5 + $0x6b0] ss:$40 sps:$4 sm:$0xff]   ;;  %v13126_v26 = vld [vmem:[#allocation5 + $0x704] ss:$40 sps:$4 sm:$0xff]  }
 0x246   :  { %8851 = vmatprep.subr.bf16.mxu1 %v13057_v28  ;;  %v13129_v28 = vld [vmem:[#allocation8 + $0x874] ss:$40 sps:$4 sm:$0xff]  }
 0x248   :  { %3804 = vmatpush1.bf16.msra.mxu0 %v13052_v29  ;;  %v13124_v29 = vld [vmem:[#allocation5 + $0x700] ss:$40 sps:$4 sm:$0xff]  }
 0x249   :  { %8852 = vmatpush1.bf16.msra.mxu1 %v13055_v30  ;;  %3805 = vmatprep.subr.bf16.mxu0 %v13060_v13  ;;  %v13127_v30 = vld [vmem:[#allocation8 + $0x870] ss:$40 sps:$4 sm:$0xff]   ;;  %v13135_v13 = vld [vmem:[#allocation8 + $0x8c4] ss:$40 sps:$4 sm:$0xff]  }
 0x24a   :  { %8862 = vmatprep.subr.bf16.mxu1 %v13063_v34  ;;  %v13130_v34 = vld [vmem:[#allocation5 + $0x750] ss:$40 sps:$4 sm:$0xff]  }
 0x24c   :  { %8854 = vmatmul.mubr.bf16.vlgmr.msra.gmra.mrb[8].mxu1 %v14812_v23  ;;  %3806 = vmatpush1.bf16.msra.mxu0 %v13058_v36  ;;  %v13138_v36 = vld [vmem:[#allocation5 + $0x7a4] ss:$40 sps:$4 sm:$0xff]  }
 0x24d   :  { %8863 = vmatpush1.bf16.msra.mxu1 %v13061_v37  ;;  %8894 = vmatprep.mubr.bf16.mxu1 %v14814_v41  ;;  %v13141_v37 = vld [vmem:[#allocation8 + $0x914] ss:$40 sps:$4 sm:$0xff]  }
 0x24e   :  { %3807 = vmatprep.subr.bf16.mxu0 %v13066_v38  ;;  %8864 = vmatprep.subr.bf16.mxu1 %v13069_v39  ;;  %v13136_v38 = vld [vmem:[#allocation5 + $0x7a0] ss:$40 sps:$4 sm:$0xff]  }
 0x24f   :  { %v13139_v39 = vld [vmem:[#allocation8 + $0x910] ss:$40 sps:$4 sm:$0xff]  }
 0x250   :  { %3808 = vmatpush1.bf16.msra.mxu0 %v13064_v42  ;;  %v13144_v42 = vld [vmem:[#allocation5 + $0x7f4] ss:$40 sps:$4 sm:$0xff]  }
 0x251   :  { %8865 = vmatpush1.bf16.msra.mxu1 %v13067_v43  ;;  %3809 = vmatprep.subr.bf16.mxu0 %v13072_v44  ;;  %v13147_v43 = vld [vmem:[#allocation8 + $0x964] ss:$40 sps:$4 sm:$0xff]   ;;  %v13142_v44 = vld [vmem:[#allocation5 + $0x7f0] ss:$40 sps:$4 sm:$0xff]  }
 0x252   :  { %8866 = vmatprep.subr.bf16.mxu1 %v13075_v45  ;;  %v13145_v45 = vld [vmem:[#allocation8 + $0x960] ss:$40 sps:$4 sm:$0xff]  }
 0x254   :  { %3810 = vmatpush1.bf16.msra.mxu0 %v13070_v46  ;;  %v13150_v46 = vld [vmem:[#allocation5 + $0x844] ss:$40 sps:$4 sm:$0xff]  }
 0x255   :  { %8867 = vmatpush1.bf16.msra.mxu1 %v13073_v47  ;;  %3811 = vmatprep.subr.bf16.mxu0 %v13078_v50  ;;  %v13153_v47 = vld [vmem:[#allocation8 + $0x9b4] ss:$40 sps:$4 sm:$0xff]   ;;  %v13148_v50 = vld [vmem:[#allocation5 + $0x840] ss:$40 sps:$4 sm:$0xff]  }
 0x256   :  { %8868 = vmatprep.subr.bf16.mxu1 %v13081_v48  ;;  %v13151_v48 = vld [vmem:[#allocation8 + $0x9b0] ss:$40 sps:$4 sm:$0xff]  }
 0x258   :  { %3812 = vmatpush1.bf16.msra.mxu0 %v13076_v51  ;;  %v3949_v51 = vmax.f32 %v14801_v49, 0.0  ;;  %v13199_v49 = vld [vmem:[#allocation8 + $0xa50] ss:$40 sps:$4 sm:$0xff]  }
 0x259   :  { %8869 = vmatpush1.bf16.msra.mxu1 %v13079_v52  ;;  %3813 = vmatprep.subr.bf16.mxu0 %v13084_v53  ;;  %v13156_v52 = vld [vmem:[#allocation5 + $0x894] ss:$40 sps:$4 sm:$0xff]  }
 0x25a   :  { %8870 = vmatprep.subr.bf16.mxu1 %v13087_v54  ;;  %v13195_v53 = vld [vmem:[#allocation8 + $0xa04] ss:$40 sps:$4 sm:$0xff]   ;;  %v13154_v54 = vld [vmem:[#allocation5 + $0x890] ss:$40 sps:$4 sm:$0xff]  }
 0x25c   :  { %3814 = vmatpush1.bf16.msra.mxu0 %v13082_v55  ;;  %v13193_v55 = vld [vmem:[#allocation8 + $0xa00] ss:$40 sps:$4 sm:$0xff]  }
 0x25d   :  { %8871 = vmatpush1.bf16.msra.mxu1 %v13085_v56  ;;  %3824 = vmatprep.subr.bf16.mxu0 %v13090_v57  ;;  %v14821_v56 = vpack.c.bf16 %v3949_v51, %v3949_v51  ;;  %v13159_v57 = vld [vmem:[#allocation5 + $0x8e4] ss:$40 sps:$4 sm:$0xff]  }
 0x25e   :  { %8872 = vmatprep.subr.bf16.mxu1 %v13093_v58  ;;  %v13201_v58 = vld [vmem:[#allocation8 + $0xa54] ss:$40 sps:$4 sm:$0xff]   ;;  %v13259_v51 = vld [vmem:[#allocation8 + $0xdc0] ss:$40 sps:$4 sm:$0xff]  }
 0x25f   :  { %3816 = vmatmul.mubr.bf16.vlgmr.msra.gmra.mrb[12].mxu0 %v14732_v5  ;;  %v13114_v5 = vld [vmem:[#allocation5 + $0x664] ss:$40 sps:$4 sm:$0xff]  }
 0x260   :  { %3825 = vmatpush1.bf16.msra.mxu0 %v13088_v59  ;;  %3856 = vmatprep.mubr.bf16.mxu0 %v14736_v32  ;;  %v13115_v32 = vld [vmem:[#allocation8 + $0x7d0] ss:$40 sps:$4 sm:$0xff]  }
 0x261   :  { %8873 = vmatpush1.bf16.msra.mxu1 %v13091_v60  ;;  %3826 = vmatprep.subr.bf16.mxu0 %v13096_v61  ;;  %v13157_v59 = vld [vmem:[#allocation5 + $0x8e0] ss:$40 sps:$4 sm:$0xff]   ;;  %v13162_v60 = vld [vmem:[#allocation5 + $0x934] ss:$40 sps:$4 sm:$0xff]  }
 0x262   :  { %8874 = vmatprep.subr.bf16.mxu1 %v13099_v62  ;;  %v13207_v61 = vld [vmem:[#allocation8 + $0xaa4] ss:$40 sps:$4 sm:$0xff]   ;;  %v13160_v62 = vld [vmem:[#allocation5 + $0x930] ss:$40 sps:$4 sm:$0xff]  }
 0x264   :  { %3827 = vmatpush1.bf16.msra.mxu0 %v13094_v63  ;;  %v13205_v63 = vld [vmem:[#allocation8 + $0xaa0] ss:$40 sps:$4 sm:$0xff]  }
 0x265   :  { %8875 = vmatpush1.bf16.msra.mxu1 %v13097_v0  ;;  %3828 = vmatprep.subr.bf16.mxu0 %v13102_v1  ;;  %v13165_v0 = vld [vmem:[#allocation5 + $0x984] ss:$40 sps:$4 sm:$0xff]  }
 0x266   :  { %8876 = vmatprep.subr.bf16.mxu1 %v13105_v2  ;;  %v13213_v1 = vld [vmem:[#allocation8 + $0xaf4] ss:$40 sps:$4 sm:$0xff]   ;;  %v13163_v2 = vld [vmem:[#allocation5 + $0x980] ss:$40 sps:$4 sm:$0xff]  }
 0x268   :  { %3829 = vmatpush1.bf16.msra.mxu0 %v13100_v3  ;;  %v13211_v3 = vld [vmem:[#allocation8 + $0xaf0] ss:$40 sps:$4 sm:$0xff]  }
 0x269   :  { %8877 = vmatpush1.bf16.msra.mxu1 %v13103_v4  ;;  %3830 = vmatprep.subr.bf16.mxu0 %v13108_v7  ;;  %v13168_v4 = vld [vmem:[#allocation5 + $0x9d4] ss:$40 sps:$4 sm:$0xff]  }
 0x26a   :  { %8878 = vmatprep.subr.bf16.mxu1 %v13111_v9  ;;  %v13219_v7 = vld [vmem:[#allocation8 + $0xb44] ss:$40 sps:$4 sm:$0xff]   ;;  %v13166_v9 = vld [vmem:[#allocation5 + $0x9d0] ss:$40 sps:$4 sm:$0xff]  }
 0x26c   :  { %3831 = vmatpush1.bf16.msra.mxu0 %v13106_v10  ;;  %v13217_v10 = vld [vmem:[#allocation8 + $0xb40] ss:$40 sps:$4 sm:$0xff]  }
 0x26d   :  { %8879 = vmatpush1.bf16.msra.mxu1 %v13109_v14  ;;  %3832 = vmatprep.subr.bf16.mxu0 %v13114_v5  ;;  %v13171_v14 = vld [vmem:[#allocation5 + $0xa24] ss:$40 sps:$4 sm:$0xff]  }
 0x26e   :  { %8880 = vmatprep.subr.bf16.mxu1 %v13117_v15  ;;  %v13225_v5 = vld [vmem:[#allocation8 + $0xb94] ss:$40 sps:$4 sm:$0xff]   ;;  %v13169_v15 = vld [vmem:[#allocation5 + $0xa20] ss:$40 sps:$4 sm:$0xff]  }
 0x270   :  { %3833 = vmatpush1.bf16.msra.mxu0 %v13112_v16  ;;  %v13223_v16 = vld [vmem:[#allocation8 + $0xb90] ss:$40 sps:$4 sm:$0xff]  }
 0x271   :  { %8881 = vmatpush1.bf16.msra.mxu1 %v13115_v32  ;;  %3834 = vmatprep.subr.bf16.mxu0 %v13120_v18  ;;  %v13174_v32 = vld [vmem:[#allocation5 + $0xa74] ss:$40 sps:$4 sm:$0xff]  }
 0x272   :  { %8882 = vmatprep.subr.bf16.mxu1 %v13123_v19  ;;  %v13231_v18 = vld [vmem:[#allocation8 + $0xbe4] ss:$40 sps:$4 sm:$0xff]   ;;  %v13172_v19 = vld [vmem:[#allocation5 + $0xa70] ss:$40 sps:$4 sm:$0xff]  }
 0x274   :  { %3835 = vmatpush1.bf16.msra.mxu0 %v13118_v24  ;;  %v13229_v24 = vld [vmem:[#allocation8 + $0xbe0] ss:$40 sps:$4 sm:$0xff]  }
 0x275   :  { %8883 = vmatpush1.bf16.msra.mxu1 %v13121_v25  ;;  %3836 = vmatprep.subr.bf16.mxu0 %v13126_v26  ;;  %v13177_v25 = vld [vmem:[#allocation5 + $0xac4] ss:$40 sps:$4 sm:$0xff]  }
 0x276   :  { %8884 = vmatprep.subr.bf16.mxu1 %v13129_v28  ;;  %v13237_v26 = vld [vmem:[#allocation8 + $0xc34] ss:$40 sps:$4 sm:$0xff]   ;;  %v13175_v28 = vld [vmem:[#allocation5 + $0xac0] ss:$40 sps:$4 sm:$0xff]  }
 0x278   :  { %3837 = vmatpush1.bf16.msra.mxu0 %v13124_v29  ;;  %v13235_v29 = vld [vmem:[#allocation8 + $0xc30] ss:$40 sps:$4 sm:$0xff]  }
 0x279   :  { %8885 = vmatpush1.bf16.msra.mxu1 %v13127_v30  ;;  %3838 = vmatprep.subr.bf16.mxu0 %v13132_v33  ;;  %v13180_v30 = vld [vmem:[#allocation5 + $0xb14] ss:$40 sps:$4 sm:$0xff]  }
 0x27a   :  { %8886 = vmatprep.subr.bf16.mxu1 %v13135_v13  ;;  %v13243_v33 = vld [vmem:[#allocation8 + $0xc84] ss:$40 sps:$4 sm:$0xff]   ;;  %v13178_v13 = vld [vmem:[#allocation5 + $0xb10] ss:$40 sps:$4 sm:$0xff]  }
 0x27c   :  { %3839 = vmatpush1.bf16.msra.mxu0 %v13130_v34  ;;  %v13183_v34 = vld [vmem:[#allocation5 + $0xb64] ss:$40 sps:$4 sm:$0xff]  }
 0x27d   :  { %8887 = vmatpush1.bf16.msra.mxu1 %v13133_v35  ;;  %3840 = vmatprep.subr.bf16.mxu0 %v13138_v36  ;;  %v13249_v35 = vld [vmem:[#allocation8 + $0xcd4] ss:$40 sps:$4 sm:$0xff]   ;;  %v13181_v36 = vld [vmem:[#allocation5 + $0xb60] ss:$40 sps:$4 sm:$0xff]  }
 0x27e   :  { %8888 = vmatprep.subr.bf16.mxu1 %v13141_v37  ;;  %v13247_v37 = vld [vmem:[#allocation8 + $0xcd0] ss:$40 sps:$4 sm:$0xff]  }
 0x280   :  { %3841 = vmatpush1.bf16.msra.mxu0 %v13136_v38  ;;  %v13252_v38 = vld [vmem:[#allocation8 + $0xd24] ss:$40 sps:$4 sm:$0xff]  }
 0x281   :  { %8889 = vmatpush1.bf16.msra.mxu1 %v13139_v39  ;;  %3842 = vmatprep.subr.bf16.mxu0 %v13144_v42  ;;  %v13184_v39 = vld [vmem:[#allocation5 + $0xbb0] ss:$40 sps:$4 sm:$0xff]  }
 0x282   :  { %8890 = vmatprep.subr.bf16.mxu1 %v13147_v43  ;;  %v13250_v42 = vld [vmem:[#allocation8 + $0xd20] ss:$40 sps:$4 sm:$0xff]  }
 0x283   :  { %v13189_v43 = vld [vmem:[#allocation5 + $0xc04] ss:$40 sps:$4 sm:$0xff]  }
 0x284   :  { %3843 = vmatpush1.bf16.msra.mxu0 %v13142_v44  ;;  %v13255_v44 = vld [vmem:[#allocation8 + $0xd74] ss:$40 sps:$4 sm:$0xff]  }
 0x285   :  { %8891 = vmatpush1.bf16.msra.mxu1 %v13145_v45  ;;  %3844 = vmatprep.subr.bf16.mxu0 %v13150_v46  ;;  %v13187_v45 = vld [vmem:[#allocation5 + $0xc00] ss:$40 sps:$4 sm:$0xff]  }
 0x286   :  { %8892 = vmatprep.subr.bf16.mxu1 %v13153_v47  ;;  %v13253_v46 = vld [vmem:[#allocation8 + $0xd70] ss:$40 sps:$4 sm:$0xff]  }
 0x287   :  { %v13192_v47 = vld [vmem:[#allocation5 + $0xc54] ss:$40 sps:$4 sm:$0xff]  }
 0x288   :  { %3845 = vmatpush1.bf16.msra.mxu0 %v13148_v50  ;;  %v13261_v50 = vld [vmem:[#allocation8 + $0xdc4] ss:$40 sps:$4 sm:$0xff]  }
 0x289   :  { %8893 = vmatpush1.bf16.msra.mxu1 %v13151_v48  ;;  %3846 = vmatprep.subr.bf16.mxu0 %v13156_v52  ;;  %v13190_v48 = vld [vmem:[#allocation5 + $0xc50] ss:$40 sps:$4 sm:$0xff]   ;;  %v13198_v52 = vld [vmem:[#allocation5 + $0xca4] ss:$40 sps:$4 sm:$0xff]  }
 0x28a   :  { %8903 = vmatprep.subr.bf16.mxu1 %v13195_v53  ;;  %v13267_v53 = vld [vmem:[#allocation8 + $0xe14] ss:$40 sps:$4 sm:$0xff]  }
 0x28c   :  { %8895 = vmatmul.mubr.bf16.vlgmr.msra.gmra.mrb[8].mxu1 %v14821_v56  ;;  %3847 = vmatpush1.bf16.msra.mxu0 %v13154_v54  ;;  %v13196_v54 = vld [vmem:[#allocation5 + $0xca0] ss:$40 sps:$4 sm:$0xff]  }
 0x28d   :  { %8904 = vmatpush1.bf16.msra.mxu1 %v13193_v55  ;;  %3848 = vmatprep.subr.bf16.mxu0 %v13159_v57  ;;  %v13204_v55 = vld [vmem:[#allocation5 + $0xcf4] ss:$40 sps:$4 sm:$0xff]  }
 0x28e   :  { %8905 = vmatprep.subr.bf16.mxu1 %v13201_v58  ;;  %v13265_v57 = vld [vmem:[#allocation8 + $0xe10] ss:$40 sps:$4 sm:$0xff]   ;;  %v13273_v58 = vld [vmem:[#allocation8 + $0xe64] ss:$40 sps:$4 sm:$0xff]  }
 0x290   :  { %3849 = vmatpush1.bf16.msra.mxu0 %v13157_v59  ;;  %v13202_v59 = vld [vmem:[#allocation5 + $0xcf0] ss:$40 sps:$4 sm:$0xff]  }
 0x291   :  { %8906 = vmatpush1.bf16.msra.mxu1 %v13199_v49  ;;  %3850 = vmatprep.subr.bf16.mxu0 %v13162_v60  ;;  %v13210_v49 = vld [vmem:[#allocation5 + $0xd44] ss:$40 sps:$4 sm:$0xff]  }
 0x292   :  { %8907 = vmatprep.subr.bf16.mxu1 %v13207_v61  ;;  %v13271_v60 = vld [vmem:[#allocation8 + $0xe60] ss:$40 sps:$4 sm:$0xff]   ;;  %v13279_v61 = vld [vmem:[#allocation8 + $0xeb4] ss:$40 sps:$4 sm:$0xff]  }
 0x294   :  { %3851 = vmatpush1.bf16.msra.mxu0 %v13160_v62  ;;  %v13208_v62 = vld [vmem:[#allocation5 + $0xd40] ss:$40 sps:$4 sm:$0xff]  }
 0x295   :  { %8908 = vmatpush1.bf16.msra.mxu1 %v13205_v63  ;;  %3852 = vmatprep.subr.bf16.mxu0 %v13165_v0  ;;  %v13216_v63 = vld [vmem:[#allocation5 + $0xd94] ss:$40 sps:$4 sm:$0xff]  }
 0x296   :  { %8909 = vmatprep.subr.bf16.mxu1 %v13213_v1  ;;  %v13277_v0 = vld [vmem:[#allocation8 + $0xeb0] ss:$40 sps:$4 sm:$0xff]   ;;  %v13285_v1 = vld [vmem:[#allocation8 + $0xf04] ss:$40 sps:$4 sm:$0xff]  }
 0x298   :  { %3853 = vmatpush1.bf16.msra.mxu0 %v13163_v2  ;;  %v13214_v2 = vld [vmem:[#allocation5 + $0xd90] ss:$40 sps:$4 sm:$0xff]  }
 0x299   :  { %8910 = vmatpush1.bf16.msra.mxu1 %v13211_v3  ;;  %3854 = vmatprep.subr.bf16.mxu0 %v13168_v4  ;;  %v13222_v3 = vld [vmem:[#allocation5 + $0xde4] ss:$40 sps:$4 sm:$0xff]   ;;  %v13220_v4 = vld [vmem:[#allocation5 + $0xde0] ss:$40 sps:$4 sm:$0xff]  }
 0x29a   :  { %8911 = vmatprep.subr.bf16.mxu1 %v13219_v7  ;;  %v13228_v7 = vld [vmem:[#allocation5 + $0xe34] ss:$40 sps:$4 sm:$0xff]  }
 0x29c   :  { %3855 = vmatpush1.bf16.msra.mxu0 %v13166_v9  ;;  %v13226_v9 = vld [vmem:[#allocation5 + $0xe30] ss:$40 sps:$4 sm:$0xff]  }
 0x29d   :  { %8912 = vmatpush1.bf16.msra.mxu1 %v13217_v10  ;;  %3865 = vmatprep.subr.bf16.mxu0 %v13171_v14  ;;  %v13234_v10 = vld [vmem:[#allocation5 + $0xe84] ss:$40 sps:$4 sm:$0xff]   ;;  %v13232_v14 = vld [vmem:[#allocation5 + $0xe80] ss:$40 sps:$4 sm:$0xff]  }
 0x29e   :  { %8913 = vmatprep.subr.bf16.mxu1 %v13225_v5  ;;  %v13240_v5 = vld [vmem:[#allocation5 + $0xed4] ss:$40 sps:$4 sm:$0xff]  }
 0x29f   :  { %3857 = vmatmul.mubr.bf16.vlgmr.msra.gmra.mrb[12].mxu0 %v14740_v12  ;;  %v13241_v12 = vld [vmem:[#allocation8 + $0xc80] ss:$40 sps:$4 sm:$0xff]  }
 0x2a0   :  { %3866 = vmatpush1.bf16.msra.mxu0 %v13169_v15  ;;  %3897 = vmatprep.mubr.bf16.mxu0 %v14742_v17  ;;  %v13186_v17 = vld [vmem:[#allocation5 + $0xbb4] ss:$40 sps:$4 sm:$0xff]   ;;  %v13238_v15 = vld [vmem:[#allocation5 + $0xed0] ss:$40 sps:$4 sm:$0xff]  }
 0x2a1   :  { %8914 = vmatpush1.bf16.msra.mxu1 %v13223_v16  ;;  %3867 = vmatprep.subr.bf16.mxu0 %v13174_v32  ;;  %v13246_v16 = vld [vmem:[#allocation5 + $0xf24] ss:$40 sps:$4 sm:$0xff]   ;;  %v13244_v32 = vld [vmem:[#allocation5 + $0xf20] ss:$40 sps:$4 sm:$0xff]  }
 0x2a2   :  { %8915 = vmatprep.subr.bf16.mxu1 %v13231_v18  ;;  %v13258_v18 = vld [vmem:[#allocation8 + $0xc] ss:$40 sps:$4 sm:$0xff]  }
 0x2a4   :  { %3868 = vmatpush1.bf16.msra.mxu0 %v13172_v19 }
 0x2a5   :  { %8916 = vmatpush1.bf16.msra.mxu1 %v13229_v24  ;;  %3869 = vmatprep.subr.bf16.mxu0 %v13177_v25 }
 0x2a6   :  { %8917 = vmatprep.subr.bf16.mxu1 %v13237_v26 }
 0x2a8   :  { %3870 = vmatpush1.bf16.msra.mxu0 %v13175_v28  ;;  %v13256_v28 = vld [vmem:[#allocation8 + $0x8] ss:$40 sps:$4 sm:$0xff]  }
 0x2a9   :  { %8918 = vmatpush1.bf16.msra.mxu1 %v13235_v29  ;;  %3871 = vmatprep.subr.bf16.mxu0 %v13180_v30  ;;  %v653_v29 = vsub.s32 7, %v14776_v8  ;;  %v13264_v30 = vld [vmem:[#allocation8 + $0x5c] ss:$40 sps:$4 sm:$0xff]  }
 0x2aa   :  { %8919 = vmatprep.subr.bf16.mxu1 %v13243_v33  ;;  %v641_v33 = vsub.s32 4, %v14776_v8 }
 0x2ac   :  { %3872 = vmatpush1.bf16.msra.mxu0 %v13178_v13  ;;  %v14834_v13 = vld [vmem:[#allocation7] sm:$0xff] }
 0x2ad   :  { %8920 = vmatpush1.bf16.msra.mxu1 %v13241_v12  ;;  %3873 = vmatprep.subr.bf16.mxu0 %v13183_v34  ;;  %v13270_v12 = vld [vmem:[#allocation8 + $0xac] ss:$40 sps:$4 sm:$0xff]   ;;  %v645_v34 = vsub.s32 5, %v14776_v8 }
 0x2ae   :  { %8921 = vmatprep.subr.bf16.mxu1 %v13249_v35 }
 0x2b0   :  { %3874 = vmatpush1.bf16.msra.mxu0 %v13181_v36  ;;  %v13268_v36 = vld [vmem:[#allocation8 + $0xa8] ss:$40 sps:$4 sm:$0xff]  }
 0x2b1   :  { %8922 = vmatpush1.bf16.msra.mxu1 %v13247_v37  ;;  %3875 = vmatprep.subr.bf16.mxu0 %v13186_v17  ;;  %v646_v37 = vrot.slane %v14834_v13, %v645_v34  ;;  %v13276_v17 = vld [vmem:[#allocation8 + $0xfc] ss:$40 sps:$4 sm:$0xff]  }
 0x2b2   :  { %8923 = vmatprep.subr.bf16.mxu1 %v13252_v38 }
 0x2b4   :  { %3876 = vmatpush1.bf16.msra.mxu0 %v13184_v39  ;;  %v13274_v39 = vld [vmem:[#allocation8 + $0xf8] ss:$40 sps:$4 sm:$0xff]  }
 0x2b5   :  { %8924 = vmatpush1.bf16.msra.mxu1 %v13250_v42  ;;  %3877 = vmatprep.subr.bf16.mxu0 %v13189_v43 }
 0x2b6   :  { %8925 = vmatprep.subr.bf16.mxu1 %v13255_v44 }
 0x2b8   :  { %3878 = vmatpush1.bf16.msra.mxu0 %v13187_v45 }
 0x2b9   :  { %8926 = vmatpush1.bf16.msra.mxu1 %v13253_v46  ;;  %3879 = vmatprep.subr.bf16.mxu0 %v13192_v47  ;;  %v13282_v47 = vld [vmem:[#allocation8 + $0x14c] ss:$40 sps:$4 sm:$0xff]  }
 0x2ba   :  { %8927 = vmatprep.subr.bf16.mxu1 %v13261_v50 }
 0x2bc   :  { %3880 = vmatpush1.bf16.msra.mxu0 %v13190_v48 }
 0x2bd   :  { %8928 = vmatpush1.bf16.msra.mxu1 %v13259_v51  ;;  %3881 = vmatprep.subr.bf16.mxu0 %v13198_v52  ;;  %v13280_v52 = vld [vmem:[#allocation8 + $0x148] ss:$40 sps:$4 sm:$0xff]  }
 0x2be   :  { %8929 = vmatprep.subr.bf16.mxu1 %v13267_v53  ;;  %v13283_v53 = vld [vmem:[#allocation8 + $0xf00] ss:$40 sps:$4 sm:$0xff]  }
 0x2c0   :  { %3882 = vmatpush1.bf16.msra.mxu0 %v13196_v54 }
 0x2c1   :  { %8930 = vmatpush1.bf16.msra.mxu1 %v13265_v57  ;;  %3883 = vmatprep.subr.bf16.mxu0 %v13204_v55  ;;  %v13288_v55 = vld [vmem:[#allocation8 + $0x19c] ss:$40 sps:$4 sm:$0xff]  }
 0x2c2   :  { %8931 = vmatprep.subr.bf16.mxu1 %v13273_v58  ;;  %v13291_v57 = vld [vmem:[#allocation8 + $0xf54] ss:$40 sps:$4 sm:$0xff]  }
 0x2c4   :  { %3884 = vmatpush1.bf16.msra.mxu0 %v13202_v59  ;;  %v13286_v59 = vld [vmem:[#allocation8 + $0x198] ss:$40 sps:$4 sm:$0xff]  }
 0x2c5   :  { %8932 = vmatpush1.bf16.msra.mxu1 %v13271_v60  ;;  %3885 = vmatprep.subr.bf16.mxu0 %v13210_v49  ;;  %v13289_v49 = vld [vmem:[#allocation8 + $0xf50] ss:$40 sps:$4 sm:$0xff]  }
 0x2c6   :  { %8933 = vmatprep.subr.bf16.mxu1 %v13279_v61  ;;  %v13294_v61 = vld [vmem:[#allocation8 + $0x1ec] ss:$40 sps:$4 sm:$0xff]  }
 0x2c8   :  { %3886 = vmatpush1.bf16.msra.mxu0 %v13208_v62  ;;  %v13297_v62 = vld [vmem:[#allocation8 + $0xfa4] ss:$40 sps:$4 sm:$0xff]  }
 0x2c9   :  { %8934 = vmatpush1.bf16.msra.mxu1 %v13277_v0  ;;  %3887 = vmatprep.subr.bf16.mxu0 %v13216_v63  ;;  %v13292_v63 = vld [vmem:[#allocation8 + $0x1e8] ss:$40 sps:$4 sm:$0xff]  }
 0x2ca   :  { %8944 = vmatprep.subr.bf16.mxu1 %v13285_v1  ;;  %v13295_v0 = vld [vmem:[#allocation8 + $0xfa0] ss:$40 sps:$4 sm:$0xff]   ;;  %v13300_v1 = vld [vmem:[#allocation8 + $0x23c] ss:$40 sps:$4 sm:$0xff]  }
 0x2cc   :  { %3888 = vmatpush1.bf16.msra.mxu0 %v13214_v2  ;;  %v13303_v2 = vld [vmem:[#allocation8 + $0xff4] ss:$40 sps:$4 sm:$0xff]  }
 0x2cd   :  { %3889 = vmatprep.subr.bf16.mxu0 %v13222_v3  ;;  %v13298_v3 = vld [vmem:[#allocation8 + $0x238] ss:$40 sps:$4 sm:$0xff]  }
 0x2d0   :  { %3890 = vmatpush1.bf16.msra.mxu0 %v13220_v4  ;;  %v13301_v4 = vld [vmem:[#allocation8 + $0xff0] ss:$40 sps:$4 sm:$0xff]  }
 0x2d1   :  { %3891 = vmatprep.subr.bf16.mxu0 %v13228_v7  ;;  %v13306_v7 = vld [vmem:[#allocation8 + $0x28c] ss:$40 sps:$4 sm:$0xff]  }
 0x2d4   :  { %3892 = vmatpush1.bf16.msra.mxu0 %v13226_v9  ;;  %v13309_v9 = vld [vmem:[#allocation8 + $0x1044] ss:$40 sps:$4 sm:$0xff]  }
 0x2d5   :  { %3893 = vmatprep.subr.bf16.mxu0 %v13234_v10  ;;  %v13304_v10 = vld [vmem:[#allocation8 + $0x288] ss:$40 sps:$4 sm:$0xff]  }
 0x2d8   :  { %3894 = vmatpush1.bf16.msra.mxu0 %v13232_v14  ;;  %v13307_v14 = vld [vmem:[#allocation8 + $0x1040] ss:$40 sps:$4 sm:$0xff]  }
 0x2d9   :  { %3895 = vmatprep.subr.bf16.mxu0 %v13240_v5  ;;  %v13312_v5 = vld [vmem:[#allocation8 + $0x2dc] ss:$40 sps:$4 sm:$0xff]  }
 0x2dc   :  { %3896 = vmatpush1.bf16.msra.mxu0 %v13238_v15  ;;  %v13315_v15 = vld [vmem:[#allocation8 + $0x1094] ss:$40 sps:$4 sm:$0xff]  }
 0x2dd   :  { %3906 = vmatprep.subr.bf16.mxu0 %v13246_v16  ;;  %v13310_v16 = vld [vmem:[#allocation8 + $0x2d8] ss:$40 sps:$4 sm:$0xff]  }
 0x2df   :  { %v14826_v19 = vpop.f32.mrb[4].mxu1  ;;  %3898 = vmatmul.mubr.bf16.vlgmr.msra.gmra.mrb[12].mxu0 %v14748_v20  ;;  %v654_v20 = vrot.slane %v14834_v13, %v653_v29 }
 0x2e0   :  { %v3778_v24 = vpop.f32.mrb[5].mxu1  ;;  %3907 = vmatpush1.bf16.msra.mxu0 %v13244_v32  ;;  %3938 = vmatprep.mubr.bf16.mxu0 %v14602_v27  ;;  %v13262_v27 = vld [vmem:[#allocation8 + $0x58] ss:$40 sps:$4 sm:$0xff]  }
 0x2e1   :  { %v3780_v25 = vpop.f32.mrb[6].mxu1  ;;  %9026 = vmatprep.subr.bf16.mxu0 %v13258_v18  ;;  %v12227_v35 = vadd.f32 %v3778_v24, %v654_v20  ;;  %v13313_v32 = vld [vmem:[#allocation8 + $0x1090] ss:$40 sps:$4 sm:$0xff]   ;;  %v13318_v18 = vld [vmem:[#allocation8 + $0x32c] ss:$40 sps:$4 sm:$0xff]  }
 0x2e2   :  { %v3781_v26 = vpop.f32.mrb[7].mxu1  ;;  %v13321_v24 = vld [vmem:[#allocation8 + $0x10e4] ss:$40 sps:$4 sm:$0xff]   ;;  %v13316_v25 = vld [vmem:[#allocation8 + $0x328] ss:$40 sps:$4 sm:$0xff]  }
 0x2e3   :  { %v3954_v44 = vmax.f32 %v12227_v35, 0.0  ;;  %v13319_v26 = vld [vmem:[#allocation8 + $0x10e0] ss:$40 sps:$4 sm:$0xff]  }
 0x2e4   :  { %v13322_v20 = vld [vmem:[#allocation8 + $0x378] ss:$40 sps:$4 sm:$0xff]   ;;  %v13328_v35 = vld [vmem:[#allocation8 + $0x3c8] ss:$40 sps:$4 sm:$0xff]  }
 0x2e5   :  { %v14852_v60 = vpack.c.bf16 %v3954_v44, %v3954_v44  ;;  %v13340_v44 = vld [vmem:[#allocation8 + $0x468] ss:$40 sps:$4 sm:$0xff]  }
 0x2eb   :  { %11226 = vmatmul.mubr.msk.bf16.vlgmr.msra.gmra.mrb[12].mxu0 %vm3123_vm0, %v14754_v31  ;;  %v642_v31 = vrot.slane %v14834_v13, %v641_v33 }
 0x2ec   :  { %9027 = vmatpush1.bf16.msra.mxu0 %v13256_v28  ;;  %9058 = vmatprep.mubr.bf16.mxu0 %v14798_v40  ;;  %v13324_v28 = vld [vmem:[#allocation8 + $0x37c] ss:$40 sps:$4 sm:$0xff]  }
 0x2ed   :  { %9028 = vmatprep.subr.bf16.mxu0 %v13264_v30  ;;  %v13327_v30 = vld [vmem:[#allocation8 + $0x1134] ss:$40 sps:$4 sm:$0xff]  }
 0x2f0   :  { %9029 = vmatpush1.bf16.msra.mxu0 %v13262_v27  ;;  %v13325_v27 = vld [vmem:[#allocation8 + $0x1130] ss:$40 sps:$4 sm:$0xff]  }
 0x2f1   :  { %9030 = vmatprep.subr.bf16.mxu0 %v13270_v12  ;;  %v13330_v12 = vld [vmem:[#allocation8 + $0x3cc] ss:$40 sps:$4 sm:$0xff]  }
 0x2f2   :  { %v3612_v38 = vpop.f32.mrb[8].mxu0 }
 0x2f3   :  { %v12224_v42 = vadd.f32 %v3612_v38, %v642_v31  ;;  %v3614_v43 = vpop.f32.mrb[9].mxu0  ;;  %v13333_v31 = vld [vmem:[#allocation8 + $0x1184] ss:$40 sps:$4 sm:$0xff]   ;;  %v13334_v38 = vld [vmem:[#allocation8 + $0x418] ss:$40 sps:$4 sm:$0xff]  }
 0x2f4   :  { %9031 = vmatpush1.bf16.msra.mxu0 %v13268_v36  ;;  %v12225_v45 = vadd.f32 %v3614_v43, %v646_v37  ;;  %v3616_v46 = vpop.f32.mrb[10].mxu0  ;;  %v13331_v36 = vld [vmem:[#allocation8 + $0x1180] ss:$40 sps:$4 sm:$0xff]   ;;  %v13336_v37 = vld [vmem:[#allocation8 + $0x41c] ss:$40 sps:$4 sm:$0xff]  }
 0x2f5   :  { %v3951_v50 = vmax.f32 %v12224_v42, 0.0  ;;  %v3617_v48 = vpop.f32.mrb[11].mxu0  ;;  %9032 = vmatprep.subr.bf16.mxu0 %v13276_v17  ;;  %v13339_v17 = vld [vmem:[#allocation8 + $0x11d4] ss:$40 sps:$4 sm:$0xff]   ;;  %v13345_v43 = vld [vmem:[#allocation8 + $0x1224] ss:$40 sps:$4 sm:$0xff]  }
 0x2f6   :  { %v3952_v51 = vmax.f32 %v12225_v45, 0.0  ;;  %v13342_v42 = vld [vmem:[#allocation8 + $0x46c] ss:$40 sps:$4 sm:$0xff]   ;;  %v13343_v45 = vld [vmem:[#allocation8 + $0x1220] ss:$40 sps:$4 sm:$0xff]  }
 0x2f7   :  { %v14849_v58 = vpack.c.bf16 %v3951_v50, %v3951_v50  ;;  %v13348_v46 = vld [vmem:[#allocation8 + $0x4bc] ss:$40 sps:$4 sm:$0xff]   ;;  %v13346_v50 = vld [vmem:[#allocation8 + $0x4b8] ss:$40 sps:$4 sm:$0xff]  }
 0x2f8   :  { %v14847_v54 = vpack.c.bf16 %v3952_v51, %v3952_v51  ;;  %9033 = vmatpush1.bf16.msra.mxu0 %v13274_v39  ;;  %v13337_v39 = vld [vmem:[#allocation8 + $0x11d0] ss:$40 sps:$4 sm:$0xff]   ;;  %v13354_v51 = vld [vmem:[#allocation8 + $0x50c] ss:$40 sps:$4 sm:$0xff]  }
 0x2f9   :  { %9034 = vmatprep.subr.bf16.mxu0 %v13282_v47  ;;  %v13351_v47 = vld [vmem:[#allocation8 + $0x1274] ss:$40 sps:$4 sm:$0xff]   ;;  %v13349_v48 = vld [vmem:[#allocation8 + $0x1270] ss:$40 sps:$4 sm:$0xff]  }
 0x2fa   :  { %8935 = vmatprep.mubr.bf16.mxu1 %v14847_v54 }
 0x2fb   :  { %8936 = vmatmul.mubr.bf16.vlgmr.msra.gmra.mrb[8].mxu1 %v14849_v58 }
 0x2fc   :  { %9035 = vmatpush1.bf16.msra.mxu0 %v13280_v52  ;;  %8945 = vmatpush1.bf16.msra.mxu1 %v13283_v53  ;;  %v13357_v52 = vld [vmem:[#allocation8 + $0x12c4] ss:$40 sps:$4 sm:$0xff]   ;;  %v13352_v53 = vld [vmem:[#allocation8 + $0x508] ss:$40 sps:$4 sm:$0xff]  }
 0x2fd   :  { %8976 = vmatprep.mubr.bf16.mxu1 %v14852_v60  ;;  %9036 = vmatprep.subr.bf16.mxu0 %v13288_v55  ;;  %v13355_v55 = vld [vmem:[#allocation8 + $0x12c0] ss:$40 sps:$4 sm:$0xff]  }
 0x2fe   :  { %8946 = vmatprep.subr.bf16.mxu1 %v13291_v57  ;;  %v649_v57 = vsub.s32 6, %v14776_v8 }
 0x300   :  { %9037 = vmatpush1.bf16.msra.mxu0 %v13286_v59  ;;  %8947 = vmatpush1.bf16.msra.mxu1 %v13289_v49  ;;  %v13360_v59 = vld [vmem:[#allocation8 + $0x55c] ss:$40 sps:$4 sm:$0xff]  }
 0x301   :  { %9038 = vmatprep.subr.bf16.mxu0 %v13294_v61  ;;  %8948 = vmatprep.subr.bf16.mxu1 %v13297_v62  ;;  %v13363_v49 = vld [vmem:[#allocation8 + $0x1314] ss:$40 sps:$4 sm:$0xff]   ;;  %v13358_v61 = vld [vmem:[#allocation8 + $0x558] ss:$40 sps:$4 sm:$0xff]  }
 0x302   :  { %v13361_v62 = vld [vmem:[#allocation8 + $0x1310] ss:$40 sps:$4 sm:$0xff]  }
 0x304   :  { %9039 = vmatpush1.bf16.msra.mxu0 %v13292_v63  ;;  %8949 = vmatpush1.bf16.msra.mxu1 %v13295_v0  ;;  %v13366_v63 = vld [vmem:[#allocation8 + $0x5ac] ss:$40 sps:$4 sm:$0xff]  }
 0x305   :  { %9040 = vmatprep.subr.bf16.mxu0 %v13300_v1  ;;  %8950 = vmatprep.subr.bf16.mxu1 %v13303_v2  ;;  %v13369_v0 = vld [vmem:[#allocation8 + $0x1364] ss:$40 sps:$4 sm:$0xff]   ;;  %v650_v1 = vrot.slane %v14834_v13, %v649_v57  ;;  %v13364_v2 = vld [vmem:[#allocation8 + $0x5a8] ss:$40 sps:$4 sm:$0xff]  }
 0x306   :  { %v13376_v13 = vld [vmem:[#allocation8 + $0x648] ss:$40 sps:$4 sm:$0xff]  }
 0x308   :  { %9041 = vmatpush1.bf16.msra.mxu0 %v13298_v3  ;;  %8951 = vmatpush1.bf16.msra.mxu1 %v13301_v4  ;;  %v13367_v3 = vld [vmem:[#allocation8 + $0x1360] ss:$40 sps:$4 sm:$0xff]   ;;  %v13372_v4 = vld [vmem:[#allocation8 + $0x5fc] ss:$40 sps:$4 sm:$0xff]  }
 0x309   :  { %9042 = vmatprep.subr.bf16.mxu0 %v13306_v7  ;;  %8952 = vmatprep.subr.bf16.mxu1 %v13309_v9  ;;  %v13375_v7 = vld [vmem:[#allocation8 + $0x13b4] ss:$40 sps:$4 sm:$0xff]   ;;  %v12226_v9 = vadd.f32 %v14826_v19, %v650_v1  ;;  %v13379_v19 = vld [vmem:[#allocation8 + $0x698] ss:$40 sps:$4 sm:$0xff]  }
 0x30a   :  { %v13403_v1 = vld [vmem:[#allocation8 + $0x918] ss:$40 sps:$4 sm:$0xff]  }
 0x30c   :  { %9043 = vmatpush1.bf16.msra.mxu0 %v13304_v10  ;;  %8953 = vmatpush1.bf16.msra.mxu1 %v13307_v14  ;;  %v13370_v10 = vld [vmem:[#allocation8 + $0x5f8] ss:$40 sps:$4 sm:$0xff]  }
 0x30d   :  { %9044 = vmatprep.subr.bf16.mxu0 %v13312_v5  ;;  %8954 = vmatprep.subr.bf16.mxu1 %v13315_v15  ;;  %v13373_v14 = vld [vmem:[#allocation8 + $0x13b0] ss:$40 sps:$4 sm:$0xff]   ;;  %v13378_v5 = vld [vmem:[#allocation8 + $0x64c] ss:$40 sps:$4 sm:$0xff]  }
 0x30e   :  { %v13435_v15 = vld [vmem:[#allocation8 + $0x1404] ss:$40 sps:$4 sm:$0xff]  }
 0x310   :  { %9045 = vmatpush1.bf16.msra.mxu0 %v13310_v16  ;;  %8955 = vmatpush1.bf16.msra.mxu1 %v13313_v32  ;;  %v3953_v16 = vmax.f32 %v12226_v9, 0.0  ;;  %v13381_v32 = vld [vmem:[#allocation8 + $0x69c] ss:$40 sps:$4 sm:$0xff]  }
 0x311   :  { %9046 = vmatprep.subr.bf16.mxu0 %v13318_v18  ;;  %8956 = vmatprep.subr.bf16.mxu1 %v13321_v24  ;;  %v13433_v18 = vld [vmem:[#allocation8 + $0x1400] ss:$40 sps:$4 sm:$0xff]   ;;  %v13441_v24 = vld [vmem:[#allocation8 + $0x1454] ss:$40 sps:$4 sm:$0xff]  }
 0x312   :  { %v13411_v9 = vld [vmem:[#allocation8 + $0x9bc] ss:$40 sps:$4 sm:$0xff]  }
 0x314   :  { %9047 = vmatpush1.bf16.msra.mxu0 %v13316_v25  ;;  %8957 = vmatpush1.bf16.msra.mxu1 %v13319_v26  ;;  %v14863_v25 = vpack.c.bf16 %v3953_v16, %v3953_v16  ;;  %v13384_v26 = vld [vmem:[#allocation8 + $0x6ec] ss:$40 sps:$4 sm:$0xff]   ;;  %v13499_v16 = vld [vmem:[#allocation8 + $0x1770] ss:$40 sps:$4 sm:$0xff]  }
 0x315   :  { %9048 = vmatprep.subr.bf16.mxu0 %v13324_v28  ;;  %8958 = vmatprep.subr.bf16.mxu1 %v13327_v30  ;;  %v13439_v28 = vld [vmem:[#allocation8 + $0x1450] ss:$40 sps:$4 sm:$0xff]  }
 0x316   :  { %v13382_v30 = vld [vmem:[#allocation8 + $0x6e8] ss:$40 sps:$4 sm:$0xff]  }
 0x318   :  { %9049 = vmatpush1.bf16.msra.mxu0 %v13322_v20  ;;  %8959 = vmatpush1.bf16.msra.mxu1 %v13325_v27  ;;  %v13447_v20 = vld [vmem:[#allocation8 + $0x14a4] ss:$40 sps:$4 sm:$0xff]  }
 0x319   :  { %9050 = vmatprep.subr.bf16.mxu0 %v13330_v12  ;;  %8960 = vmatprep.subr.bf16.mxu1 %v13333_v31  ;;  %v13387_v27 = vld [vmem:[#allocation8 + $0x73c] ss:$40 sps:$4 sm:$0xff]   ;;  %v13445_v12 = vld [vmem:[#allocation8 + $0x14a0] ss:$40 sps:$4 sm:$0xff]  }
 0x31a   :  { %v13385_v31 = vld [vmem:[#allocation8 + $0x738] ss:$40 sps:$4 sm:$0xff]  }
 0x31c   :  { %9051 = vmatpush1.bf16.msra.mxu0 %v13328_v35  ;;  %8961 = vmatpush1.bf16.msra.mxu1 %v13331_v36  ;;  %v13453_v35 = vld [vmem:[#allocation8 + $0x14f4] ss:$40 sps:$4 sm:$0xff]  }
 0x31d   :  { %9052 = vmatprep.subr.bf16.mxu0 %v13336_v37  ;;  %8962 = vmatprep.subr.bf16.mxu1 %v13339_v17  ;;  %v13390_v36 = vld [vmem:[#allocation8 + $0x78c] ss:$40 sps:$4 sm:$0xff]   ;;  %v13451_v37 = vld [vmem:[#allocation8 + $0x14f0] ss:$40 sps:$4 sm:$0xff]  }
 0x31e   :  { %v13388_v17 = vld [vmem:[#allocation8 + $0x788] ss:$40 sps:$4 sm:$0xff]  }
 0x320   :  { %9053 = vmatpush1.bf16.msra.mxu0 %v13334_v38  ;;  %8963 = vmatpush1.bf16.msra.mxu1 %v13337_v39  ;;  %v13459_v38 = vld [vmem:[#allocation8 + $0x1544] ss:$40 sps:$4 sm:$0xff]  }
 0x321   :  { %9054 = vmatprep.subr.bf16.mxu0 %v13342_v42  ;;  %8964 = vmatprep.subr.bf16.mxu1 %v13345_v43  ;;  %v13393_v39 = vld [vmem:[#allocation8 + $0x7dc] ss:$40 sps:$4 sm:$0xff]   ;;  %v13457_v42 = vld [vmem:[#allocation8 + $0x1540] ss:$40 sps:$4 sm:$0xff]  }
 0x322   :  { %v13465_v43 = vld [vmem:[#allocation8 + $0x1594] ss:$40 sps:$4 sm:$0xff]  }
 0x324   :  { %9055 = vmatpush1.bf16.msra.mxu0 %v13340_v44  ;;  %8965 = vmatpush1.bf16.msra.mxu1 %v13343_v45  ;;  %v13391_v44 = vld [vmem:[#allocation8 + $0x7d8] ss:$40 sps:$4 sm:$0xff]   ;;  %v13396_v45 = vld [vmem:[#allocation8 + $0x82c] ss:$40 sps:$4 sm:$0xff]  }
 0x325   :  { %9056 = vmatprep.subr.bf16.mxu0 %v13348_v46  ;;  %8966 = vmatprep.subr.bf16.mxu1 %v13351_v47  ;;  %v13463_v46 = vld [vmem:[#allocation8 + $0x1590] ss:$40 sps:$4 sm:$0xff]   ;;  %v13471_v47 = vld [vmem:[#allocation8 + $0x15e4] ss:$40 sps:$4 sm:$0xff]  }
 0x328   :  { %9057 = vmatpush1.bf16.msra.mxu0 %v13346_v50  ;;  %8967 = vmatpush1.bf16.msra.mxu1 %v13349_v48  ;;  %v13394_v50 = vld [vmem:[#allocation8 + $0x828] ss:$40 sps:$4 sm:$0xff]   ;;  %v13399_v48 = vld [vmem:[#allocation8 + $0x87c] ss:$40 sps:$4 sm:$0xff]  }
 0x329   :  { %9067 = vmatprep.subr.bf16.mxu0 %v13354_v51  ;;  %8968 = vmatprep.subr.bf16.mxu1 %v13357_v52  ;;  %v13469_v51 = vld [vmem:[#allocation8 + $0x15e0] ss:$40 sps:$4 sm:$0xff]   ;;  %v13477_v52 = vld [vmem:[#allocation8 + $0x1634] ss:$40 sps:$4 sm:$0xff]  }
 0x32b   :  { %9059 = vmatmul.mubr.bf16.vlgmr.msra.gmra.mrb[16].mxu0 %v14812_v23 }
 0x32c   :  { %9068 = vmatpush1.bf16.msra.mxu0 %v13352_v53  ;;  %9099 = vmatprep.mubr.bf16.mxu0 %v14814_v41  ;;  %v13397_v53 = vld [vmem:[#allocation8 + $0x878] ss:$40 sps:$4 sm:$0xff]  }
 0x32d   :  { %8969 = vmatpush1.bf16.msra.mxu1 %v13355_v55  ;;  %9069 = vmatprep.subr.bf16.mxu0 %v13360_v59  ;;  %v13402_v55 = vld [vmem:[#allocation8 + $0x8cc] ss:$40 sps:$4 sm:$0xff]   ;;  %v13475_v59 = vld [vmem:[#allocation8 + $0x1630] ss:$40 sps:$4 sm:$0xff]  }
 0x32e   :  { %8970 = vmatprep.subr.bf16.mxu1 %v13363_v49  ;;  %v13483_v49 = vld [vmem:[#allocation8 + $0x1684] ss:$40 sps:$4 sm:$0xff]  }
 0x330   :  { %9070 = vmatpush1.bf16.msra.mxu0 %v13358_v61  ;;  %v13400_v61 = vld [vmem:[#allocation8 + $0x8c8] ss:$40 sps:$4 sm:$0xff]  }
 0x331   :  { %8971 = vmatpush1.bf16.msra.mxu1 %v13361_v62  ;;  %9071 = vmatprep.subr.bf16.mxu0 %v13366_v63  ;;  %v13405_v62 = vld [vmem:[#allocation8 + $0x91c] ss:$40 sps:$4 sm:$0xff]   ;;  %v13481_v63 = vld [vmem:[#allocation8 + $0x1680] ss:$40 sps:$4 sm:$0xff]  }
 0x332   :  { %8972 = vmatprep.subr.bf16.mxu1 %v13369_v0  ;;  %v13489_v0 = vld [vmem:[#allocation8 + $0x16d4] ss:$40 sps:$4 sm:$0xff]  }
 0x334   :  { %9072 = vmatpush1.bf16.msra.mxu0 %v13364_v2  ;;  %v13408_v2 = vld [vmem:[#allocation8 + $0x96c] ss:$40 sps:$4 sm:$0xff]  }
 0x335   :  { %8973 = vmatpush1.bf16.msra.mxu1 %v13367_v3  ;;  %9073 = vmatprep.subr.bf16.mxu0 %v13372_v4  ;;  %v13487_v3 = vld [vmem:[#allocation8 + $0x16d0] ss:$40 sps:$4 sm:$0xff]   ;;  %v13495_v4 = vld [vmem:[#allocation8 + $0x1724] ss:$40 sps:$4 sm:$0xff]  }
 0x336   :  { %8974 = vmatprep.subr.bf16.mxu1 %v13375_v7  ;;  %v13406_v7 = vld [vmem:[#allocation8 + $0x968] ss:$40 sps:$4 sm:$0xff]  }
 0x338   :  { %9074 = vmatpush1.bf16.msra.mxu0 %v13370_v10  ;;  %v13493_v10 = vld [vmem:[#allocation8 + $0x1720] ss:$40 sps:$4 sm:$0xff]  }
 0x339   :  { %8975 = vmatpush1.bf16.msra.mxu1 %v13373_v14  ;;  %9075 = vmatprep.subr.bf16.mxu0 %v13378_v5  ;;  %v13501_v14 = vld [vmem:[#allocation8 + $0x1774] ss:$40 sps:$4 sm:$0xff]   ;;  %v13409_v5 = vld [vmem:[#allocation8 + $0x9b8] ss:$40 sps:$4 sm:$0xff]  }
 0x33a   :  { %8985 = vmatprep.subr.bf16.mxu1 %v13435_v15  ;;  %v13414_v15 = vld [vmem:[#allocation8 + $0xa0c] ss:$40 sps:$4 sm:$0xff]  }
 0x33c   :  { %8977 = vmatmul.mubr.bf16.vlgmr.msra.gmra.mrb[8].mxu1 %v14863_v25  ;;  %9076 = vmatpush1.bf16.msra.mxu0 %v13376_v13  ;;  %v13507_v13 = vld [vmem:[#allocation8 + $0x17c4] ss:$40 sps:$4 sm:$0xff]  }
 0x33d   :  { %9077 = vmatprep.subr.bf16.mxu0 %v13381_v32  ;;  %8986 = vmatpush1.bf16.msra.mxu1 %v13433_v18  ;;  %v13412_v32 = vld [vmem:[#allocation8 + $0xa08] ss:$40 sps:$4 sm:$0xff]   ;;  %v13417_v18 = vld [vmem:[#allocation8 + $0xa5c] ss:$40 sps:$4 sm:$0xff]  }
 0x33e   :  { %8987 = vmatprep.subr.bf16.mxu1 %v13441_v24  ;;  %v13505_v24 = vld [vmem:[#allocation8 + $0x17c0] ss:$40 sps:$4 sm:$0xff]  }
 0x340   :  { %9078 = vmatpush1.bf16.msra.mxu0 %v13379_v19  ;;  %v13415_v19 = vld [vmem:[#allocation8 + $0xa58] ss:$40 sps:$4 sm:$0xff]  }
 0x341   :  { %9079 = vmatprep.subr.bf16.mxu0 %v13384_v26  ;;  %8988 = vmatpush1.bf16.msra.mxu1 %v13439_v28  ;;  %v13513_v26 = vld [vmem:[#allocation8 + $0x1814] ss:$40 sps:$4 sm:$0xff]  }
 0x342   :  { %8989 = vmatprep.subr.bf16.mxu1 %v13447_v20  ;;  %v13420_v28 = vld [vmem:[#allocation8 + $0xaac] ss:$40 sps:$4 sm:$0xff]  }
 0x343   :  { %v13519_v20 = vld [vmem:[#allocation8 + $0x1864] ss:$40 sps:$4 sm:$0xff]  }
 0x344   :  { %9080 = vmatpush1.bf16.msra.mxu0 %v13382_v30  ;;  %v13511_v30 = vld [vmem:[#allocation8 + $0x1810] ss:$40 sps:$4 sm:$0xff]  }
 0x345   :  { %9081 = vmatprep.subr.bf16.mxu0 %v13387_v27  ;;  %8990 = vmatpush1.bf16.msra.mxu1 %v13445_v12  ;;  %v13418_v27 = vld [vmem:[#allocation8 + $0xaa8] ss:$40 sps:$4 sm:$0xff]   ;;  %v13423_v12 = vld [vmem:[#allocation8 + $0xafc] ss:$40 sps:$4 sm:$0xff]  }
 0x346   :  { %8991 = vmatprep.subr.bf16.mxu1 %v13453_v35  ;;  %v13525_v35 = vld [vmem:[#allocation8 + $0x18b4] ss:$40 sps:$4 sm:$0xff]  }
 0x348   :  { %9082 = vmatpush1.bf16.msra.mxu0 %v13385_v31  ;;  %v13517_v31 = vld [vmem:[#allocation8 + $0x1860] ss:$40 sps:$4 sm:$0xff]  }
 0x349   :  { %9083 = vmatprep.subr.bf16.mxu0 %v13390_v36  ;;  %8992 = vmatpush1.bf16.msra.mxu1 %v13451_v37  ;;  %v13421_v36 = vld [vmem:[#allocation8 + $0xaf8] ss:$40 sps:$4 sm:$0xff]   ;;  %v13426_v37 = vld [vmem:[#allocation8 + $0xb4c] ss:$40 sps:$4 sm:$0xff]  }
 0x34a   :  { %8993 = vmatprep.subr.bf16.mxu1 %v13459_v38  ;;  %v13534_v38 = vld [vmem:[#allocation8 + $0x14] ss:$40 sps:$4 sm:$0xff]  }
 0x34c   :  { %9084 = vmatpush1.bf16.msra.mxu0 %v13388_v17  ;;  %v13523_v17 = vld [vmem:[#allocation8 + $0x18b0] ss:$40 sps:$4 sm:$0xff]  }
 0x34d   :  { %9085 = vmatprep.subr.bf16.mxu0 %v13393_v39  ;;  %8994 = vmatpush1.bf16.msra.mxu1 %v13457_v42  ;;  %v13424_v39 = vld [vmem:[#allocation8 + $0xb48] ss:$40 sps:$4 sm:$0xff]   ;;  %v13429_v42 = vld [vmem:[#allocation8 + $0xb9c] ss:$40 sps:$4 sm:$0xff]  }
 0x34e   :  { %8995 = vmatprep.subr.bf16.mxu1 %v13465_v43  ;;  %v13427_v43 = vld [vmem:[#allocation8 + $0xb98] ss:$40 sps:$4 sm:$0xff]  }
 0x350   :  { %9086 = vmatpush1.bf16.msra.mxu0 %v13391_v44  ;;  %v13432_v44 = vld [vmem:[#allocation8 + $0xbec] ss:$40 sps:$4 sm:$0xff]  }
 0x351   :  { %9087 = vmatprep.subr.bf16.mxu0 %v13396_v45  ;;  %8996 = vmatpush1.bf16.msra.mxu1 %v13463_v46  ;;  %v13430_v45 = vld [vmem:[#allocation8 + $0xbe8] ss:$40 sps:$4 sm:$0xff]   ;;  %v13438_v46 = vld [vmem:[#allocation8 + $0xc3c] ss:$40 sps:$4 sm:$0xff]  }
 0x352   :  { %8997 = vmatprep.subr.bf16.mxu1 %v13471_v47  ;;  %v13436_v47 = vld [vmem:[#allocation8 + $0xc38] ss:$40 sps:$4 sm:$0xff]  }
 0x354   :  { %9088 = vmatpush1.bf16.msra.mxu0 %v13394_v50  ;;  %v13444_v50 = vld [vmem:[#allocation8 + $0xc8c] ss:$40 sps:$4 sm:$0xff]  }
 0x355   :  { %9089 = vmatprep.subr.bf16.mxu0 %v13399_v48  ;;  %8998 = vmatpush1.bf16.msra.mxu1 %v13469_v51  ;;  %v13442_v48 = vld [vmem:[#allocation8 + $0xc88] ss:$40 sps:$4 sm:$0xff]   ;;  %v13450_v51 = vld [vmem:[#allocation8 + $0xcdc] ss:$40 sps:$4 sm:$0xff]  }
 0x356   :  { %8999 = vmatprep.subr.bf16.mxu1 %v13477_v52  ;;  %v13448_v52 = vld [vmem:[#allocation8 + $0xcd8] ss:$40 sps:$4 sm:$0xff]  }
 0x358   :  { %9090 = vmatpush1.bf16.msra.mxu0 %v13397_v53  ;;  %v13456_v53 = vld [vmem:[#allocation8 + $0xd2c] ss:$40 sps:$4 sm:$0xff]  }
 0x359   :  { %9091 = vmatprep.subr.bf16.mxu0 %v13402_v55  ;;  %9000 = vmatpush1.bf16.msra.mxu1 %v13475_v59  ;;  %v13454_v55 = vld [vmem:[#allocation8 + $0xd28] ss:$40 sps:$4 sm:$0xff]   ;;  %v13462_v59 = vld [vmem:[#allocation8 + $0xd7c] ss:$40 sps:$4 sm:$0xff]  }
 0x35a   :  { %9001 = vmatprep.subr.bf16.mxu1 %v13483_v49  ;;  %v13460_v49 = vld [vmem:[#allocation8 + $0xd78] ss:$40 sps:$4 sm:$0xff]  }
 0x35c   :  { %9092 = vmatpush1.bf16.msra.mxu0 %v13400_v61  ;;  %v13468_v61 = vld [vmem:[#allocation8 + $0xdcc] ss:$40 sps:$4 sm:$0xff]  }
 0x35d   :  { %9093 = vmatprep.subr.bf16.mxu0 %v13405_v62  ;;  %9002 = vmatpush1.bf16.msra.mxu1 %v13481_v63  ;;  %v13466_v62 = vld [vmem:[#allocation8 + $0xdc8] ss:$40 sps:$4 sm:$0xff]   ;;  %v13474_v63 = vld [vmem:[#allocation8 + $0xe1c] ss:$40 sps:$4 sm:$0xff]  }
 0x35e   :  { %9003 = vmatprep.subr.bf16.mxu1 %v13489_v0  ;;  %v13472_v0 = vld [vmem:[#allocation8 + $0xe18] ss:$40 sps:$4 sm:$0xff]  }
 0x360   :  { %9094 = vmatpush1.bf16.msra.mxu0 %v13403_v1  ;;  %v13480_v1 = vld [vmem:[#allocation8 + $0xe6c] ss:$40 sps:$4 sm:$0xff]  }
 0x361   :  { %9095 = vmatprep.subr.bf16.mxu0 %v13408_v2  ;;  %9004 = vmatpush1.bf16.msra.mxu1 %v13487_v3  ;;  %v13478_v2 = vld [vmem:[#allocation8 + $0xe68] ss:$40 sps:$4 sm:$0xff]   ;;  %v13486_v3 = vld [vmem:[#allocation8 + $0xebc] ss:$40 sps:$4 sm:$0xff]  }
 0x362   :  { %9005 = vmatprep.subr.bf16.mxu1 %v13495_v4  ;;  %v13484_v4 = vld [vmem:[#allocation8 + $0xeb8] ss:$40 sps:$4 sm:$0xff]  }
 0x364   :  { %9096 = vmatpush1.bf16.msra.mxu0 %v13406_v7  ;;  %v13492_v7 = vld [vmem:[#allocation8 + $0xf0c] ss:$40 sps:$4 sm:$0xff]  }
 0x365   :  { %9097 = vmatprep.subr.bf16.mxu0 %v13411_v9  ;;  %9006 = vmatpush1.bf16.msra.mxu1 %v13493_v10  ;;  %v13490_v9 = vld [vmem:[#allocation8 + $0xf08] ss:$40 sps:$4 sm:$0xff]   ;;  %v13498_v10 = vld [vmem:[#allocation8 + $0xf5c] ss:$40 sps:$4 sm:$0xff]  }
 0x366   :  { %9007 = vmatprep.subr.bf16.mxu1 %v13501_v14  ;;  %v13496_v14 = vld [vmem:[#allocation8 + $0xf58] ss:$40 sps:$4 sm:$0xff]  }
 0x368   :  { %9098 = vmatpush1.bf16.msra.mxu0 %v13409_v5  ;;  %v13504_v5 = vld [vmem:[#allocation8 + $0xfac] ss:$40 sps:$4 sm:$0xff]  }
 0x369   :  { %9108 = vmatprep.subr.bf16.mxu0 %v13414_v15  ;;  %9008 = vmatpush1.bf16.msra.mxu1 %v13499_v16  ;;  %v13502_v15 = vld [vmem:[#allocation8 + $0xfa8] ss:$40 sps:$4 sm:$0xff]   ;;  %v13510_v16 = vld [vmem:[#allocation8 + $0xffc] ss:$40 sps:$4 sm:$0xff]  }
 0x36a   :  { %9009 = vmatprep.subr.bf16.mxu1 %v13507_v13  ;;  %v13508_v13 = vld [vmem:[#allocation8 + $0xff8] ss:$40 sps:$4 sm:$0xff]  }
 0x36b   :  { %9100 = vmatmul.mubr.bf16.vlgmr.msra.gmra.mrb[16].mxu0 %v14821_v56 }
 0x36c   :  { %9109 = vmatpush1.bf16.msra.mxu0 %v13412_v32  ;;  %9140 = vmatprep.mubr.bf16.mxu0 %v14847_v54  ;;  %v13516_v32 = vld [vmem:[#allocation8 + $0x104c] ss:$40 sps:$4 sm:$0xff]  }
 0x36d   :  { %9110 = vmatprep.subr.bf16.mxu0 %v13417_v18  ;;  %9010 = vmatpush1.bf16.msra.mxu1 %v13505_v24  ;;  %v13514_v18 = vld [vmem:[#allocation8 + $0x1048] ss:$40 sps:$4 sm:$0xff]   ;;  %v620_v24 = vld [vmem:[#allocation7 + $0x8] sm:$0x3] }
 0x36e   :  { %9011 = vmatprep.subr.bf16.mxu1 %v13513_v26  ;;  %v658_v26 = vrot.slane %v620_v24, %v14806_v6 }
 0x370   :  { %9111 = vmatpush1.bf16.msra.mxu0 %v13415_v19  ;;  %v13522_v19 = vld [vmem:[#allocation8 + $0x109c] ss:$40 sps:$4 sm:$0xff]  }
 0x371   :  { %9112 = vmatprep.subr.bf16.mxu0 %v13420_v28  ;;  %9012 = vmatpush1.bf16.msra.mxu1 %v13511_v30  ;;  %v13520_v28 = vld [vmem:[#allocation8 + $0x1098] ss:$40 sps:$4 sm:$0xff]   ;;  %v662_v30 = vrot.slane %v620_v24, %v14779_v11 }
 0x372   :  { %9013 = vmatprep.subr.bf16.mxu1 %v13519_v20  ;;  %v13528_v20 = vld [vmem:[#allocation8 + $0x10ec] ss:$40 sps:$4 sm:$0xff]   ;;  %v13574_v24 = vld [vmem:[#allocation8 + $0x240] ss:$40 sps:$4 sm:$0xff]  }
 0x374   :  { %9113 = vmatpush1.bf16.msra.mxu0 %v13418_v27 }
 0x375   :  { %9114 = vmatprep.subr.bf16.mxu0 %v13423_v12  ;;  %9014 = vmatpush1.bf16.msra.mxu1 %v13517_v31 }
 0x376   :  { %9015 = vmatprep.subr.bf16.mxu1 %v13525_v35 }
 0x378   :  { %9115 = vmatpush1.bf16.msra.mxu0 %v13421_v36 }
 0x379   :  { %9116 = vmatprep.subr.bf16.mxu0 %v13426_v37  ;;  %9016 = vmatpush1.bf16.msra.mxu1 %v13523_v17  ;;  %v13526_v37 = vld [vmem:[#allocation8 + $0x10e8] ss:$40 sps:$4 sm:$0xff]  }
 0x37a   :  { %9231 = vmatprep.subr.bf16.mxu1 %v13534_v38 }
 0x37c   :  { %9117 = vmatpush1.bf16.msra.mxu0 %v13424_v39  ;;  %v13531_v39 = vld [vmem:[#allocation8 + $0x113c] ss:$40 sps:$4 sm:$0xff]  }
 0x37d   :  { %9118 = vmatprep.subr.bf16.mxu0 %v13429_v42 }
 0x380   :  { %9119 = vmatpush1.bf16.msra.mxu0 %v13427_v43 }
 0x381   :  { %9120 = vmatprep.subr.bf16.mxu0 %v13432_v44  ;;  %v13529_v44 = vld [vmem:[#allocation8 + $0x1138] ss:$40 sps:$4 sm:$0xff]  }
 0x384   :  { %9121 = vmatpush1.bf16.msra.mxu0 %v13430_v45  ;;  %v13532_v45 = vld [vmem:[#allocation8 + $0x10] ss:$40 sps:$4 sm:$0xff]  }
 0x385   :  { %9122 = vmatprep.subr.bf16.mxu0 %v13438_v46 }
 0x388   :  { %9123 = vmatpush1.bf16.msra.mxu0 %v13436_v47  ;;  %v13537_v47 = vld [vmem:[#allocation8 + $0x118c] ss:$40 sps:$4 sm:$0xff]  }
 0x389   :  { %9124 = vmatprep.subr.bf16.mxu0 %v13444_v50  ;;  %v13540_v50 = vld [vmem:[#allocation8 + $0x64] ss:$40 sps:$4 sm:$0xff]  }
 0x38c   :  { %9125 = vmatpush1.bf16.msra.mxu0 %v13442_v48  ;;  %v13535_v48 = vld [vmem:[#allocation8 + $0x1188] ss:$40 sps:$4 sm:$0xff]  }
 0x38d   :  { %9126 = vmatprep.subr.bf16.mxu0 %v13450_v51  ;;  %v13538_v51 = vld [vmem:[#allocation8 + $0x60] ss:$40 sps:$4 sm:$0xff]  }
 0x390   :  { %9127 = vmatpush1.bf16.msra.mxu0 %v13448_v52  ;;  %v13543_v52 = vld [vmem:[#allocation8 + $0x11dc] ss:$40 sps:$4 sm:$0xff]  }
 0x391   :  { %9128 = vmatprep.subr.bf16.mxu0 %v13456_v53  ;;  %v13546_v53 = vld [vmem:[#allocation8 + $0xb4] ss:$40 sps:$4 sm:$0xff]  }
 0x394   :  { %9129 = vmatpush1.bf16.msra.mxu0 %v13454_v55  ;;  %v13541_v55 = vld [vmem:[#allocation8 + $0x11d8] ss:$40 sps:$4 sm:$0xff]  }
 0x395   :  { %9130 = vmatprep.subr.bf16.mxu0 %v13462_v59  ;;  %v13544_v59 = vld [vmem:[#allocation8 + $0xb0] ss:$40 sps:$4 sm:$0xff]  }
 0x398   :  { %9131 = vmatpush1.bf16.msra.mxu0 %v13460_v49  ;;  %v13549_v49 = vld [vmem:[#allocation8 + $0x122c] ss:$40 sps:$4 sm:$0xff]  }
 0x399   :  { %9132 = vmatprep.subr.bf16.mxu0 %v13468_v61  ;;  %v13552_v61 = vld [vmem:[#allocation8 + $0x104] ss:$40 sps:$4 sm:$0xff]  }
 0x39c   :  { %9133 = vmatpush1.bf16.msra.mxu0 %v13466_v62  ;;  %v13547_v62 = vld [vmem:[#allocation8 + $0x1228] ss:$40 sps:$4 sm:$0xff]  }
 0x39d   :  { %9134 = vmatprep.subr.bf16.mxu0 %v13474_v63  ;;  %v13550_v63 = vld [vmem:[#allocation8 + $0x100] ss:$40 sps:$4 sm:$0xff]  }
 0x3a0   :  { %9135 = vmatpush1.bf16.msra.mxu0 %v13472_v0  ;;  %v13555_v0 = vld [vmem:[#allocation8 + $0x127c] ss:$40 sps:$4 sm:$0xff]  }
 0x3a1   :  { %9136 = vmatprep.subr.bf16.mxu0 %v13480_v1  ;;  %v13558_v1 = vld [vmem:[#allocation8 + $0x154] ss:$40 sps:$4 sm:$0xff]  }
 0x3a4   :  { %9137 = vmatpush1.bf16.msra.mxu0 %v13478_v2  ;;  %v13553_v2 = vld [vmem:[#allocation8 + $0x1278] ss:$40 sps:$4 sm:$0xff]  }
 0x3a5   :  { %9138 = vmatprep.subr.bf16.mxu0 %v13486_v3  ;;  %v13556_v3 = vld [vmem:[#allocation8 + $0x150] ss:$40 sps:$4 sm:$0xff]  }
 0x3a8   :  { %9139 = vmatpush1.bf16.msra.mxu0 %v13484_v4  ;;  %v13561_v4 = vld [vmem:[#allocation8 + $0x12cc] ss:$40 sps:$4 sm:$0xff]  }
 0x3a9   :  { %9149 = vmatprep.subr.bf16.mxu0 %v13492_v7  ;;  %v13564_v7 = vld [vmem:[#allocation8 + $0x1a4] ss:$40 sps:$4 sm:$0xff]  }
 0x3ab   :  { %9141 = vmatmul.mubr.bf16.vlgmr.msra.gmra.mrb[16].mxu0 %v14849_v58 }
 0x3ac   :  { %9150 = vmatpush1.bf16.msra.mxu0 %v13490_v9  ;;  %9181 = vmatprep.mubr.bf16.mxu0 %v14852_v60  ;;  %v13559_v9 = vld [vmem:[#allocation8 + $0x12c8] ss:$40 sps:$4 sm:$0xff]  }
 0x3ad   :  { %9151 = vmatprep.subr.bf16.mxu0 %v13498_v10  ;;  %v13562_v10 = vld [vmem:[#allocation8 + $0x1a0] ss:$40 sps:$4 sm:$0xff]  }
 0x3b0   :  { %9152 = vmatpush1.bf16.msra.mxu0 %v13496_v14  ;;  %v13567_v14 = vld [vmem:[#allocation8 + $0x131c] ss:$40 sps:$4 sm:$0xff]  }
 0x3b1   :  { %9153 = vmatprep.subr.bf16.mxu0 %v13504_v5  ;;  %v13570_v5 = vld [vmem:[#allocation8 + $0x1f4] ss:$40 sps:$4 sm:$0xff]  }
 0x3b4   :  { %9154 = vmatpush1.bf16.msra.mxu0 %v13502_v15  ;;  %v13565_v15 = vld [vmem:[#allocation8 + $0x1318] ss:$40 sps:$4 sm:$0xff]  }
 0x3b5   :  { %9155 = vmatprep.subr.bf16.mxu0 %v13510_v16  ;;  %v13568_v16 = vld [vmem:[#allocation8 + $0x1f0] ss:$40 sps:$4 sm:$0xff]  }
 0x3b8   :  { %9156 = vmatpush1.bf16.msra.mxu0 %v13508_v13  ;;  %v13573_v13 = vld [vmem:[#allocation8 + $0x136c] ss:$40 sps:$4 sm:$0xff]  }
 0x3b9   :  { %9157 = vmatprep.subr.bf16.mxu0 %v13516_v32  ;;  %v13576_v32 = vld [vmem:[#allocation8 + $0x244] ss:$40 sps:$4 sm:$0xff]  }
 0x3bc   :  { %9158 = vmatpush1.bf16.msra.mxu0 %v13514_v18  ;;  %v13571_v18 = vld [vmem:[#allocation8 + $0x1368] ss:$40 sps:$4 sm:$0xff]  }
 0x3bd   :  { %9159 = vmatprep.subr.bf16.mxu0 %v13522_v19  ;;  %v13579_v19 = vld [vmem:[#allocation8 + $0x13bc] ss:$40 sps:$4 sm:$0xff]  }
 0x3be   :  { %v3940_v27 = vpop.f32.mrb[12].mxu0 }
 0x3bf   :  { %v12228_v12 = vadd.f32 %v3940_v27, %v658_v26  ;;  %v3942_v31 = vpop.f32.mrb[13].mxu0  ;;  %v13582_v26 = vld [vmem:[#allocation8 + $0x294] ss:$40 sps:$4 sm:$0xff]   ;;  %v13588_v27 = vld [vmem:[#allocation8 + $0x2e4] ss:$40 sps:$4 sm:$0xff]  }
 0x3c0   :  { %v12229_v35 = vadd.f32 %v3942_v31, %v662_v30  ;;  %9160 = vmatpush1.bf16.msra.mxu0 %v13520_v28  ;;  %v3944_v36 = vpop.f32.mrb[14].mxu0  ;;  %v13577_v28 = vld [vmem:[#allocation8 + $0x13b8] ss:$40 sps:$4 sm:$0xff]  }
 0x3c1   :  { %v3955_v17 = vmax.f32 %v12228_v12, 0.0  ;;  %v3945_v38 = vpop.f32.mrb[15].mxu0  ;;  %9161 = vmatprep.subr.bf16.mxu0 %v13528_v20  ;;  %v13580_v30 = vld [vmem:[#allocation8 + $0x290] ss:$40 sps:$4 sm:$0xff]   ;;  %v13585_v20 = vld [vmem:[#allocation8 + $0x140c] ss:$40 sps:$4 sm:$0xff]  }
 0x3c2   :  { %v3956_v42 = vmax.f32 %v12229_v35, 0.0  ;;  %v13583_v12 = vld [vmem:[#allocation8 + $0x1408] ss:$40 sps:$4 sm:$0xff]   ;;  %v13591_v35 = vld [vmem:[#allocation8 + $0x145c] ss:$40 sps:$4 sm:$0xff]  }
 0x3c3   :  { %v14874_v46 = vpack.c.bf16 %v3955_v17, %v3955_v17  ;;  %v13586_v31 = vld [vmem:[#allocation8 + $0x2e0] ss:$40 sps:$4 sm:$0xff]   ;;  %v13594_v36 = vld [vmem:[#allocation8 + $0x334] ss:$40 sps:$4 sm:$0xff]   ;;  %v13592_v17 = vld [vmem:[#allocation8 + $0x330] ss:$40 sps:$4 sm:$0xff]  }
 0x3c4   :  { %v14872_v43 = vpack.c.bf16 %v3956_v42, %v3956_v42  ;;  %9162 = vmatpush1.bf16.msra.mxu0 %v13526_v37  ;;  %v13589_v37 = vld [vmem:[#allocation8 + $0x1458] ss:$40 sps:$4 sm:$0xff]   ;;  %v13597_v38 = vld [vmem:[#allocation8 + $0x14ac] ss:$40 sps:$4 sm:$0xff]   ;;  %v13595_v42 = vld [vmem:[#allocation8 + $0x14a8] ss:$40 sps:$4 sm:$0xff]  }
 0x3c5   :  { %9163 = vmatprep.subr.bf16.mxu0 %v13531_v39  ;;  %v13600_v39 = vld [vmem:[#allocation8 + $0x384] ss:$40 sps:$4 sm:$0xff]  }
 0x3c6   :  { %9017 = vmatprep.mubr.bf16.mxu1 %v14872_v43 }
 0x3c7   :  { %9018 = vmatmul.mubr.bf16.vlgmr.msra.gmra.mrb[8].mxu1 %v14874_v46 }
 0x3c8   :  { %9164 = vmatpush1.bf16.msra.mxu0 %v13529_v44  ;;  %9232 = vmatpush1.bf16.msra.mxu1 %v13532_v45  ;;  %v13598_v44 = vld [vmem:[#allocation8 + $0x380] ss:$40 sps:$4 sm:$0xff]   ;;  %v13603_v45 = vld [vmem:[#allocation8 + $0x14fc] ss:$40 sps:$4 sm:$0xff]  }
 0x3c9   :  { %9263 = vmatprep.mubr.bf16.mxu1 %v14798_v40  ;;  %9165 = vmatprep.subr.bf16.mxu0 %v13537_v47  ;;  %v13606_v47 = vld [vmem:[#allocation8 + $0x3d4] ss:$40 sps:$4 sm:$0xff]  }
 0x3ca   :  { %9233 = vmatprep.subr.bf16.mxu1 %v13540_v50  ;;  %v13601_v50 = vld [vmem:[#allocation8 + $0x14f8] ss:$40 sps:$4 sm:$0xff]  }
 0x3cc   :  { %9166 = vmatpush1.bf16.msra.mxu0 %v13535_v48  ;;  %9234 = vmatpush1.bf16.msra.mxu1 %v13538_v51  ;;  %v13604_v48 = vld [vmem:[#allocation8 + $0x3d0] ss:$40 sps:$4 sm:$0xff]   ;;  %v13609_v51 = vld [vmem:[#allocation8 + $0x154c] ss:$40 sps:$4 sm:$0xff]  }
 0x3cd   :  { %9167 = vmatprep.subr.bf16.mxu0 %v13543_v52  ;;  %9235 = vmatprep.subr.bf16.mxu1 %v13546_v53  ;;  %v13612_v52 = vld [vmem:[#allocation8 + $0x424] ss:$40 sps:$4 sm:$0xff]   ;;  %v13607_v53 = vld [vmem:[#allocation8 + $0x1548] ss:$40 sps:$4 sm:$0xff]  }
 0x3d0   :  { %9168 = vmatpush1.bf16.msra.mxu0 %v13541_v55  ;;  %9236 = vmatpush1.bf16.msra.mxu1 %v13544_v59  ;;  %v13610_v55 = vld [vmem:[#allocation8 + $0x420] ss:$40 sps:$4 sm:$0xff]   ;;  %v13615_v59 = vld [vmem:[#allocation8 + $0x159c] ss:$40 sps:$4 sm:$0xff]  }
 0x3d1   :  { %9169 = vmatprep.subr.bf16.mxu0 %v13549_v49  ;;  %9237 = vmatprep.subr.bf16.mxu1 %v13552_v61  ;;  %v13618_v49 = vld [vmem:[#allocation8 + $0x474] ss:$40 sps:$4 sm:$0xff]   ;;  %v13613_v61 = vld [vmem:[#allocation8 + $0x1598] ss:$40 sps:$4 sm:$0xff]  }
 0x3d4   :  { %9170 = vmatpush1.bf16.msra.mxu0 %v13547_v62  ;;  %9238 = vmatpush1.bf16.msra.mxu1 %v13550_v63  ;;  %v13616_v62 = vld [vmem:[#allocation8 + $0x470] ss:$40 sps:$4 sm:$0xff]   ;;  %v13621_v63 = vld [vmem:[#allocation8 + $0x15ec] ss:$40 sps:$4 sm:$0xff]  }
 0x3d5   :  { %9171 = vmatprep.subr.bf16.mxu0 %v13555_v0  ;;  %9239 = vmatprep.subr.bf16.mxu1 %v13558_v1  ;;  %v13624_v0 = vld [vmem:[#allocation8 + $0x4c4] ss:$40 sps:$4 sm:$0xff]   ;;  %v13619_v1 = vld [vmem:[#allocation8 + $0x15e8] ss:$40 sps:$4 sm:$0xff]  }
 0x3d8   :  { %9172 = vmatpush1.bf16.msra.mxu0 %v13553_v2  ;;  %9240 = vmatpush1.bf16.msra.mxu1 %v13556_v3  ;;  %v13622_v2 = vld [vmem:[#allocation8 + $0x4c0] ss:$40 sps:$4 sm:$0xff]   ;;  %v13627_v3 = vld [vmem:[#allocation8 + $0x163c] ss:$40 sps:$4 sm:$0xff]  }
 0x3d9   :  { %9173 = vmatprep.subr.bf16.mxu0 %v13561_v4  ;;  %9241 = vmatprep.subr.bf16.mxu1 %v13564_v7  ;;  %v13630_v4 = vld [vmem:[#allocation8 + $0x514] ss:$40 sps:$4 sm:$0xff]   ;;  %v13625_v7 = vld [vmem:[#allocation8 + $0x1638] ss:$40 sps:$4 sm:$0xff]  }
 0x3dc   :  { %9174 = vmatpush1.bf16.msra.mxu0 %v13559_v9  ;;  %9242 = vmatpush1.bf16.msra.mxu1 %v13562_v10  ;;  %v13628_v9 = vld [vmem:[#allocation8 + $0x510] ss:$40 sps:$4 sm:$0xff]   ;;  %v13633_v10 = vld [vmem:[#allocation8 + $0x168c] ss:$40 sps:$4 sm:$0xff]  }
 0x3dd   :  { %9175 = vmatprep.subr.bf16.mxu0 %v13567_v14  ;;  %9243 = vmatprep.subr.bf16.mxu1 %v13570_v5  ;;  %v13636_v14 = vld [vmem:[#allocation8 + $0x564] ss:$40 sps:$4 sm:$0xff]   ;;  %v13631_v5 = vld [vmem:[#allocation8 + $0x1688] ss:$40 sps:$4 sm:$0xff]  }
 0x3e0   :  { %9176 = vmatpush1.bf16.msra.mxu0 %v13565_v15  ;;  %9244 = vmatpush1.bf16.msra.mxu1 %v13568_v16  ;;  %v13634_v15 = vld [vmem:[#allocation8 + $0x560] ss:$40 sps:$4 sm:$0xff]   ;;  %v13639_v16 = vld [vmem:[#allocation8 + $0x16dc] ss:$40 sps:$4 sm:$0xff]  }
 0x3e1   :  { %9177 = vmatprep.subr.bf16.mxu0 %v13573_v13  ;;  %9245 = vmatprep.subr.bf16.mxu1 %v13576_v32  ;;  %v13642_v13 = vld [vmem:[#allocation8 + $0x5b4] ss:$40 sps:$4 sm:$0xff]   ;;  %v13637_v32 = vld [vmem:[#allocation8 + $0x16d8] ss:$40 sps:$4 sm:$0xff]  }
 0x3e4   :  { %9178 = vmatpush1.bf16.msra.mxu0 %v13571_v18  ;;  %9246 = vmatpush1.bf16.msra.mxu1 %v13574_v24  ;;  %v13640_v18 = vld [vmem:[#allocation8 + $0x5b0] ss:$40 sps:$4 sm:$0xff]   ;;  %v13645_v24 = vld [vmem:[#allocation8 + $0x172c] ss:$40 sps:$4 sm:$0xff]  }
 0x3e5   :  { %9179 = vmatprep.subr.bf16.mxu0 %v13579_v19  ;;  %9247 = vmatprep.subr.bf16.mxu1 %v13582_v26  ;;  %v13648_v19 = vld [vmem:[#allocation8 + $0x604] ss:$40 sps:$4 sm:$0xff]   ;;  %v13643_v26 = vld [vmem:[#allocation8 + $0x1728] ss:$40 sps:$4 sm:$0xff]  }
 0x3e8   :  { %9180 = vmatpush1.bf16.msra.mxu0 %v13577_v28  ;;  %9248 = vmatpush1.bf16.msra.mxu1 %v13580_v30  ;;  %v13646_v28 = vld [vmem:[#allocation8 + $0x600] ss:$40 sps:$4 sm:$0xff]   ;;  %v13651_v30 = vld [vmem:[#allocation8 + $0x177c] ss:$40 sps:$4 sm:$0xff]  }
 0x3e9   :  { %9190 = vmatprep.subr.bf16.mxu0 %v13585_v20  ;;  %9249 = vmatprep.subr.bf16.mxu1 %v13588_v27  ;;  %v13654_v20 = vld [vmem:[#allocation8 + $0x654] ss:$40 sps:$4 sm:$0xff]   ;;  %v13649_v27 = vld [vmem:[#allocation8 + $0x1778] ss:$40 sps:$4 sm:$0xff]  }
 0x3eb   :  { %9182 = vmatmul.mubr.bf16.vlgmr.msra.gmra.mrb[16].mxu0 %v14863_v25 }
 0x3ec   :  { %9191 = vmatpush1.bf16.msra.mxu0 %v13583_v12  ;;  %9222 = vmatprep.mubr.bf16.mxu0 %v14872_v43  ;;  %v13652_v12 = vld [vmem:[#allocation8 + $0x650] ss:$40 sps:$4 sm:$0xff]  }
 0x3ed   :  { %9250 = vmatpush1.bf16.msra.mxu1 %v13586_v31  ;;  %9192 = vmatprep.subr.bf16.mxu0 %v13591_v35  ;;  %v13657_v31 = vld [vmem:[#allocation8 + $0x17cc] ss:$40 sps:$4 sm:$0xff]  }
 0x3ee   :  { %9251 = vmatprep.subr.bf16.mxu1 %v13594_v36  ;;  %v13660_v35 = vld [vmem:[#allocation8 + $0x6a4] ss:$40 sps:$4 sm:$0xff]   ;;  %v13655_v36 = vld [vmem:[#allocation8 + $0x17c8] ss:$40 sps:$4 sm:$0xff]  }
 0x3f0   :  { %9193 = vmatpush1.bf16.msra.mxu0 %v13589_v37  ;;  %v13658_v37 = vld [vmem:[#allocation8 + $0x6a0] ss:$40 sps:$4 sm:$0xff]  }
 0x3f1   :  { %9252 = vmatpush1.bf16.msra.mxu1 %v13592_v17  ;;  %9194 = vmatprep.subr.bf16.mxu0 %v13597_v38  ;;  %v13663_v17 = vld [vmem:[#allocation8 + $0x181c] ss:$40 sps:$4 sm:$0xff]  }
 0x3f2   :  { %9253 = vmatprep.subr.bf16.mxu1 %v13600_v39  ;;  %v13666_v38 = vld [vmem:[#allocation8 + $0x6f4] ss:$40 sps:$4 sm:$0xff]   ;;  %v13661_v39 = vld [vmem:[#allocation8 + $0x1818] ss:$40 sps:$4 sm:$0xff]  }
 0x3f4   :  { %9195 = vmatpush1.bf16.msra.mxu0 %v13595_v42  ;;  %v13664_v42 = vld [vmem:[#allocation8 + $0x6f0] ss:$40 sps:$4 sm:$0xff]  }
 0x3f5   :  { %9254 = vmatpush1.bf16.msra.mxu1 %v13598_v44  ;;  %9196 = vmatprep.subr.bf16.mxu0 %v13603_v45  ;;  %v13669_v44 = vld [vmem:[#allocation8 + $0x186c] ss:$40 sps:$4 sm:$0xff]  }
 0x3f6   :  { %9255 = vmatprep.subr.bf16.mxu1 %v13606_v47  ;;  %v13672_v45 = vld [vmem:[#allocation8 + $0x744] ss:$40 sps:$4 sm:$0xff]   ;;  %v13667_v47 = vld [vmem:[#allocation8 + $0x1868] ss:$40 sps:$4 sm:$0xff]  }
 0x3f8   :  { %9197 = vmatpush1.bf16.msra.mxu0 %v13601_v50  ;;  %v13670_v50 = vld [vmem:[#allocation8 + $0x740] ss:$40 sps:$4 sm:$0xff]  }
 0x3f9   :  { %9256 = vmatpush1.bf16.msra.mxu1 %v13604_v48  ;;  %9198 = vmatprep.subr.bf16.mxu0 %v13609_v51  ;;  %v13675_v48 = vld [vmem:[#allocation8 + $0x18bc] ss:$40 sps:$4 sm:$0xff]  }
 0x3fa   :  { %9257 = vmatprep.subr.bf16.mxu1 %v13612_v52  ;;  %v13678_v51 = vld [vmem:[#allocation8 + $0x794] ss:$40 sps:$4 sm:$0xff]   ;;  %v13673_v52 = vld [vmem:[#allocation8 + $0x18b8] ss:$40 sps:$4 sm:$0xff]  }
 0x3fc   :  { %9199 = vmatpush1.bf16.msra.mxu0 %v13607_v53  ;;  %v13676_v53 = vld [vmem:[#allocation8 + $0x790] ss:$40 sps:$4 sm:$0xff]  }
 0x3fd   :  { %9258 = vmatpush1.bf16.msra.mxu1 %v13610_v55  ;;  %9200 = vmatprep.subr.bf16.mxu0 %v13615_v59  ;;  %v13684_v55 = vld [vmem:[#allocation8 + $0x1c] ss:$40 sps:$4 sm:$0xff]  }
 0x3fe   :  { %9259 = vmatprep.subr.bf16.mxu1 %v13618_v49  ;;  %v13681_v59 = vld [vmem:[#allocation8 + $0x7e4] ss:$40 sps:$4 sm:$0xff]   ;;  %v13682_v49 = vld [vmem:[#allocation8 + $0x18] ss:$40 sps:$4 sm:$0xff]  }
 0x400   :  { %9201 = vmatpush1.bf16.msra.mxu0 %v13613_v61  ;;  %v13679_v61 = vld [vmem:[#allocation8 + $0x7e0] ss:$40 sps:$4 sm:$0xff]  }
 0x401   :  { %9260 = vmatpush1.bf16.msra.mxu1 %v13616_v62  ;;  %9202 = vmatprep.subr.bf16.mxu0 %v13621_v63  ;;  %v13690_v62 = vld [vmem:[#allocation8 + $0x6c] ss:$40 sps:$4 sm:$0xff]  }
 0x402   :  { %9261 = vmatprep.subr.bf16.mxu1 %v13624_v0  ;;  %v13687_v63 = vld [vmem:[#allocation8 + $0x834] ss:$40 sps:$4 sm:$0xff]   ;;  %v13688_v0 = vld [vmem:[#allocation8 + $0x68] ss:$40 sps:$4 sm:$0xff]  }
 0x404   :  { %9203 = vmatpush1.bf16.msra.mxu0 %v13619_v1  ;;  %v13685_v1 = vld [vmem:[#allocation8 + $0x830] ss:$40 sps:$4 sm:$0xff]  }
 0x405   :  { %9262 = vmatpush1.bf16.msra.mxu1 %v13622_v2  ;;  %9204 = vmatprep.subr.bf16.mxu0 %v13627_v3  ;;  %v13696_v2 = vld [vmem:[#allocation8 + $0xbc] ss:$40 sps:$4 sm:$0xff]  }
 0x406   :  { %9272 = vmatprep.subr.bf16.mxu1 %v13630_v4  ;;  %v13693_v3 = vld [vmem:[#allocation8 + $0x884] ss:$40 sps:$4 sm:$0xff]   ;;  %v13694_v4 = vld [vmem:[#allocation8 + $0xb8] ss:$40 sps:$4 sm:$0xff]  }
 0x408   :  { %9264 = vmatmul.mubr.bf16.vlgmr.msra.gmra.mrb[12].mxu1 %v14812_v23  ;;  %9205 = vmatpush1.bf16.msra.mxu0 %v13625_v7  ;;  %v13691_v7 = vld [vmem:[#allocation8 + $0x880] ss:$40 sps:$4 sm:$0xff]  }
 0x409   :  { %9273 = vmatpush1.bf16.msra.mxu1 %v13628_v9  ;;  %9304 = vmatprep.mubr.bf16.mxu1 %v14814_v41  ;;  %v13702_v9 = vld [vmem:[#allocation8 + $0x10c] ss:$40 sps:$4 sm:$0xff]  }
 0x40a   :  { %9206 = vmatprep.subr.bf16.mxu0 %v13633_v10  ;;  %9274 = vmatprep.subr.bf16.mxu1 %v13636_v14  ;;  %v13699_v10 = vld [vmem:[#allocation8 + $0x8d4] ss:$40 sps:$4 sm:$0xff]   ;;  %v13700_v14 = vld [vmem:[#allocation8 + $0x108] ss:$40 sps:$4 sm:$0xff]  }
 0x40c   :  { %9207 = vmatpush1.bf16.msra.mxu0 %v13631_v5  ;;  %v13697_v5 = vld [vmem:[#allocation8 + $0x8d0] ss:$40 sps:$4 sm:$0xff]  }
 0x40d   :  { %9275 = vmatpush1.bf16.msra.mxu1 %v13634_v15  ;;  %9208 = vmatprep.subr.bf16.mxu0 %v13639_v16  ;;  %v13708_v15 = vld [vmem:[#allocation8 + $0x15c] ss:$40 sps:$4 sm:$0xff]  }
 0x40e   :  { %9276 = vmatprep.subr.bf16.mxu1 %v13642_v13  ;;  %v13705_v16 = vld [vmem:[#allocation8 + $0x924] ss:$40 sps:$4 sm:$0xff]   ;;  %v13706_v13 = vld [vmem:[#allocation8 + $0x158] ss:$40 sps:$4 sm:$0xff]  }
 0x410   :  { %9209 = vmatpush1.bf16.msra.mxu0 %v13637_v32  ;;  %v13703_v32 = vld [vmem:[#allocation8 + $0x920] ss:$40 sps:$4 sm:$0xff]  }
 0x411   :  { %9277 = vmatpush1.bf16.msra.mxu1 %v13640_v18  ;;  %9210 = vmatprep.subr.bf16.mxu0 %v13645_v24  ;;  %v13714_v18 = vld [vmem:[#allocation8 + $0x1ac] ss:$40 sps:$4 sm:$0xff]  }
 0x412   :  { %9278 = vmatprep.subr.bf16.mxu1 %v13648_v19  ;;  %v13711_v24 = vld [vmem:[#allocation8 + $0x974] ss:$40 sps:$4 sm:$0xff]   ;;  %v13712_v19 = vld [vmem:[#allocation8 + $0x1a8] ss:$40 sps:$4 sm:$0xff]  }
 0x414   :  { %9211 = vmatpush1.bf16.msra.mxu0 %v13643_v26  ;;  %v13709_v26 = vld [vmem:[#allocation8 + $0x970] ss:$40 sps:$4 sm:$0xff]  }
 0x415   :  { %9279 = vmatpush1.bf16.msra.mxu1 %v13646_v28  ;;  %9212 = vmatprep.subr.bf16.mxu0 %v13651_v30  ;;  %v13720_v28 = vld [vmem:[#allocation8 + $0x1fc] ss:$40 sps:$4 sm:$0xff]  }
 0x416   :  { %9280 = vmatprep.subr.bf16.mxu1 %v13654_v20  ;;  %v13717_v30 = vld [vmem:[#allocation8 + $0x9c4] ss:$40 sps:$4 sm:$0xff]   ;;  %v13718_v20 = vld [vmem:[#allocation8 + $0x1f8] ss:$40 sps:$4 sm:$0xff]  }
 0x418   :  { %9213 = vmatpush1.bf16.msra.mxu0 %v13649_v27  ;;  %v13715_v27 = vld [vmem:[#allocation8 + $0x9c0] ss:$40 sps:$4 sm:$0xff]  }
 0x419   :  { %9281 = vmatpush1.bf16.msra.mxu1 %v13652_v12  ;;  %9214 = vmatprep.subr.bf16.mxu0 %v13657_v31  ;;  %v13726_v12 = vld [vmem:[#allocation8 + $0x24c] ss:$40 sps:$4 sm:$0xff]  }
 0x41a   :  { %9282 = vmatprep.subr.bf16.mxu1 %v13660_v35  ;;  %v13723_v31 = vld [vmem:[#allocation8 + $0xa14] ss:$40 sps:$4 sm:$0xff]   ;;  %v13724_v35 = vld [vmem:[#allocation8 + $0x248] ss:$40 sps:$4 sm:$0xff]  }
 0x41c   :  { %9215 = vmatpush1.bf16.msra.mxu0 %v13655_v36  ;;  %v13721_v36 = vld [vmem:[#allocation8 + $0xa10] ss:$40 sps:$4 sm:$0xff]  }
 0x41d   :  { %9283 = vmatpush1.bf16.msra.mxu1 %v13658_v37  ;;  %9216 = vmatprep.subr.bf16.mxu0 %v13663_v17  ;;  %v13729_v37 = vld [vmem:[#allocation8 + $0xa64] ss:$40 sps:$4 sm:$0xff]  }
 0x41e   :  { %9284 = vmatprep.subr.bf16.mxu1 %v13666_v38  ;;  %v13732_v17 = vld [vmem:[#allocation8 + $0x29c] ss:$40 sps:$4 sm:$0xff]   ;;  %v13730_v38 = vld [vmem:[#allocation8 + $0x298] ss:$40 sps:$4 sm:$0xff]  }
 0x420   :  { %9217 = vmatpush1.bf16.msra.mxu0 %v13661_v39  ;;  %v13727_v39 = vld [vmem:[#allocation8 + $0xa60] ss:$40 sps:$4 sm:$0xff]  }
 0x421   :  { %9285 = vmatpush1.bf16.msra.mxu1 %v13664_v42  ;;  %9218 = vmatprep.subr.bf16.mxu0 %v13669_v44  ;;  %v13738_v42 = vld [vmem:[#allocation8 + $0x2ec] ss:$40 sps:$4 sm:$0xff]  }
 0x422   :  { %9286 = vmatprep.subr.bf16.mxu1 %v13672_v45  ;;  %v13735_v44 = vld [vmem:[#allocation8 + $0xab4] ss:$40 sps:$4 sm:$0xff]   ;;  %v13736_v45 = vld [vmem:[#allocation8 + $0x2e8] ss:$40 sps:$4 sm:$0xff]  }
 0x424   :  { %9219 = vmatpush1.bf16.msra.mxu0 %v13667_v47  ;;  %v13733_v47 = vld [vmem:[#allocation8 + $0xab0] ss:$40 sps:$4 sm:$0xff]  }
 0x425   :  { %9287 = vmatpush1.bf16.msra.mxu1 %v13670_v50  ;;  %9220 = vmatprep.subr.bf16.mxu0 %v13675_v48  ;;  %v13744_v50 = vld [vmem:[#allocation8 + $0x33c] ss:$40 sps:$4 sm:$0xff]  }
 0x426   :  { %9288 = vmatprep.subr.bf16.mxu1 %v13678_v51  ;;  %v13741_v48 = vld [vmem:[#allocation8 + $0xb04] ss:$40 sps:$4 sm:$0xff]   ;;  %v13742_v51 = vld [vmem:[#allocation8 + $0x338] ss:$40 sps:$4 sm:$0xff]  }
 0x428   :  { %9221 = vmatpush1.bf16.msra.mxu0 %v13673_v52  ;;  %v13739_v52 = vld [vmem:[#allocation8 + $0xb00] ss:$40 sps:$4 sm:$0xff]  }
 0x429   :  { %9289 = vmatpush1.bf16.msra.mxu1 %v13676_v53  ;;  %9436 = vmatprep.subr.bf16.mxu0 %v13684_v55  ;;  %v13750_v53 = vld [vmem:[#allocation8 + $0x38c] ss:$40 sps:$4 sm:$0xff]  }
 0x42a   :  { %9290 = vmatprep.subr.bf16.mxu1 %v13681_v59  ;;  %v13747_v55 = vld [vmem:[#allocation8 + $0xb54] ss:$40 sps:$4 sm:$0xff]   ;;  %v13748_v59 = vld [vmem:[#allocation8 + $0x388] ss:$40 sps:$4 sm:$0xff]  }
 0x42b   :  { %9223 = vmatmul.mubr.bf16.vlgmr.msra.gmra.mrb[16].mxu0 %v14874_v46 }
 0x42c   :  { %9437 = vmatpush1.bf16.msra.mxu0 %v13682_v49  ;;  %9468 = vmatprep.mubr.bf16.mxu0 %v14798_v40  ;;  %v13745_v49 = vld [vmem:[#allocation8 + $0xb50] ss:$40 sps:$4 sm:$0xff]  }
 0x42d   :  { %9291 = vmatpush1.bf16.msra.mxu1 %v13679_v61  ;;  %9438 = vmatprep.subr.bf16.mxu0 %v13690_v62  ;;  %v13756_v61 = vld [vmem:[#allocation8 + $0x3dc] ss:$40 sps:$4 sm:$0xff]  }
 0x42e   :  { %9292 = vmatprep.subr.bf16.mxu1 %v13687_v63  ;;  %v13753_v62 = vld [vmem:[#allocation8 + $0xba4] ss:$40 sps:$4 sm:$0xff]   ;;  %v13754_v63 = vld [vmem:[#allocation8 + $0x3d8] ss:$40 sps:$4 sm:$0xff]  }
 0x430   :  { %9439 = vmatpush1.bf16.msra.mxu0 %v13688_v0  ;;  %v13751_v0 = vld [vmem:[#allocation8 + $0xba0] ss:$40 sps:$4 sm:$0xff]  }
 0x431   :  { %9293 = vmatpush1.bf16.msra.mxu1 %v13685_v1  ;;  %9440 = vmatprep.subr.bf16.mxu0 %v13696_v2  ;;  %v13762_v1 = vld [vmem:[#allocation8 + $0x42c] ss:$40 sps:$4 sm:$0xff]  }
 0x432   :  { %9294 = vmatprep.subr.bf16.mxu1 %v13693_v3  ;;  %v13759_v2 = vld [vmem:[#allocation8 + $0xbf4] ss:$40 sps:$4 sm:$0xff]   ;;  %v13760_v3 = vld [vmem:[#allocation8 + $0x428] ss:$40 sps:$4 sm:$0xff]  }
 0x434   :  { %9441 = vmatpush1.bf16.msra.mxu0 %v13694_v4  ;;  %v13757_v4 = vld [vmem:[#allocation8 + $0xbf0] ss:$40 sps:$4 sm:$0xff]  }
 0x435   :  { %9295 = vmatpush1.bf16.msra.mxu1 %v13691_v7  ;;  %9442 = vmatprep.subr.bf16.mxu0 %v13702_v9  ;;  %v13768_v7 = vld [vmem:[#allocation8 + $0x47c] ss:$40 sps:$4 sm:$0xff]  }
 0x436   :  { %9296 = vmatprep.subr.bf16.mxu1 %v13699_v10  ;;  %v13765_v9 = vld [vmem:[#allocation8 + $0xc44] ss:$40 sps:$4 sm:$0xff]   ;;  %v13766_v10 = vld [vmem:[#allocation8 + $0x478] ss:$40 sps:$4 sm:$0xff]  }
 0x438   :  { %9443 = vmatpush1.bf16.msra.mxu0 %v13700_v14  ;;  %v13763_v14 = vld [vmem:[#allocation8 + $0xc40] ss:$40 sps:$4 sm:$0xff]  }
 0x439   :  { %9297 = vmatpush1.bf16.msra.mxu1 %v13697_v5  ;;  %9444 = vmatprep.subr.bf16.mxu0 %v13708_v15  ;;  %v13774_v5 = vld [vmem:[#allocation8 + $0x4cc] ss:$40 sps:$4 sm:$0xff]  }
 0x43a   :  { %9298 = vmatprep.subr.bf16.mxu1 %v13705_v16  ;;  %v13771_v15 = vld [vmem:[#allocation8 + $0xc94] ss:$40 sps:$4 sm:$0xff]   ;;  %v13772_v16 = vld [vmem:[#allocation8 + $0x4c8] ss:$40 sps:$4 sm:$0xff]  }
 0x43c   :  { %9445 = vmatpush1.bf16.msra.mxu0 %v13706_v13  ;;  %v13769_v13 = vld [vmem:[#allocation8 + $0xc90] ss:$40 sps:$4 sm:$0xff]  }
 0x43d   :  { %9299 = vmatpush1.bf16.msra.mxu1 %v13703_v32  ;;  %9446 = vmatprep.subr.bf16.mxu0 %v13714_v18  ;;  %v13780_v32 = vld [vmem:[#allocation8 + $0x51c] ss:$40 sps:$4 sm:$0xff]  }
 0x43e   :  { %9300 = vmatprep.subr.bf16.mxu1 %v13711_v24  ;;  %v13777_v18 = vld [vmem:[#allocation8 + $0xce4] ss:$40 sps:$4 sm:$0xff]   ;;  %v13778_v24 = vld [vmem:[#allocation8 + $0x518] ss:$40 sps:$4 sm:$0xff]  }
 0x440   :  { %9447 = vmatpush1.bf16.msra.mxu0 %v13712_v19  ;;  %v13775_v19 = vld [vmem:[#allocation8 + $0xce0] ss:$40 sps:$4 sm:$0xff]  }
 0x441   :  { %9301 = vmatpush1.bf16.msra.mxu1 %v13709_v26  ;;  %9448 = vmatprep.subr.bf16.mxu0 %v13720_v28  ;;  %v13786_v26 = vld [vmem:[#allocation8 + $0x56c] ss:$40 sps:$4 sm:$0xff]  }
 0x442   :  { %9302 = vmatprep.subr.bf16.mxu1 %v13717_v30  ;;  %v13783_v28 = vld [vmem:[#allocation8 + $0xd34] ss:$40 sps:$4 sm:$0xff]   ;;  %v13784_v30 = vld [vmem:[#allocation8 + $0x568] ss:$40 sps:$4 sm:$0xff]  }
 0x444   :  { %9449 = vmatpush1.bf16.msra.mxu0 %v13718_v20  ;;  %v13781_v20 = vld [vmem:[#allocation8 + $0xd30] ss:$40 sps:$4 sm:$0xff]  }
 0x445   :  { %9303 = vmatpush1.bf16.msra.mxu1 %v13715_v27  ;;  %9450 = vmatprep.subr.bf16.mxu0 %v13726_v12  ;;  %v13792_v27 = vld [vmem:[#allocation8 + $0x5bc] ss:$40 sps:$4 sm:$0xff]  }
 0x446   :  { %9313 = vmatprep.subr.bf16.mxu1 %v13723_v31  ;;  %v13789_v12 = vld [vmem:[#allocation8 + $0xd84] ss:$40 sps:$4 sm:$0xff]   ;;  %v13790_v31 = vld [vmem:[#allocation8 + $0x5b8] ss:$40 sps:$4 sm:$0xff]  }
 0x448   :  { %9305 = vmatmul.mubr.bf16.vlgmr.msra.gmra.mrb[12].mxu1 %v14821_v56  ;;  %9451 = vmatpush1.bf16.msra.mxu0 %v13724_v35  ;;  %v13787_v35 = vld [vmem:[#allocation8 + $0xd80] ss:$40 sps:$4 sm:$0xff]  }
 0x449   :  { %9314 = vmatpush1.bf16.msra.mxu1 %v13721_v36  ;;  %9345 = vmatprep.mubr.bf16.mxu1 %v14847_v54  ;;  %v13798_v36 = vld [vmem:[#allocation8 + $0x60c] ss:$40 sps:$4 sm:$0xff]  }
 0x44a   :  { %9315 = vmatprep.subr.bf16.mxu1 %v13729_v37  ;;  %9452 = vmatprep.subr.bf16.mxu0 %v13732_v17  ;;  %v13795_v37 = vld [vmem:[#allocation8 + $0xdd4] ss:$40 sps:$4 sm:$0xff]   ;;  %v13796_v17 = vld [vmem:[#allocation8 + $0x608] ss:$40 sps:$4 sm:$0xff]  }
 0x44c   :  { %9453 = vmatpush1.bf16.msra.mxu0 %v13730_v38  ;;  %v13793_v38 = vld [vmem:[#allocation8 + $0xdd0] ss:$40 sps:$4 sm:$0xff]  }
 0x44d   :  { %9316 = vmatpush1.bf16.msra.mxu1 %v13727_v39  ;;  %9454 = vmatprep.subr.bf16.mxu0 %v13738_v42  ;;  %v13804_v39 = vld [vmem:[#allocation8 + $0x65c] ss:$40 sps:$4 sm:$0xff]  }
 0x44e   :  { %9317 = vmatprep.subr.bf16.mxu1 %v13735_v44  ;;  %v13801_v42 = vld [vmem:[#allocation8 + $0xe24] ss:$40 sps:$4 sm:$0xff]   ;;  %v13802_v44 = vld [vmem:[#allocation8 + $0x658] ss:$40 sps:$4 sm:$0xff]  }
 0x450   :  { %9455 = vmatpush1.bf16.msra.mxu0 %v13736_v45  ;;  %v13799_v45 = vld [vmem:[#allocation8 + $0xe20] ss:$40 sps:$4 sm:$0xff]  }
 0x451   :  { %9318 = vmatpush1.bf16.msra.mxu1 %v13733_v47  ;;  %9456 = vmatprep.subr.bf16.mxu0 %v13744_v50  ;;  %v13810_v47 = vld [vmem:[#allocation8 + $0x6ac] ss:$40 sps:$4 sm:$0xff]  }
 0x452   :  { %9319 = vmatprep.subr.bf16.mxu1 %v13741_v48  ;;  %v13807_v50 = vld [vmem:[#allocation8 + $0xe74] ss:$40 sps:$4 sm:$0xff]   ;;  %v13808_v48 = vld [vmem:[#allocation8 + $0x6a8] ss:$40 sps:$4 sm:$0xff]  }
 0x454   :  { %9457 = vmatpush1.bf16.msra.mxu0 %v13742_v51  ;;  %v13805_v51 = vld [vmem:[#allocation8 + $0xe70] ss:$40 sps:$4 sm:$0xff]  }
 0x455   :  { %9320 = vmatpush1.bf16.msra.mxu1 %v13739_v52  ;;  %9458 = vmatprep.subr.bf16.mxu0 %v13750_v53  ;;  %v13816_v52 = vld [vmem:[#allocation8 + $0x6fc] ss:$40 sps:$4 sm:$0xff]  }
 0x456   :  { %9321 = vmatprep.subr.bf16.mxu1 %v13747_v55  ;;  %v13813_v53 = vld [vmem:[#allocation8 + $0xec4] ss:$40 sps:$4 sm:$0xff]   ;;  %v13814_v55 = vld [vmem:[#allocation8 + $0x6f8] ss:$40 sps:$4 sm:$0xff]  }
 0x458   :  { %9459 = vmatpush1.bf16.msra.mxu0 %v13748_v59  ;;  %v13811_v59 = vld [vmem:[#allocation8 + $0xec0] ss:$40 sps:$4 sm:$0xff]  }
 0x459   :  { %9322 = vmatpush1.bf16.msra.mxu1 %v13745_v49  ;;  %9460 = vmatprep.subr.bf16.mxu0 %v13756_v61  ;;  %v13822_v49 = vld [vmem:[#allocation8 + $0x74c] ss:$40 sps:$4 sm:$0xff]  }
 0x45a   :  { %9323 = vmatprep.subr.bf16.mxu1 %v13753_v62  ;;  %v13819_v61 = vld [vmem:[#allocation8 + $0xf14] ss:$40 sps:$4 sm:$0xff]   ;;  %v13820_v62 = vld [vmem:[#allocation8 + $0x748] ss:$40 sps:$4 sm:$0xff]  }
 0x45c   :  { %9461 = vmatpush1.bf16.msra.mxu0 %v13754_v63  ;;  %v13817_v63 = vld [vmem:[#allocation8 + $0xf10] ss:$40 sps:$4 sm:$0xff]  }
 0x45d   :  { %9324 = vmatpush1.bf16.msra.mxu1 %v13751_v0  ;;  %9462 = vmatprep.subr.bf16.mxu0 %v13762_v1  ;;  %v13825_v0 = vld [vmem:[#allocation8 + $0xf64] ss:$40 sps:$4 sm:$0xff]  }
 0x45e   :  { %9325 = vmatprep.subr.bf16.mxu1 %v13759_v2  ;;  %v13828_v1 = vld [vmem:[#allocation8 + $0x79c] ss:$40 sps:$4 sm:$0xff]   ;;  %v13826_v2 = vld [vmem:[#allocation8 + $0x798] ss:$40 sps:$4 sm:$0xff]  }
 0x460   :  { %9463 = vmatpush1.bf16.msra.mxu0 %v13760_v3  ;;  %v13823_v3 = vld [vmem:[#allocation8 + $0xf60] ss:$40 sps:$4 sm:$0xff]  }
 0x461   :  { %9326 = vmatpush1.bf16.msra.mxu1 %v13757_v4  ;;  %9464 = vmatprep.subr.bf16.mxu0 %v13768_v7  ;;  %v13834_v4 = vld [vmem:[#allocation8 + $0x7ec] ss:$40 sps:$4 sm:$0xff]  }
 0x462   :  { %9327 = vmatprep.subr.bf16.mxu1 %v13765_v9  ;;  %v13831_v7 = vld [vmem:[#allocation8 + $0xfb4] ss:$40 sps:$4 sm:$0xff]   ;;  %v13832_v9 = vld [vmem:[#allocation8 + $0x7e8] ss:$40 sps:$4 sm:$0xff]  }
 0x464   :  { %9465 = vmatpush1.bf16.msra.mxu0 %v13766_v10  ;;  %v13829_v10 = vld [vmem:[#allocation8 + $0xfb0] ss:$40 sps:$4 sm:$0xff]  }
 0x465   :  { %9328 = vmatpush1.bf16.msra.mxu1 %v13763_v14  ;;  %9466 = vmatprep.subr.bf16.mxu0 %v13774_v5  ;;  %v13840_v14 = vld [vmem:[#allocation8 + $0x83c] ss:$40 sps:$4 sm:$0xff]  }
 0x466   :  { %9329 = vmatprep.subr.bf16.mxu1 %v13771_v15  ;;  %v13837_v5 = vld [vmem:[#allocation8 + $0x1004] ss:$40 sps:$4 sm:$0xff]   ;;  %v13838_v15 = vld [vmem:[#allocation8 + $0x838] ss:$40 sps:$4 sm:$0xff]  }
 0x468   :  { %9467 = vmatpush1.bf16.msra.mxu0 %v13772_v16  ;;  %v13835_v16 = vld [vmem:[#allocation8 + $0x1000] ss:$40 sps:$4 sm:$0xff]  }
 0x469   :  { %9330 = vmatpush1.bf16.msra.mxu1 %v13769_v13  ;;  %9477 = vmatprep.subr.bf16.mxu0 %v13780_v32  ;;  %v13846_v13 = vld [vmem:[#allocation8 + $0x88c] ss:$40 sps:$4 sm:$0xff]  }
 0x46a   :  { %9331 = vmatprep.subr.bf16.mxu1 %v13777_v18  ;;  %v13843_v32 = vld [vmem:[#allocation8 + $0x1054] ss:$40 sps:$4 sm:$0xff]   ;;  %v13844_v18 = vld [vmem:[#allocation8 + $0x888] ss:$40 sps:$4 sm:$0xff]  }
 0x46b   :  { %9469 = vmatmul.mubr.bf16.vlgmr.msra.gmra.mrb[20].mxu0 %v14812_v23 }
 0x46c   :  { %9478 = vmatpush1.bf16.msra.mxu0 %v13778_v24  ;;  %9509 = vmatprep.mubr.bf16.mxu0 %v14814_v41  ;;  %v13841_v24 = vld [vmem:[#allocation8 + $0x1050] ss:$40 sps:$4 sm:$0xff]  }
 0x46d   :  { %9332 = vmatpush1.bf16.msra.mxu1 %v13775_v19  ;;  %9479 = vmatprep.subr.bf16.mxu0 %v13786_v26  ;;  %v13852_v19 = vld [vmem:[#allocation8 + $0x8dc] ss:$40 sps:$4 sm:$0xff]  }
 0x46e   :  { %9333 = vmatprep.subr.bf16.mxu1 %v13783_v28  ;;  %v13849_v26 = vld [vmem:[#allocation8 + $0x10a4] ss:$40 sps:$4 sm:$0xff]   ;;  %v13850_v28 = vld [vmem:[#allocation8 + $0x8d8] ss:$40 sps:$4 sm:$0xff]  }
 0x470   :  { %9480 = vmatpush1.bf16.msra.mxu0 %v13784_v30  ;;  %v13847_v30 = vld [vmem:[#allocation8 + $0x10a0] ss:$40 sps:$4 sm:$0xff]  }
 0x471   :  { %9334 = vmatpush1.bf16.msra.mxu1 %v13781_v20  ;;  %9481 = vmatprep.subr.bf16.mxu0 %v13792_v27  ;;  %v13858_v20 = vld [vmem:[#allocation8 + $0x92c] ss:$40 sps:$4 sm:$0xff]  }
 0x472   :  { %9335 = vmatprep.subr.bf16.mxu1 %v13789_v12  ;;  %v13855_v12 = vld [vmem:[#allocation8 + $0x10f4] ss:$40 sps:$4 sm:$0xff]  }
 0x474   :  { %9482 = vmatpush1.bf16.msra.mxu0 %v13790_v31 }
 0x475   :  { %9336 = vmatpush1.bf16.msra.mxu1 %v13787_v35  ;;  %9483 = vmatprep.subr.bf16.mxu0 %v13798_v36  ;;  %v13856_v36 = vld [vmem:[#allocation8 + $0x928] ss:$40 sps:$4 sm:$0xff]  }
 0x476   :  { %9337 = vmatprep.subr.bf16.mxu1 %v13795_v37 }
 0x478   :  { %9484 = vmatpush1.bf16.msra.mxu0 %v13796_v17  ;;  %v13853_v17 = vld [vmem:[#allocation8 + $0x10f0] ss:$40 sps:$4 sm:$0xff]  }
 0x479   :  { %9338 = vmatpush1.bf16.msra.mxu1 %v13793_v38  ;;  %9485 = vmatprep.subr.bf16.mxu0 %v13804_v39  ;;  %v13864_v38 = vld [vmem:[#allocation8 + $0x97c] ss:$40 sps:$4 sm:$0xff]  }
 0x47a   :  { %9339 = vmatprep.subr.bf16.mxu1 %v13801_v42  ;;  %v13861_v39 = vld [vmem:[#allocation8 + $0x1144] ss:$40 sps:$4 sm:$0xff]   ;;  %v13862_v42 = vld [vmem:[#allocation8 + $0x978] ss:$40 sps:$4 sm:$0xff]  }
 0x47c   :  { %9486 = vmatpush1.bf16.msra.mxu0 %v13802_v44  ;;  %v13859_v44 = vld [vmem:[#allocation8 + $0x1140] ss:$40 sps:$4 sm:$0xff]  }
 0x47d   :  { %9340 = vmatpush1.bf16.msra.mxu1 %v13799_v45  ;;  %9487 = vmatprep.subr.bf16.mxu0 %v13810_v47  ;;  %v13870_v45 = vld [vmem:[#allocation8 + $0x9cc] ss:$40 sps:$4 sm:$0xff]  }
 0x47e   :  { %9341 = vmatprep.subr.bf16.mxu1 %v13807_v50  ;;  %v13867_v47 = vld [vmem:[#allocation8 + $0x1194] ss:$40 sps:$4 sm:$0xff]   ;;  %v13868_v50 = vld [vmem:[#allocation8 + $0x9c8] ss:$40 sps:$4 sm:$0xff]  }
 0x480   :  { %9488 = vmatpush1.bf16.msra.mxu0 %v13808_v48  ;;  %v13865_v48 = vld [vmem:[#allocation8 + $0x1190] ss:$40 sps:$4 sm:$0xff]  }
 0x481   :  { %9342 = vmatpush1.bf16.msra.mxu1 %v13805_v51  ;;  %9489 = vmatprep.subr.bf16.mxu0 %v13816_v52  ;;  %v13876_v51 = vld [vmem:[#allocation8 + $0xa1c] ss:$40 sps:$4 sm:$0xff]  }
 0x482   :  { %9343 = vmatprep.subr.bf16.mxu1 %v13813_v53  ;;  %v13873_v52 = vld [vmem:[#allocation8 + $0x11e4] ss:$40 sps:$4 sm:$0xff]   ;;  %v13874_v53 = vld [vmem:[#allocation8 + $0xa18] ss:$40 sps:$4 sm:$0xff]  }
 0x484   :  { %9490 = vmatpush1.bf16.msra.mxu0 %v13814_v55  ;;  %v13871_v55 = vld [vmem:[#allocation8 + $0x11e0] ss:$40 sps:$4 sm:$0xff]  }
 0x485   :  { %9344 = vmatpush1.bf16.msra.mxu1 %v13811_v59  ;;  %9491 = vmatprep.subr.bf16.mxu0 %v13822_v49  ;;  %v13882_v59 = vld [vmem:[#allocation8 + $0xa6c] ss:$40 sps:$4 sm:$0xff]  }
 0x486   :  { %9354 = vmatprep.subr.bf16.mxu1 %v13819_v61  ;;  %v13879_v49 = vld [vmem:[#allocation8 + $0x1234] ss:$40 sps:$4 sm:$0xff]   ;;  %v13880_v61 = vld [vmem:[#allocation8 + $0xa68] ss:$40 sps:$4 sm:$0xff]  }
 0x488   :  { %9346 = vmatmul.mubr.bf16.vlgmr.msra.gmra.mrb[12].mxu1 %v14849_v58  ;;  %9492 = vmatpush1.bf16.msra.mxu0 %v13820_v62  ;;  %v13877_v62 = vld [vmem:[#allocation8 + $0x1230] ss:$40 sps:$4 sm:$0xff]  }
 0x489   :  { %9355 = vmatpush1.bf16.msra.mxu1 %v13817_v63  ;;  %9386 = vmatprep.mubr.bf16.mxu1 %v14852_v60  ;;  %v13888_v63 = vld [vmem:[#allocation8 + $0xabc] ss:$40 sps:$4 sm:$0xff]  }
 0x48a   :  { %9356 = vmatprep.subr.bf16.mxu1 %v13825_v0  ;;  %9493 = vmatprep.subr.bf16.mxu0 %v13828_v1  ;;  %v13885_v0 = vld [vmem:[#allocation8 + $0x1284] ss:$40 sps:$4 sm:$0xff]   ;;  %v13886_v1 = vld [vmem:[#allocation8 + $0xab8] ss:$40 sps:$4 sm:$0xff]  }
 0x48c   :  { %9494 = vmatpush1.bf16.msra.mxu0 %v13826_v2  ;;  %v13883_v2 = vld [vmem:[#allocation8 + $0x1280] ss:$40 sps:$4 sm:$0xff]  }
 0x48d   :  { %9357 = vmatpush1.bf16.msra.mxu1 %v13823_v3  ;;  %9495 = vmatprep.subr.bf16.mxu0 %v13834_v4  ;;  %v13894_v3 = vld [vmem:[#allocation8 + $0xb0c] ss:$40 sps:$4 sm:$0xff]  }
 0x48e   :  { %9358 = vmatprep.subr.bf16.mxu1 %v13831_v7  ;;  %v13891_v4 = vld [vmem:[#allocation8 + $0x12d4] ss:$40 sps:$4 sm:$0xff]   ;;  %v13892_v7 = vld [vmem:[#allocation8 + $0xb08] ss:$40 sps:$4 sm:$0xff]  }
 0x490   :  { %9496 = vmatpush1.bf16.msra.mxu0 %v13832_v9  ;;  %v13889_v9 = vld [vmem:[#allocation8 + $0x12d0] ss:$40 sps:$4 sm:$0xff]  }
 0x491   :  { %9359 = vmatpush1.bf16.msra.mxu1 %v13829_v10  ;;  %9497 = vmatprep.subr.bf16.mxu0 %v13840_v14  ;;  %v13900_v10 = vld [vmem:[#allocation8 + $0xb5c] ss:$40 sps:$4 sm:$0xff]  }
 0x492   :  { %9360 = vmatprep.subr.bf16.mxu1 %v13837_v5  ;;  %v13897_v14 = vld [vmem:[#allocation8 + $0x1324] ss:$40 sps:$4 sm:$0xff]   ;;  %v13898_v5 = vld [vmem:[#allocation8 + $0xb58] ss:$40 sps:$4 sm:$0xff]  }
 0x494   :  { %9498 = vmatpush1.bf16.msra.mxu0 %v13838_v15  ;;  %v13895_v15 = vld [vmem:[#allocation8 + $0x1320] ss:$40 sps:$4 sm:$0xff]  }
 0x495   :  { %9361 = vmatpush1.bf16.msra.mxu1 %v13835_v16  ;;  %9499 = vmatprep.subr.bf16.mxu0 %v13846_v13  ;;  %v13906_v16 = vld [vmem:[#allocation8 + $0xbac] ss:$40 sps:$4 sm:$0xff]  }
 0x496   :  { %9362 = vmatprep.subr.bf16.mxu1 %v13843_v32  ;;  %v13903_v13 = vld [vmem:[#allocation8 + $0x1374] ss:$40 sps:$4 sm:$0xff]   ;;  %v13904_v32 = vld [vmem:[#allocation8 + $0xba8] ss:$40 sps:$4 sm:$0xff]  }
 0x498   :  { %9500 = vmatpush1.bf16.msra.mxu0 %v13844_v18  ;;  %v13901_v18 = vld [vmem:[#allocation8 + $0x1370] ss:$40 sps:$4 sm:$0xff]  }
 0x499   :  { %9363 = vmatpush1.bf16.msra.mxu1 %v13841_v24  ;;  %9501 = vmatprep.subr.bf16.mxu0 %v13852_v19  ;;  %v13912_v24 = vld [vmem:[#allocation8 + $0xbfc] ss:$40 sps:$4 sm:$0xff]  }
 0x49a   :  { %v14891_v27 = vpop.f32.mrb[8].mxu1  ;;  %9364 = vmatprep.subr.bf16.mxu1 %v13849_v26  ;;  %v13909_v19 = vld [vmem:[#allocation8 + $0x13c4] ss:$40 sps:$4 sm:$0xff]   ;;  %v13910_v26 = vld [vmem:[#allocation8 + $0xbf8] ss:$40 sps:$4 sm:$0xff]  }
 0x49b   :  { %v14893_v31 = vpop.f32.mrb[9].mxu1 }
 0x49c   :  { %9502 = vmatpush1.bf16.msra.mxu0 %v13850_v28  ;;  %v9023_v35 = vpop.f32.mrb[10].mxu1  ;;  %v13907_v28 = vld [vmem:[#allocation8 + $0x13c0] ss:$40 sps:$4 sm:$0xff]  }
 0x49d   :  { %9365 = vmatpush1.bf16.msra.mxu1 %v13847_v30  ;;  %v9024_v37 = vpop.f32.mrb[11].mxu1  ;;  %9503 = vmatprep.subr.bf16.mxu0 %v13858_v20  ;;  %v13918_v30 = vld [vmem:[#allocation8 + $0xc4c] ss:$40 sps:$4 sm:$0xff]   ;;  %v13913_v35 = vld [vmem:[#allocation8 + $0x1410] ss:$40 sps:$4 sm:$0xff]  }
 0x49e   :  { %9366 = vmatprep.subr.bf16.mxu1 %v13855_v12  ;;  %v13915_v20 = vld [vmem:[#allocation8 + $0x1414] ss:$40 sps:$4 sm:$0xff]   ;;  %v13916_v12 = vld [vmem:[#allocation8 + $0xc48] ss:$40 sps:$4 sm:$0xff]  }
 0x49f   :  { %v13924_v37 = vld [vmem:[#allocation8 + $0xc9c] ss:$40 sps:$4 sm:$0xff]  }
 0x4a0   :  { %9504 = vmatpush1.bf16.msra.mxu0 %v13856_v36  ;;  %v13921_v36 = vld [vmem:[#allocation8 + $0x1464] ss:$40 sps:$4 sm:$0xff]  }
 0x4a1   :  { %9367 = vmatpush1.bf16.msra.mxu1 %v13853_v17  ;;  %9505 = vmatprep.subr.bf16.mxu0 %v13864_v38  ;;  %v13922_v17 = vld [vmem:[#allocation8 + $0xc98] ss:$40 sps:$4 sm:$0xff]  }
 0x4a2   :  { %9368 = vmatprep.subr.bf16.mxu1 %v13861_v39  ;;  %v13919_v38 = vld [vmem:[#allocation8 + $0x1460] ss:$40 sps:$4 sm:$0xff]   ;;  %v13930_v39 = vld [vmem:[#allocation8 + $0xcec] ss:$40 sps:$4 sm:$0xff]  }
 0x4a4   :  { %9506 = vmatpush1.bf16.msra.mxu0 %v13862_v42  ;;  %v13927_v42 = vld [vmem:[#allocation8 + $0x14b4] ss:$40 sps:$4 sm:$0xff]  }
 0x4a5   :  { %9369 = vmatpush1.bf16.msra.mxu1 %v13859_v44  ;;  %9507 = vmatprep.subr.bf16.mxu0 %v13870_v45  ;;  %v13928_v44 = vld [vmem:[#allocation8 + $0xce8] ss:$40 sps:$4 sm:$0xff]  }
 0x4a6   :  { %9370 = vmatprep.subr.bf16.mxu1 %v13867_v47  ;;  %v13925_v45 = vld [vmem:[#allocation8 + $0x14b0] ss:$40 sps:$4 sm:$0xff]   ;;  %v13936_v47 = vld [vmem:[#allocation8 + $0xd3c] ss:$40 sps:$4 sm:$0xff]  }
 0x4a8   :  { %9508 = vmatpush1.bf16.msra.mxu0 %v13868_v50  ;;  %v13933_v50 = vld [vmem:[#allocation8 + $0x1504] ss:$40 sps:$4 sm:$0xff]  }
 0x4a9   :  { %9371 = vmatpush1.bf16.msra.mxu1 %v13865_v48  ;;  %9518 = vmatprep.subr.bf16.mxu0 %v13876_v51  ;;  %v13934_v48 = vld [vmem:[#allocation8 + $0xd38] ss:$40 sps:$4 sm:$0xff]  }
 0x4aa   :  { %9372 = vmatprep.subr.bf16.mxu1 %v13873_v52  ;;  %v13931_v51 = vld [vmem:[#allocation8 + $0x1500] ss:$40 sps:$4 sm:$0xff]   ;;  %v13942_v52 = vld [vmem:[#allocation8 + $0xd8c] ss:$40 sps:$4 sm:$0xff]  }
 0x4ab   :  { %9510 = vmatmul.mubr.bf16.vlgmr.msra.gmra.mrb[20].mxu0 %v14821_v56 }
 0x4ac   :  { %9519 = vmatpush1.bf16.msra.mxu0 %v13874_v53  ;;  %9550 = vmatprep.mubr.bf16.mxu0 %v14847_v54  ;;  %v13939_v53 = vld [vmem:[#allocation8 + $0x1554] ss:$40 sps:$4 sm:$0xff]  }
 0x4ad   :  { %9373 = vmatpush1.bf16.msra.mxu1 %v13871_v55  ;;  %9520 = vmatprep.subr.bf16.mxu0 %v13882_v59  ;;  %v13940_v55 = vld [vmem:[#allocation8 + $0xd88] ss:$40 sps:$4 sm:$0xff]  }
 0x4ae   :  { %9374 = vmatprep.subr.bf16.mxu1 %v13879_v49  ;;  %v13937_v59 = vld [vmem:[#allocation8 + $0x1550] ss:$40 sps:$4 sm:$0xff]   ;;  %v13948_v49 = vld [vmem:[#allocation8 + $0xddc] ss:$40 sps:$4 sm:$0xff]  }
 0x4b0   :  { %9521 = vmatpush1.bf16.msra.mxu0 %v13880_v61  ;;  %v13945_v61 = vld [vmem:[#allocation8 + $0x15a4] ss:$40 sps:$4 sm:$0xff]  }
 0x4b1   :  { %9375 = vmatpush1.bf16.msra.mxu1 %v13877_v62  ;;  %9522 = vmatprep.subr.bf16.mxu0 %v13888_v63  ;;  %v13946_v62 = vld [vmem:[#allocation8 + $0xdd8] ss:$40 sps:$4 sm:$0xff]  }
 0x4b2   :  { %9376 = vmatprep.subr.bf16.mxu1 %v13885_v0  ;;  %v13943_v63 = vld [vmem:[#allocation8 + $0x15a0] ss:$40 sps:$4 sm:$0xff]   ;;  %v13954_v0 = vld [vmem:[#allocation8 + $0xe2c] ss:$40 sps:$4 sm:$0xff]  }
 0x4b4   :  { %9523 = vmatpush1.bf16.msra.mxu0 %v13886_v1  ;;  %v13951_v1 = vld [vmem:[#allocation8 + $0x15f4] ss:$40 sps:$4 sm:$0xff]  }
 0x4b5   :  { %9377 = vmatpush1.bf16.msra.mxu1 %v13883_v2  ;;  %9524 = vmatprep.subr.bf16.mxu0 %v13894_v3  ;;  %v13952_v2 = vld [vmem:[#allocation8 + $0xe28] ss:$40 sps:$4 sm:$0xff]  }
 0x4b6   :  { %9378 = vmatprep.subr.bf16.mxu1 %v13891_v4  ;;  %v13949_v3 = vld [vmem:[#allocation8 + $0x15f0] ss:$40 sps:$4 sm:$0xff]   ;;  %v13960_v4 = vld [vmem:[#allocation8 + $0xe7c] ss:$40 sps:$4 sm:$0xff]  }
 0x4b8   :  { %9525 = vmatpush1.bf16.msra.mxu0 %v13892_v7  ;;  %v13957_v7 = vld [vmem:[#allocation8 + $0x1644] ss:$40 sps:$4 sm:$0xff]  }
 0x4b9   :  { %9379 = vmatpush1.bf16.msra.mxu1 %v13889_v9  ;;  %9526 = vmatprep.subr.bf16.mxu0 %v13900_v10  ;;  %v13958_v9 = vld [vmem:[#allocation8 + $0xe78] ss:$40 sps:$4 sm:$0xff]  }
 0x4ba   :  { %9380 = vmatprep.subr.bf16.mxu1 %v13897_v14  ;;  %v13955_v10 = vld [vmem:[#allocation8 + $0x1640] ss:$40 sps:$4 sm:$0xff]   ;;  %v13966_v14 = vld [vmem:[#allocation8 + $0xecc] ss:$40 sps:$4 sm:$0xff]  }
 0x4bc   :  { %9527 = vmatpush1.bf16.msra.mxu0 %v13898_v5  ;;  %v13963_v5 = vld [vmem:[#allocation8 + $0x1694] ss:$40 sps:$4 sm:$0xff]  }
 0x4bd   :  { %9381 = vmatpush1.bf16.msra.mxu1 %v13895_v15  ;;  %9528 = vmatprep.subr.bf16.mxu0 %v13906_v16  ;;  %v13964_v15 = vld [vmem:[#allocation8 + $0xec8] ss:$40 sps:$4 sm:$0xff]  }
 0x4be   :  { %9382 = vmatprep.subr.bf16.mxu1 %v13903_v13  ;;  %v13961_v16 = vld [vmem:[#allocation8 + $0x1690] ss:$40 sps:$4 sm:$0xff]   ;;  %v13972_v13 = vld [vmem:[#allocation8 + $0xf1c] ss:$40 sps:$4 sm:$0xff]  }
 0x4c0   :  { %9529 = vmatpush1.bf16.msra.mxu0 %v13904_v32  ;;  %v13969_v32 = vld [vmem:[#allocation8 + $0x16e4] ss:$40 sps:$4 sm:$0xff]  }
 0x4c1   :  { %9383 = vmatpush1.bf16.msra.mxu1 %v13901_v18  ;;  %9530 = vmatprep.subr.bf16.mxu0 %v13912_v24  ;;  %v13970_v18 = vld [vmem:[#allocation8 + $0xf18] ss:$40 sps:$4 sm:$0xff]  }
 0x4c2   :  { %9384 = vmatprep.subr.bf16.mxu1 %v13909_v19  ;;  %v13967_v24 = vld [vmem:[#allocation8 + $0x16e0] ss:$40 sps:$4 sm:$0xff]   ;;  %v13978_v19 = vld [vmem:[#allocation8 + $0xf6c] ss:$40 sps:$4 sm:$0xff]  }
 0x4c4   :  { %9531 = vmatpush1.bf16.msra.mxu0 %v13910_v26  ;;  %v13975_v26 = vld [vmem:[#allocation8 + $0x1734] ss:$40 sps:$4 sm:$0xff]  }
 0x4c5   :  { %9385 = vmatpush1.bf16.msra.mxu1 %v13907_v28  ;;  %9532 = vmatprep.subr.bf16.mxu0 %v13918_v30  ;;  %v13976_v28 = vld [vmem:[#allocation8 + $0xf68] ss:$40 sps:$4 sm:$0xff]  }
 0x4c6   :  { %9395 = vmatprep.subr.bf16.mxu1 %v13915_v20  ;;  %v13973_v30 = vld [vmem:[#allocation8 + $0x1730] ss:$40 sps:$4 sm:$0xff]   ;;  %v13984_v20 = vld [vmem:[#allocation8 + $0xfbc] ss:$40 sps:$4 sm:$0xff]  }
 0x4c8   :  { %9387 = vmatmul.mubr.bf16.vlgmr.msra.gmra.mrb[12].mxu1 %v14863_v25  ;;  %9533 = vmatpush1.bf16.msra.mxu0 %v13916_v12  ;;  %v13981_v12 = vld [vmem:[#allocation8 + $0x1784] ss:$40 sps:$4 sm:$0xff]  }
 0x4c9   :  { %9396 = vmatpush1.bf16.msra.mxu1 %v13913_v35  ;;  %9427 = vmatprep.mubr.bf16.mxu1 %v14872_v43  ;;  %v13982_v35 = vld [vmem:[#allocation8 + $0xfb8] ss:$40 sps:$4 sm:$0xff]  }
 0x4ca   :  { %9397 = vmatprep.subr.bf16.mxu1 %v13921_v36  ;;  %9534 = vmatprep.subr.bf16.mxu0 %v13924_v37  ;;  %v13979_v36 = vld [vmem:[#allocation8 + $0x1780] ss:$40 sps:$4 sm:$0xff]   ;;  %v13990_v37 = vld [vmem:[#allocation8 + $0x100c] ss:$40 sps:$4 sm:$0xff]  }
 0x4cc   :  { %9535 = vmatpush1.bf16.msra.mxu0 %v13922_v17  ;;  %v13987_v17 = vld [vmem:[#allocation8 + $0x17d4] ss:$40 sps:$4 sm:$0xff]  }
 0x4cd   :  { %9398 = vmatpush1.bf16.msra.mxu1 %v13919_v38  ;;  %9536 = vmatprep.subr.bf16.mxu0 %v13930_v39  ;;  %v13988_v38 = vld [vmem:[#allocation8 + $0x1008] ss:$40 sps:$4 sm:$0xff]  }
 0x4ce   :  { %9399 = vmatprep.subr.bf16.mxu1 %v13927_v42  ;;  %v13985_v39 = vld [vmem:[#allocation8 + $0x17d0] ss:$40 sps:$4 sm:$0xff]   ;;  %v13996_v42 = vld [vmem:[#allocation8 + $0x105c] ss:$40 sps:$4 sm:$0xff]  }
 0x4d0   :  { %9537 = vmatpush1.bf16.msra.mxu0 %v13928_v44  ;;  %v13993_v44 = vld [vmem:[#allocation8 + $0x1824] ss:$40 sps:$4 sm:$0xff]  }
 0x4d1   :  { %9400 = vmatpush1.bf16.msra.mxu1 %v13925_v45  ;;  %9538 = vmatprep.subr.bf16.mxu0 %v13936_v47  ;;  %v13994_v45 = vld [vmem:[#allocation8 + $0x1058] ss:$40 sps:$4 sm:$0xff]  }
 0x4d2   :  { %9401 = vmatprep.subr.bf16.mxu1 %v13933_v50  ;;  %v13991_v47 = vld [vmem:[#allocation8 + $0x1820] ss:$40 sps:$4 sm:$0xff]   ;;  %v14002_v50 = vld [vmem:[#allocation8 + $0x10ac] ss:$40 sps:$4 sm:$0xff]  }
 0x4d4   :  { %9539 = vmatpush1.bf16.msra.mxu0 %v13934_v48  ;;  %v13999_v48 = vld [vmem:[#allocation8 + $0x1874] ss:$40 sps:$4 sm:$0xff]  }
 0x4d5   :  { %9402 = vmatpush1.bf16.msra.mxu1 %v13931_v51  ;;  %9540 = vmatprep.subr.bf16.mxu0 %v13942_v52  ;;  %v14000_v51 = vld [vmem:[#allocation8 + $0x10a8] ss:$40 sps:$4 sm:$0xff]  }
 0x4d6   :  { %9403 = vmatprep.subr.bf16.mxu1 %v13939_v53  ;;  %v13997_v52 = vld [vmem:[#allocation8 + $0x1870] ss:$40 sps:$4 sm:$0xff]   ;;  %v14008_v53 = vld [vmem:[#allocation8 + $0x10fc] ss:$40 sps:$4 sm:$0xff]  }
 0x4d8   :  { %9541 = vmatpush1.bf16.msra.mxu0 %v13940_v55 }
 0x4d9   :  { %9404 = vmatpush1.bf16.msra.mxu1 %v13937_v59  ;;  %9542 = vmatprep.subr.bf16.mxu0 %v13948_v49  ;;  %v14005_v59 = vld [vmem:[#allocation8 + $0x18c4] ss:$40 sps:$4 sm:$0xff]  }
 0x4da   :  { %9405 = vmatprep.subr.bf16.mxu1 %v13945_v61 }
 0x4dc   :  { %9543 = vmatpush1.bf16.msra.mxu0 %v13946_v62  ;;  %v14006_v62 = vld [vmem:[#allocation8 + $0x10f8] ss:$40 sps:$4 sm:$0xff]  }
 0x4dd   :  { %9406 = vmatpush1.bf16.msra.mxu1 %v13943_v63  ;;  %9544 = vmatprep.subr.bf16.mxu0 %v13954_v0  ;;  %v14003_v0 = vld [vmem:[#allocation8 + $0x18c0] ss:$40 sps:$4 sm:$0xff]  }
 0x4de   :  { %9407 = vmatprep.subr.bf16.mxu1 %v13951_v1  ;;  %v14011_v1 = vld [vmem:[#allocation8 + $0x114c] ss:$40 sps:$4 sm:$0xff]  }
 0x4e0   :  { %9545 = vmatpush1.bf16.msra.mxu0 %v13952_v2  ;;  %v14014_v2 = vld [vmem:[#allocation8 + $0x24] ss:$40 sps:$4 sm:$0xff]  }
 0x4e1   :  { %9408 = vmatpush1.bf16.msra.mxu1 %v13949_v3  ;;  %9546 = vmatprep.subr.bf16.mxu0 %v13960_v4  ;;  %v14009_v3 = vld [vmem:[#allocation8 + $0x1148] ss:$40 sps:$4 sm:$0xff]  }
 0x4e2   :  { %9409 = vmatprep.subr.bf16.mxu1 %v13957_v7  ;;  %v14012_v4 = vld [vmem:[#allocation8 + $0x20] ss:$40 sps:$4 sm:$0xff]   ;;  %v14017_v7 = vld [vmem:[#allocation8 + $0x119c] ss:$40 sps:$4 sm:$0xff]  }
 0x4e4   :  { %9547 = vmatpush1.bf16.msra.mxu0 %v13958_v9  ;;  %v14020_v9 = vld [vmem:[#allocation8 + $0x74] ss:$40 sps:$4 sm:$0xff]  }
 0x4e5   :  { %9410 = vmatpush1.bf16.msra.mxu1 %v13955_v10  ;;  %9548 = vmatprep.subr.bf16.mxu0 %v13966_v14  ;;  %v14015_v10 = vld [vmem:[#allocation8 + $0x1198] ss:$40 sps:$4 sm:$0xff]  }
 0x4e6   :  { %9411 = vmatprep.subr.bf16.mxu1 %v13963_v5  ;;  %v14018_v14 = vld [vmem:[#allocation8 + $0x70] ss:$40 sps:$4 sm:$0xff]   ;;  %v14023_v5 = vld [vmem:[#allocation8 + $0x11ec] ss:$40 sps:$4 sm:$0xff]  }
 0x4e8   :  { %9549 = vmatpush1.bf16.msra.mxu0 %v13964_v15  ;;  %v14026_v15 = vld [vmem:[#allocation8 + $0xc4] ss:$40 sps:$4 sm:$0xff]  }
 0x4e9   :  { %9412 = vmatpush1.bf16.msra.mxu1 %v13961_v16  ;;  %9559 = vmatprep.subr.bf16.mxu0 %v13972_v13  ;;  %v14021_v16 = vld [vmem:[#allocation8 + $0x11e8] ss:$40 sps:$4 sm:$0xff]  }
 0x4ea   :  { %9413 = vmatprep.subr.bf16.mxu1 %v13969_v32  ;;  %v14024_v13 = vld [vmem:[#allocation8 + $0xc0] ss:$40 sps:$4 sm:$0xff]   ;;  %v14029_v32 = vld [vmem:[#allocation8 + $0x123c] ss:$40 sps:$4 sm:$0xff]  }
 0x4eb   :  { %9551 = vmatmul.mubr.bf16.vlgmr.msra.gmra.mrb[20].mxu0 %v14849_v58 }
 0x4ec   :  { %9560 = vmatpush1.bf16.msra.mxu0 %v13970_v18  ;;  %9591 = vmatprep.mubr.bf16.mxu0 %v14852_v60  ;;  %v14032_v18 = vld [vmem:[#allocation8 + $0x114] ss:$40 sps:$4 sm:$0xff]  }
 0x4ed   :  { %9414 = vmatpush1.bf16.msra.mxu1 %v13967_v24  ;;  %9561 = vmatprep.subr.bf16.mxu0 %v13978_v19  ;;  %v14027_v24 = vld [vmem:[#allocation8 + $0x1238] ss:$40 sps:$4 sm:$0xff]  }
 0x4ee   :  { %9415 = vmatprep.subr.bf16.mxu1 %v13975_v26  ;;  %v14030_v19 = vld [vmem:[#allocation8 + $0x110] ss:$40 sps:$4 sm:$0xff]   ;;  %v14035_v26 = vld [vmem:[#allocation8 + $0x128c] ss:$40 sps:$4 sm:$0xff]  }
 0x4f0   :  { %9562 = vmatpush1.bf16.msra.mxu0 %v13976_v28  ;;  %v14033_v28 = vld [vmem:[#allocation8 + $0x1288] ss:$40 sps:$4 sm:$0xff]  }
 0x4f1   :  { %9416 = vmatpush1.bf16.msra.mxu1 %v13973_v30  ;;  %9563 = vmatprep.subr.bf16.mxu0 %v13984_v20  ;;  %v14036_v30 = vld [vmem:[#allocation8 + $0x160] ss:$40 sps:$4 sm:$0xff]   ;;  %v14041_v20 = vld [vmem:[#allocation8 + $0x12dc] ss:$40 sps:$4 sm:$0xff]  }
 0x4f2   :  { %9417 = vmatprep.subr.bf16.mxu1 %v13981_v12  ;;  %v14044_v12 = vld [vmem:[#allocation8 + $0x1b4] ss:$40 sps:$4 sm:$0xff]  }
 0x4f4   :  { %9564 = vmatpush1.bf16.msra.mxu0 %v13982_v35  ;;  %v14039_v35 = vld [vmem:[#allocation8 + $0x12d8] ss:$40 sps:$4 sm:$0xff]  }
 0x4f5   :  { %9418 = vmatpush1.bf16.msra.mxu1 %v13979_v36  ;;  %9565 = vmatprep.subr.bf16.mxu0 %v13990_v37  ;;  %v14042_v36 = vld [vmem:[#allocation8 + $0x1b0] ss:$40 sps:$4 sm:$0xff]   ;;  %v14047_v37 = vld [vmem:[#allocation8 + $0x132c] ss:$40 sps:$4 sm:$0xff]  }
 0x4f6   :  { %9419 = vmatprep.subr.bf16.mxu1 %v13987_v17  ;;  %v14050_v17 = vld [vmem:[#allocation8 + $0x204] ss:$40 sps:$4 sm:$0xff]  }
 0x4f8   :  { %9566 = vmatpush1.bf16.msra.mxu0 %v13988_v38  ;;  %v14045_v38 = vld [vmem:[#allocation8 + $0x1328] ss:$40 sps:$4 sm:$0xff]  }
 0x4f9   :  { %9420 = vmatpush1.bf16.msra.mxu1 %v13985_v39  ;;  %9567 = vmatprep.subr.bf16.mxu0 %v13996_v42  ;;  %v14048_v39 = vld [vmem:[#allocation8 + $0x200] ss:$40 sps:$4 sm:$0xff]   ;;  %v14053_v42 = vld [vmem:[#allocation8 + $0x137c] ss:$40 sps:$4 sm:$0xff]  }
 0x4fa   :  { %9421 = vmatprep.subr.bf16.mxu1 %v13993_v44  ;;  %v14056_v44 = vld [vmem:[#allocation8 + $0x254] ss:$40 sps:$4 sm:$0xff]  }
 0x4fc   :  { %9568 = vmatpush1.bf16.msra.mxu0 %v13994_v45  ;;  %v14051_v45 = vld [vmem:[#allocation8 + $0x1378] ss:$40 sps:$4 sm:$0xff]  }
 0x4fd   :  { %9422 = vmatpush1.bf16.msra.mxu1 %v13991_v47  ;;  %9569 = vmatprep.subr.bf16.mxu0 %v14002_v50  ;;  %v14054_v47 = vld [vmem:[#allocation8 + $0x250] ss:$40 sps:$4 sm:$0xff]   ;;  %v14059_v50 = vld [vmem:[#allocation8 + $0x13cc] ss:$40 sps:$4 sm:$0xff]  }
 0x4fe   :  { %v14901_v55 = vpop.f32.mrb[16].mxu0  ;;  %9423 = vmatprep.subr.bf16.mxu1 %v13999_v48  ;;  %v14062_v48 = vld [vmem:[#allocation8 + $0x2a4] ss:$40 sps:$4 sm:$0xff]  }
 0x4ff   :  { %v14903_v49 = vpop.f32.mrb[17].mxu0 }
 0x500   :  { %v9228_v61 = vpop.f32.mrb[18].mxu0  ;;  %9570 = vmatpush1.bf16.msra.mxu0 %v14000_v51  ;;  %v14057_v51 = vld [vmem:[#allocation8 + $0x13c8] ss:$40 sps:$4 sm:$0xff]  }
 0x501   :  { %9424 = vmatpush1.bf16.msra.mxu1 %v13997_v52  ;;  %v9229_v63 = vpop.f32.mrb[19].mxu0  ;;  %9571 = vmatprep.subr.bf16.mxu0 %v14008_v53  ;;  %v14060_v52 = vld [vmem:[#allocation8 + $0x2a0] ss:$40 sps:$4 sm:$0xff]   ;;  %v14065_v53 = vld [vmem:[#allocation8 + $0x141c] ss:$40 sps:$4 sm:$0xff]  }
 0x502   :  { %9425 = vmatprep.subr.bf16.mxu1 %v14005_v59  ;;  %v14068_v59 = vld [vmem:[#allocation8 + $0x2f4] ss:$40 sps:$4 sm:$0xff]   ;;  %v14063_v61 = vld [vmem:[#allocation8 + $0x1418] ss:$40 sps:$4 sm:$0xff]  }
 0x503   :  { %v14071_v63 = vld [vmem:[#allocation8 + $0x146c] ss:$40 sps:$4 sm:$0xff]  }
 0x504   :  { %9572 = vmatpush1.bf16.msra.mxu0 %v14006_v62  ;;  %v14066_v62 = vld [vmem:[#allocation8 + $0x2f0] ss:$40 sps:$4 sm:$0xff]  }
 0x505   :  { %9426 = vmatpush1.bf16.msra.mxu1 %v14003_v0  ;;  %9573 = vmatprep.subr.bf16.mxu0 %v14011_v1  ;;  %v14074_v0 = vld [vmem:[#allocation8 + $0x344] ss:$40 sps:$4 sm:$0xff]   ;;  %v14069_v1 = vld [vmem:[#allocation8 + $0x1468] ss:$40 sps:$4 sm:$0xff]  }
 0x506   :  { %9641 = vmatprep.subr.bf16.mxu1 %v14014_v2  ;;  %v14072_v2 = vld [vmem:[#allocation8 + $0x340] ss:$40 sps:$4 sm:$0xff]  }
 0x508   :  { %9428 = vmatmul.mubr.bf16.vlgmr.msra.gmra.mrb[12].mxu1 %v14874_v46  ;;  %9574 = vmatpush1.bf16.msra.mxu0 %v14009_v3  ;;  %v14077_v3 = vld [vmem:[#allocation8 + $0x14bc] ss:$40 sps:$4 sm:$0xff]  }
 0x509   :  { %9642 = vmatpush1.bf16.msra.mxu1 %v14012_v4  ;;  %9673 = vmatprep.mubr.bf16.mxu1 %v14798_v40  ;;  %v14038_v40 = vld [vmem:[#allocation8 + $0x164] ss:$40 sps:$4 sm:$0xff]   ;;  %v14080_v4 = vld [vmem:[#allocation8 + $0x394] ss:$40 sps:$4 sm:$0xff]  }
 0x50a   :  { %9575 = vmatprep.subr.bf16.mxu0 %v14017_v7  ;;  %9643 = vmatprep.subr.bf16.mxu1 %v14020_v9  ;;  %v14075_v7 = vld [vmem:[#allocation8 + $0x14b8] ss:$40 sps:$4 sm:$0xff]  }
 0x50b   :  { %v14078_v9 = vld [vmem:[#allocation8 + $0x390] ss:$40 sps:$4 sm:$0xff]  }
 0x50c   :  { %9576 = vmatpush1.bf16.msra.mxu0 %v14015_v10  ;;  %v14083_v10 = vld [vmem:[#allocation8 + $0x150c] ss:$40 sps:$4 sm:$0xff]  }
 0x50d   :  { %9644 = vmatpush1.bf16.msra.mxu1 %v14018_v14  ;;  %9577 = vmatprep.subr.bf16.mxu0 %v14023_v5  ;;  %v14086_v14 = vld [vmem:[#allocation8 + $0x3e4] ss:$40 sps:$4 sm:$0xff]   ;;  %v14081_v5 = vld [vmem:[#allocation8 + $0x1508] ss:$40 sps:$4 sm:$0xff]  }
 0x50e   :  { %9645 = vmatprep.subr.bf16.mxu1 %v14026_v15  ;;  %v14084_v15 = vld [vmem:[#allocation8 + $0x3e0] ss:$40 sps:$4 sm:$0xff]  }
 0x510   :  { %9578 = vmatpush1.bf16.msra.mxu0 %v14021_v16  ;;  %v14089_v16 = vld [vmem:[#allocation8 + $0x155c] ss:$40 sps:$4 sm:$0xff]  }
 0x511   :  { %9646 = vmatpush1.bf16.msra.mxu1 %v14024_v13  ;;  %9579 = vmatprep.subr.bf16.mxu0 %v14029_v32  ;;  %v14092_v13 = vld [vmem:[#allocation8 + $0x434] ss:$40 sps:$4 sm:$0xff]   ;;  %v14087_v32 = vld [vmem:[#allocation8 + $0x1558] ss:$40 sps:$4 sm:$0xff]  }
 0x512   :  { %9647 = vmatprep.subr.bf16.mxu1 %v14032_v18  ;;  %v14090_v18 = vld [vmem:[#allocation8 + $0x430] ss:$40 sps:$4 sm:$0xff]  }
 0x514   :  { %9580 = vmatpush1.bf16.msra.mxu0 %v14027_v24  ;;  %v14095_v24 = vld [vmem:[#allocation8 + $0x15ac] ss:$40 sps:$4 sm:$0xff]  }
 0x515   :  { %9648 = vmatpush1.bf16.msra.mxu1 %v14030_v19  ;;  %9581 = vmatprep.subr.bf16.mxu0 %v14035_v26  ;;  %v14098_v19 = vld [vmem:[#allocation8 + $0x484] ss:$40 sps:$4 sm:$0xff]   ;;  %v14093_v26 = vld [vmem:[#allocation8 + $0x15a8] ss:$40 sps:$4 sm:$0xff]  }
 0x516   :  { %9649 = vmatprep.subr.bf16.mxu1 %v14038_v40  ;;  %v14096_v40 = vld [vmem:[#allocation8 + $0x480] ss:$40 sps:$4 sm:$0xff]  }
 0x518   :  { %9582 = vmatpush1.bf16.msra.mxu0 %v14033_v28  ;;  %v14101_v28 = vld [vmem:[#allocation8 + $0x15fc] ss:$40 sps:$4 sm:$0xff]  }
 0x519   :  { %9650 = vmatpush1.bf16.msra.mxu1 %v14036_v30  ;;  %9583 = vmatprep.subr.bf16.mxu0 %v14041_v20  ;;  %v14104_v30 = vld [vmem:[#allocation8 + $0x4d4] ss:$40 sps:$4 sm:$0xff]   ;;  %v14099_v20 = vld [vmem:[#allocation8 + $0x15f8] ss:$40 sps:$4 sm:$0xff]  }
 0x51a   :  { %9651 = vmatprep.subr.bf16.mxu1 %v14044_v12  ;;  %v14102_v12 = vld [vmem:[#allocation8 + $0x4d0] ss:$40 sps:$4 sm:$0xff]  }
 0x51c   :  { %9584 = vmatpush1.bf16.msra.mxu0 %v14039_v35  ;;  %v14107_v35 = vld [vmem:[#allocation8 + $0x164c] ss:$40 sps:$4 sm:$0xff]  }
 0x51d   :  { %9652 = vmatpush1.bf16.msra.mxu1 %v14042_v36  ;;  %9585 = vmatprep.subr.bf16.mxu0 %v14047_v37  ;;  %v14110_v36 = vld [vmem:[#allocation8 + $0x524] ss:$40 sps:$4 sm:$0xff]   ;;  %v14105_v37 = vld [vmem:[#allocation8 + $0x1648] ss:$40 sps:$4 sm:$0xff]  }
 0x51e   :  { %9653 = vmatprep.subr.bf16.mxu1 %v14050_v17  ;;  %v14108_v17 = vld [vmem:[#allocation8 + $0x520] ss:$40 sps:$4 sm:$0xff]  }
 0x520   :  { %9586 = vmatpush1.bf16.msra.mxu0 %v14045_v38  ;;  %v14113_v38 = vld [vmem:[#allocation8 + $0x169c] ss:$40 sps:$4 sm:$0xff]  }
 0x521   :  { %9654 = vmatpush1.bf16.msra.mxu1 %v14048_v39  ;;  %9587 = vmatprep.subr.bf16.mxu0 %v14053_v42  ;;  %v14116_v39 = vld [vmem:[#allocation8 + $0x574] ss:$40 sps:$4 sm:$0xff]   ;;  %v14111_v42 = vld [vmem:[#allocation8 + $0x1698] ss:$40 sps:$4 sm:$0xff]  }
 0x522   :  { %9655 = vmatprep.subr.bf16.mxu1 %v14056_v44  ;;  %v14114_v44 = vld [vmem:[#allocation8 + $0x570] ss:$40 sps:$4 sm:$0xff]  }
 0x524   :  { %9588 = vmatpush1.bf16.msra.mxu0 %v14051_v45  ;;  %v14119_v45 = vld [vmem:[#allocation8 + $0x16ec] ss:$40 sps:$4 sm:$0xff]  }
 0x525   :  { %9656 = vmatpush1.bf16.msra.mxu1 %v14054_v47  ;;  %9589 = vmatprep.subr.bf16.mxu0 %v14059_v50  ;;  %v14122_v47 = vld [vmem:[#allocation8 + $0x5c4] ss:$40 sps:$4 sm:$0xff]   ;;  %v14117_v50 = vld [vmem:[#allocation8 + $0x16e8] ss:$40 sps:$4 sm:$0xff]  }
 0x526   :  { %9657 = vmatprep.subr.bf16.mxu1 %v14062_v48  ;;  %v14120_v48 = vld [vmem:[#allocation8 + $0x5c0] ss:$40 sps:$4 sm:$0xff]  }
 0x528   :  { %9590 = vmatpush1.bf16.msra.mxu0 %v14057_v51  ;;  %v14125_v51 = vld [vmem:[#allocation8 + $0x173c] ss:$40 sps:$4 sm:$0xff]  }
 0x529   :  { %9658 = vmatpush1.bf16.msra.mxu1 %v14060_v52  ;;  %9600 = vmatprep.subr.bf16.mxu0 %v14065_v53  ;;  %v14128_v52 = vld [vmem:[#allocation8 + $0x614] ss:$40 sps:$4 sm:$0xff]   ;;  %v14126_v53 = vld [vmem:[#allocation8 + $0x610] ss:$40 sps:$4 sm:$0xff]  }
 0x52a   :  { %9659 = vmatprep.subr.bf16.mxu1 %v14068_v59  ;;  %v14131_v59 = vld [vmem:[#allocation8 + $0x178c] ss:$40 sps:$4 sm:$0xff]  }
 0x52b   :  { %9592 = vmatmul.mubr.bf16.vlgmr.msra.gmra.mrb[20].mxu0 %v14863_v25 }
 0x52c   :  { %9601 = vmatpush1.bf16.msra.mxu0 %v14063_v61  ;;  %9632 = vmatprep.mubr.bf16.mxu0 %v14872_v43  ;;  %v14129_v61 = vld [vmem:[#allocation8 + $0x1788] ss:$40 sps:$4 sm:$0xff]  }
 0x52d   :  { %9660 = vmatpush1.bf16.msra.mxu1 %v14066_v62  ;;  %9602 = vmatprep.subr.bf16.mxu0 %v14071_v63  ;;  %v14132_v62 = vld [vmem:[#allocation8 + $0x660] ss:$40 sps:$4 sm:$0xff]   ;;  %v14137_v63 = vld [vmem:[#allocation8 + $0x17dc] ss:$40 sps:$4 sm:$0xff]  }
 0x52e   :  { %9661 = vmatprep.subr.bf16.mxu1 %v14074_v0  ;;  %v14140_v0 = vld [vmem:[#allocation8 + $0x6b4] ss:$40 sps:$4 sm:$0xff]  }
 0x530   :  { %9603 = vmatpush1.bf16.msra.mxu0 %v14069_v1  ;;  %v14135_v1 = vld [vmem:[#allocation8 + $0x17d8] ss:$40 sps:$4 sm:$0xff]  }
 0x531   :  { %9662 = vmatpush1.bf16.msra.mxu1 %v14072_v2  ;;  %9604 = vmatprep.subr.bf16.mxu0 %v14077_v3  ;;  %v14138_v2 = vld [vmem:[#allocation8 + $0x6b0] ss:$40 sps:$4 sm:$0xff]   ;;  %v14143_v3 = vld [vmem:[#allocation8 + $0x182c] ss:$40 sps:$4 sm:$0xff]  }
 0x532   :  { %9663 = vmatprep.subr.bf16.mxu1 %v14080_v4  ;;  %v14146_v4 = vld [vmem:[#allocation8 + $0x704] ss:$40 sps:$4 sm:$0xff]  }
 0x534   :  { %9605 = vmatpush1.bf16.msra.mxu0 %v14075_v7  ;;  %v14911_v7 = vld [vmem:[#allocation10] sm:$0xff] }
 0x535   :  { %9664 = vmatpush1.bf16.msra.mxu1 %v14078_v9  ;;  %9606 = vmatprep.subr.bf16.mxu0 %v14083_v10  ;;  %v14141_v9 = vld [vmem:[#allocation8 + $0x1828] ss:$40 sps:$4 sm:$0xff]  }
 0x536   :  { %9665 = vmatprep.subr.bf16.mxu1 %v14086_v14  ;;  %v14144_v10 = vld [vmem:[#allocation8 + $0x700] ss:$40 sps:$4 sm:$0xff]   ;;  %v14149_v14 = vld [vmem:[#allocation8 + $0x187c] ss:$40 sps:$4 sm:$0xff]  }
 0x538   :  { %9607 = vmatpush1.bf16.msra.mxu0 %v14081_v5  ;;  %v4778_v5 = vrot.slane %v14911_v7, %v14779_v11 }
 0x539   :  { %9666 = vmatpush1.bf16.msra.mxu1 %v14084_v15  ;;  %9608 = vmatprep.subr.bf16.mxu0 %v14089_v16  ;;  %v14152_v15 = vld [vmem:[#allocation8 + $0x754] ss:$40 sps:$4 sm:$0xff]   ;;  %v14147_v16 = vld [vmem:[#allocation8 + $0x1878] ss:$40 sps:$4 sm:$0xff]  }
 0x53a   :  { %9667 = vmatprep.subr.bf16.mxu1 %v14092_v13  ;;  %v14150_v13 = vld [vmem:[#allocation8 + $0x750] ss:$40 sps:$4 sm:$0xff]  }
 0x53c   :  { %9609 = vmatpush1.bf16.msra.mxu0 %v14087_v32  ;;  %v14155_v32 = vld [vmem:[#allocation8 + $0x18cc] ss:$40 sps:$4 sm:$0xff]  }
 0x53d   :  { %9668 = vmatpush1.bf16.msra.mxu1 %v14090_v18  ;;  %9610 = vmatprep.subr.bf16.mxu0 %v14095_v24  ;;  %v12231_v18 = vadd.f32 %v14893_v31, %v4778_v5  ;;  %v14158_v24 = vld [vmem:[#allocation8 + $0x7a4] ss:$40 sps:$4 sm:$0xff]  }
 0x53e   :  { %9669 = vmatprep.subr.bf16.mxu1 %v14098_v19  ;;  %v14153_v19 = vld [vmem:[#allocation8 + $0x18c8] ss:$40 sps:$4 sm:$0xff]   ;;  %v14166_v31 = vld [vmem:[#allocation8 + $0x844] ss:$40 sps:$4 sm:$0xff]  }
 0x53f   :  { %v14196_v5 = vld [vmem:[#allocation8 + $0xa24] ss:$40 sps:$4 sm:$0xff]  }
 0x540   :  { %9611 = vmatpush1.bf16.msra.mxu0 %v14093_v26  ;;  %v14156_v26 = vld [vmem:[#allocation8 + $0x7a0] ss:$40 sps:$4 sm:$0xff]  }
 0x541   :  { %9670 = vmatpush1.bf16.msra.mxu1 %v14096_v40  ;;  %9612 = vmatprep.subr.bf16.mxu0 %v14101_v28  ;;  %v14162_v40 = vld [vmem:[#allocation11 + $0x40] sm:$0xff]   ;;  %v9847_v28 = vmax.f32 %v12231_v18, 0.0 }
 0x542   :  { %9671 = vmatprep.subr.bf16.mxu1 %v14104_v30  ;;  %v14161_v30 = vld [vmem:[#allocation8 + $0x7f4] ss:$40 sps:$4 sm:$0xff]   ;;  %v14202_v18 = vld [vmem:[#allocation11 + $0xc0] sm:$0xff]  }
 0x544   :  { %9613 = vmatpush1.bf16.msra.mxu0 %v14099_v20  ;;  %v14163_v20 = vld [vmem:[#allocation11] sm:$0xff]  }
 0x545   :  { %9672 = vmatpush1.bf16.msra.mxu1 %v14102_v12  ;;  %9614 = vmatprep.subr.bf16.mxu0 %v14107_v35  ;;  %v14159_v12 = vld [vmem:[#allocation8 + $0x7f0] ss:$40 sps:$4 sm:$0xff]  }
 0x546   :  { %9682 = vmatprep.subr.bf16.mxu1 %v14110_v36  ;;  %v14167_v35 = vld [vmem:[#allocation11 + $0x48] sm:$0xff]   ;;  %v9857_v36 = vpack.c.bf16 %v9847_v28, %v9847_v28 }
 0x547   :  { %v14208_v28 = vld [vmem:[#allocation11 + $0x88] sm:$0xff]  }
 0x548   :  { %9674 = vmatmul.mubr.bf16.vlgmr.msra.gmra.mrb[16].mxu1 %v14812_v23  ;;  %9615 = vmatpush1.bf16.msra.mxu0 %v14105_v37  ;;  %v14123_v23 = vld [vmem:[#allocation8 + $0x1738] ss:$40 sps:$4 sm:$0xff]  }
 0x549   :  { %9683 = vmatpush1.bf16.msra.mxu1 %v14108_v17  ;;  %9714 = vmatprep.mubr.bf16.mxu1 %v14814_v41  ;;  %v14134_v41 = vld [vmem:[#allocation8 + $0x664] ss:$40 sps:$4 sm:$0xff]   ;;  %v14168_v37 = vld [vmem:[#allocation11 + $0x8] sm:$0xff]   ;;  %v14164_v17 = vld [vmem:[#allocation8 + $0x840] ss:$40 sps:$4 sm:$0xff]  }
 0x54a   :  { %9616 = vmatprep.subr.bf16.mxu0 %v14113_v38  ;;  %9684 = vmatprep.subr.bf16.mxu1 %v14116_v39  ;;  %v14172_v38 = vld [vmem:[#allocation11 + $0x50] sm:$0xff]  }
 0x54b   :  { %v14171_v39 = vld [vmem:[#allocation8 + $0x894] ss:$40 sps:$4 sm:$0xff]  }
 0x54c   :  { %9617 = vmatpush1.bf16.msra.mxu0 %v14111_v42  ;;  %v14173_v42 = vld [vmem:[#allocation11 + $0x10] sm:$0xff]  }
 0x54d   :  { %9685 = vmatpush1.bf16.msra.mxu1 %v14114_v44  ;;  %9618 = vmatprep.subr.bf16.mxu0 %v14119_v45  ;;  %v14169_v44 = vld [vmem:[#allocation8 + $0x890] ss:$40 sps:$4 sm:$0xff]   ;;  %v14177_v45 = vld [vmem:[#allocation11 + $0x58] sm:$0xff]  }
 0x54e   :  { %9686 = vmatprep.subr.bf16.mxu1 %v14122_v47  ;;  %v14176_v47 = vld [vmem:[#allocation8 + $0x8e4] ss:$40 sps:$4 sm:$0xff]  }
 0x550   :  { %9619 = vmatpush1.bf16.msra.mxu0 %v14117_v50  ;;  %v14178_v50 = vld [vmem:[#allocation11 + $0x18] sm:$0xff]  }
 0x551   :  { %9687 = vmatpush1.bf16.msra.mxu1 %v14120_v48  ;;  %9620 = vmatprep.subr.bf16.mxu0 %v14125_v51  ;;  %v14174_v48 = vld [vmem:[#allocation8 + $0x8e0] ss:$40 sps:$4 sm:$0xff]  }
 0x552   :  { %9688 = vmatprep.subr.bf16.mxu1 %v14128_v52  ;;  %v14182_v51 = vld [vmem:[#allocation11 + $0x60] sm:$0xff]   ;;  %v14181_v52 = vld [vmem:[#allocation8 + $0x934] ss:$40 sps:$4 sm:$0xff]  }
 0x554   :  { %9621 = vmatpush1.bf16.msra.mxu0 %v14123_v23  ;;  %v14183_v23 = vld [vmem:[#allocation11 + $0x20] sm:$0xff]  }
 0x555   :  { %9689 = vmatpush1.bf16.msra.mxu1 %v14126_v53  ;;  %9622 = vmatprep.subr.bf16.mxu0 %v14131_v59  ;;  %v14179_v53 = vld [vmem:[#allocation8 + $0x930] ss:$40 sps:$4 sm:$0xff]  }
 0x556   :  { %9690 = vmatprep.subr.bf16.mxu1 %v14134_v41  ;;  %v14187_v59 = vld [vmem:[#allocation11 + $0x68] sm:$0xff]   ;;  %v14186_v41 = vld [vmem:[#allocation8 + $0x984] ss:$40 sps:$4 sm:$0xff]  }
 0x558   :  { %9623 = vmatpush1.bf16.msra.mxu0 %v14129_v61  ;;  %v14188_v61 = vld [vmem:[#allocation11 + $0x28] sm:$0xff]  }
 0x559   :  { %9691 = vmatpush1.bf16.msra.mxu1 %v14132_v62  ;;  %9624 = vmatprep.subr.bf16.mxu0 %v14137_v63  ;;  %v4774_v62 = vrot.slane %v14911_v7, %v14806_v6  ;;  %v14184_v63 = vld [vmem:[#allocation8 + $0x980] ss:$40 sps:$4 sm:$0xff]  }
 0x55a   :  { %9692 = vmatprep.subr.bf16.mxu1 %v14140_v0  ;;  %v14192_v0 = vld [vmem:[#allocation11 + $0x70] sm:$0xff]  }
 0x55c   :  { %9625 = vmatpush1.bf16.msra.mxu0 %v14135_v1  ;;  %v4786_v1 = vrot.slane %v14911_v7, %v637_v22 }
 0x55d   :  { %9693 = vmatpush1.bf16.msra.mxu1 %v14138_v2  ;;  %9626 = vmatprep.subr.bf16.mxu0 %v14143_v3  ;;  %v14191_v2 = vld [vmem:[#allocation8 + $0x9d4] ss:$40 sps:$4 sm:$0xff]  }
 0x55e   :  { %9694 = vmatprep.subr.bf16.mxu1 %v14146_v4  ;;  %v14193_v3 = vld [vmem:[#allocation11 + $0x30] sm:$0xff]   ;;  %v12230_v4 = vadd.f32 %v14891_v27, %v4774_v62  ;;  %v14203_v27 = vld [vmem:[#allocation11 + $0x80] sm:$0xff]   ;;  %v14238_v62 = vld [vmem:[#allocation11 + $0xb8] sm:$0xff]  }
 0x560   :  { %9627 = vmatpush1.bf16.msra.mxu0 %v14141_v9  ;;  %v14189_v9 = vld [vmem:[#allocation8 + $0x9d0] ss:$40 sps:$4 sm:$0xff]  }
 0x561   :  { %9695 = vmatpush1.bf16.msra.mxu1 %v14144_v10  ;;  %9628 = vmatprep.subr.bf16.mxu0 %v14149_v14  ;;  %v14197_v10 = vld [vmem:[#allocation11 + $0x78] sm:$0xff]   ;;  %v12233_v14 = vadd.f32 %v14903_v49, %v4786_v1  ;;  %v14199_v49 = vld [vmem:[#allocation8 + $0xa70] ss:$40 sps:$4 sm:$0xff]   ;;  %v14241_v1 = vld [vmem:[#allocation8 + $0xcf4] ss:$40 sps:$4 sm:$0xff]  }
 0x562   :  { %9696 = vmatprep.subr.bf16.mxu1 %v14152_v15  ;;  %v14198_v15 = vld [vmem:[#allocation11 + $0x38] sm:$0xff]  }
 0x563   :  { %v9849_v22 = vmax.f32 %v12233_v14, 0.0  ;;  %v14242_v14 = vld [vmem:[#allocation8 + $0xd40] ss:$40 sps:$4 sm:$0xff]  }
 0x564   :  { %9629 = vmatpush1.bf16.msra.mxu0 %v14147_v16  ;;  %v9846_v16 = vmax.f32 %v12230_v4, 0.0  ;;  %v14265_v4 = vld [vmem:[#allocation11 + $0x148] sm:$0xff]  }
 0x565   :  { %9697 = vmatpush1.bf16.msra.mxu1 %v14150_v13  ;;  %9630 = vmatprep.subr.bf16.mxu0 %v14155_v32  ;;  %v14194_v13 = vld [vmem:[#allocation8 + $0xa20] ss:$40 sps:$4 sm:$0xff]   ;;  %v14201_v32 = vld [vmem:[#allocation8 + $0xa74] ss:$40 sps:$4 sm:$0xff]  }
 0x566   :  { %9698 = vmatprep.subr.bf16.mxu1 %v14158_v24  ;;  %v9856_v24 = vpack.c.bf16 %v9846_v16, %v9846_v16  ;;  %v14271_v16 = vld [vmem:[#allocation11 + $0x110] sm:$0xff]  }
 0x568   :  { %9631 = vmatpush1.bf16.msra.mxu0 %v14153_v19  ;;  %v14207_v19 = vld [vmem:[#allocation11 + $0xc8] sm:$0xff]  }
 0x569   :  { %9699 = vmatpush1.bf16.msra.mxu1 %v14156_v26  ;;  %12108 = vmatprep.subr.bf16.mxu0 %v14162_v40  ;;  %v9859_v26 = vpack.c.bf16 %v9849_v22, %v9849_v22  ;;  %v14206_v40 = vld [vmem:[#allocation8 + $0xac4] ss:$40 sps:$4 sm:$0xff]  }
 0x56a   :  { %9700 = vmatprep.subr.bf16.mxu1 %v14161_v30  ;;  %v14204_v30 = vld [vmem:[#allocation8 + $0xac0] ss:$40 sps:$4 sm:$0xff]  }
 0x56b   :  { %9633 = vmatmul.mubr.bf16.vlgmr.msra.gmra.mrb[20].mxu0 %v14874_v46  ;;  %v14275_v22 = vld [vmem:[#allocation11 + $0x158] sm:$0xff]  }
 0x56c   :  { %12109 = vmatpush3.bf16.msra.mxu0 %v14163_v20  ;;  %10545 = vmatprep.mubr.bf16.mxu0 %v9857_v36  ;;  %v14211_v20 = vld [vmem:[#allocation8 + $0xb14] ss:$40 sps:$4 sm:$0xff]   ;;  %v14216_v36 = vld [vmem:[#allocation8 + $0xb64] ss:$40 sps:$4 sm:$0xff]  }
 0x56d   :  { %9701 = vmatpush1.bf16.msra.mxu1 %v14159_v12  ;;  %12110 = vmatprep.subr.bf16.mxu0 %v14167_v35  ;;  %v14213_v12 = vld [vmem:[#allocation11 + $0x90] sm:$0xff]   ;;  %v14217_v35 = vld [vmem:[#allocation11 + $0xd8] sm:$0xff]  }
 0x56e   :  { %9702 = vmatprep.subr.bf16.mxu1 %v14166_v31  ;;  %v14218_v31 = vld [vmem:[#allocation11 + $0x98] sm:$0xff]  }
 0x570   :  { %12111 = vmatpush3.bf16.msra.mxu0 %v14168_v37  ;;  %v14214_v37 = vld [vmem:[#allocation8 + $0xb60] ss:$40 sps:$4 sm:$0xff]  }
 0x571   :  { %9703 = vmatpush1.bf16.msra.mxu1 %v14164_v17  ;;  %12112 = vmatprep.subr.bf16.mxu0 %v14172_v38  ;;  %v14222_v17 = vld [vmem:[#allocation11 + $0xe0] sm:$0xff]   ;;  %v14221_v38 = vld [vmem:[#allocation8 + $0xbb4] ss:$40 sps:$4 sm:$0xff]  }
 0x572   :  { %9704 = vmatprep.subr.bf16.mxu1 %v14171_v39  ;;  %v14223_v39 = vld [vmem:[#allocation11 + $0xa0] sm:$0xff]  }
 0x574   :  { %12113 = vmatpush3.bf16.msra.mxu0 %v14173_v42  ;;  %v14219_v42 = vld [vmem:[#allocation8 + $0xbb0] ss:$40 sps:$4 sm:$0xff]  }
 0x575   :  { %9705 = vmatpush1.bf16.msra.mxu1 %v14169_v44  ;;  %12114 = vmatprep.subr.bf16.mxu0 %v14177_v45  ;;  %v14227_v44 = vld [vmem:[#allocation11 + $0xe8] sm:$0xff]   ;;  %v14226_v45 = vld [vmem:[#allocation8 + $0xc04] ss:$40 sps:$4 sm:$0xff]  }
 0x576   :  { %9706 = vmatprep.subr.bf16.mxu1 %v14176_v47  ;;  %v14228_v47 = vld [vmem:[#allocation11 + $0xa8] sm:$0xff]  }
 0x578   :  { %12115 = vmatpush3.bf16.msra.mxu0 %v14178_v50  ;;  %v4782_v50 = vrot.slane %v14911_v7, %v633_v21  ;;  %v14234_v21 = vld [vmem:[#allocation8 + $0xca0] ss:$40 sps:$4 sm:$0xff]  }
 0x579   :  { %9707 = vmatpush1.bf16.msra.mxu1 %v14174_v48  ;;  %12116 = vmatprep.subr.bf16.mxu0 %v14182_v51  ;;  %v14224_v48 = vld [vmem:[#allocation8 + $0xc00] ss:$40 sps:$4 sm:$0xff]  }
 0x57a   :  { %9708 = vmatprep.subr.bf16.mxu1 %v14181_v52  ;;  %v14232_v51 = vld [vmem:[#allocation11 + $0xf0] sm:$0xff]  }
 0x57b   :  { %v14231_v52 = vld [vmem:[#allocation8 + $0xc54] ss:$40 sps:$4 sm:$0xff]  }
 0x57c   :  { %12117 = vmatpush3.bf16.msra.mxu0 %v14183_v23  ;;  %v14233_v23 = vld [vmem:[#allocation11 + $0xb0] sm:$0xff]  }
 0x57d   :  { %9709 = vmatpush1.bf16.msra.mxu1 %v14179_v53  ;;  %12118 = vmatprep.subr.bf16.mxu0 %v14187_v59  ;;  %v12232_v53 = vadd.f32 %v14901_v55, %v4782_v50  ;;  %v14229_v59 = vld [vmem:[#allocation8 + $0xc50] ss:$40 sps:$4 sm:$0xff]  }
 0x57e   :  { %9710 = vmatprep.subr.bf16.mxu1 %v14186_v41  ;;  %v14237_v41 = vld [vmem:[#allocation11 + $0xf8] sm:$0xff]   ;;  %v14239_v55 = vld [vmem:[#allocation8 + $0xcf0] ss:$40 sps:$4 sm:$0xff]  }
 0x57f   :  { %v14277_v50 = vld [vmem:[#allocation8 + $0x1010] ss:$40 sps:$4 sm:$0xff]  }
 0x580   :  { %12119 = vmatpush3.bf16.msra.mxu0 %v14188_v61  ;;  %v14236_v61 = vld [vmem:[#allocation8 + $0xca4] ss:$40 sps:$4 sm:$0xff]  }
 0x581   :  { %9711 = vmatpush1.bf16.msra.mxu1 %v14184_v63  ;;  %12120 = vmatprep.subr.bf16.mxu0 %v14192_v0  ;;  %v9848_v63 = vmax.f32 %v12232_v53, 0.0  ;;  %v14260_v0 = vld [vmem:[#allocation11 + $0x140] sm:$0xff]  }
 0x582   :  { %9712 = vmatprep.subr.bf16.mxu1 %v14191_v2  ;;  %v14261_v2 = vld [vmem:[#allocation11 + $0x100] sm:$0xff]  }
 0x583   :  { %v14294_v53 = vld [vmem:[#allocation8 + $0x1104] ss:$40 sps:$4 sm:$0xff]  }
 0x584   :  { %12121 = vmatpush3.bf16.msra.mxu0 %v14193_v3  ;;  %v9858_v3 = vpack.c.bf16 %v9848_v63, %v9848_v63 }
 0x585   :  { %9713 = vmatpush1.bf16.msra.mxu1 %v14189_v9  ;;  %12122 = vmatprep.subr.bf16.mxu0 %v14197_v10  ;;  %v14244_v9 = vld [vmem:[#allocation8 + $0xd44] ss:$40 sps:$4 sm:$0xff]   ;;  %v14266_v10 = vld [vmem:[#allocation11 + $0x108] sm:$0xff]  }
 0x586   :  { %9723 = vmatprep.subr.bf16.mxu1 %v14196_v5  ;;  %v14270_v5 = vld [vmem:[#allocation11 + $0x150] sm:$0xff]  }
 0x588   :  { %9715 = vmatmul.mubr.bf16.vlgmr.msra.gmra.mrb[16].mxu1 %v14821_v56  ;;  %12123 = vmatpush3.bf16.msra.mxu0 %v14198_v15  ;;  %v14212_v56 = vld [vmem:[#allocation11 + $0xd0] sm:$0xff]  }
 0x589   :  { %9724 = vmatpush1.bf16.msra.mxu1 %v14194_v13  ;;  %9755 = vmatprep.mubr.bf16.mxu1 %v14847_v54  ;;  %v14209_v54 = vld [vmem:[#allocation8 + $0xb10] ss:$40 sps:$4 sm:$0xff]   ;;  %v14247_v15 = vld [vmem:[#allocation8 + $0xd94] ss:$40 sps:$4 sm:$0xff]  }
 0x58a   :  { %9725 = vmatprep.subr.bf16.mxu1 %v14201_v32  ;;  %12130 = vmatprep.subr.bf16.mxu0 %v14202_v18  ;;  %v14245_v13 = vld [vmem:[#allocation8 + $0xd90] ss:$40 sps:$4 sm:$0xff]   ;;  %v14250_v32 = vld [vmem:[#allocation8 + $0xde4] ss:$40 sps:$4 sm:$0xff]  }
 0x58b   :  { %10546 = vmatmul.mubr.bf16.vlgmr.msra.gmra.mrb[24].mxu0 %v9856_v24  ;;  %v14276_v18 = vld [vmem:[#allocation11 + $0x118] sm:$0xff]   ;;  %v14280_v24 = vld [vmem:[#allocation11 + $0x160] sm:$0xff]  }
 0x58c   :  { %12131 = vmatpush3.bf16.msra.mxu0 %v14203_v27  ;;  %10585 = vmatprep.mubr.bf16.mxu0 %v9859_v26  ;;  %v14248_v27 = vld [vmem:[#allocation8 + $0xde0] ss:$40 sps:$4 sm:$0xff]   ;;  %v14251_v26 = vld [vmem:[#allocation8 + $0xe30] ss:$40 sps:$4 sm:$0xff]  }
 0x58d   :  { %9726 = vmatpush1.bf16.msra.mxu1 %v14199_v49  ;;  %12132 = vmatprep.subr.bf16.mxu0 %v14207_v19  ;;  %v14253_v49 = vld [vmem:[#allocation8 + $0xe34] ss:$40 sps:$4 sm:$0xff]   ;;  %v14281_v19 = vld [vmem:[#allocation11 + $0x120] sm:$0xff]  }
 0x58e   :  { %9727 = vmatprep.subr.bf16.mxu1 %v14206_v40  ;;  %v14285_v40 = vld [vmem:[#allocation11 + $0x168] sm:$0xff]  }
 0x590   :  { %12133 = vmatpush3.bf16.msra.mxu0 %v14208_v28  ;;  %v14256_v28 = vld [vmem:[#allocation8 + $0xe84] ss:$40 sps:$4 sm:$0xff]  }
 0x591   :  { %9728 = vmatpush1.bf16.msra.mxu1 %v14204_v30  ;;  %12134 = vmatprep.subr.bf16.mxu0 %v14212_v56  ;;  %v14286_v30 = vld [vmem:[#allocation11 + $0x128] sm:$0xff]   ;;  %v14254_v56 = vld [vmem:[#allocation8 + $0xe80] ss:$40 sps:$4 sm:$0xff]  }
 0x592   :  { %9729 = vmatprep.subr.bf16.mxu1 %v14211_v20  ;;  %v14290_v20 = vld [vmem:[#allocation11 + $0x170] sm:$0xff]  }
 0x594   :  { %12135 = vmatpush3.bf16.msra.mxu0 %v14213_v12  ;;  %v14259_v12 = vld [vmem:[#allocation8 + $0xed4] ss:$40 sps:$4 sm:$0xff]  }
 0x595   :  { %9730 = vmatpush1.bf16.msra.mxu1 %v14209_v54  ;;  %12136 = vmatprep.subr.bf16.mxu0 %v14217_v35  ;;  %v14291_v54 = vld [vmem:[#allocation11 + $0x130] sm:$0xff]  }
 0x596   :  { %9731 = vmatprep.subr.bf16.mxu1 %v14216_v36  ;;  %v14257_v35 = vld [vmem:[#allocation8 + $0xed0] ss:$40 sps:$4 sm:$0xff]   ;;  %v14295_v36 = vld [vmem:[#allocation11 + $0x178] sm:$0xff]  }
 0x598   :  { %12137 = vmatpush3.bf16.msra.mxu0 %v14218_v31  ;;  %v14264_v31 = vld [vmem:[#allocation8 + $0xf24] ss:$40 sps:$4 sm:$0xff]  }
 0x599   :  { %9732 = vmatpush1.bf16.msra.mxu1 %v14214_v37  ;;  %12138 = vmatprep.subr.bf16.mxu0 %v14222_v17  ;;  %v14296_v37 = vld [vmem:[#allocation11 + $0x138] sm:$0xff]  }
 0x59a   :  { %9733 = vmatprep.subr.bf16.mxu1 %v14221_v38  ;;  %v14262_v17 = vld [vmem:[#allocation8 + $0xf20] ss:$40 sps:$4 sm:$0xff]   ;;  %v14269_v38 = vld [vmem:[#allocation8 + $0xf74] ss:$40 sps:$4 sm:$0xff]  }
 0x59c   :  { %12139 = vmatpush3.bf16.msra.mxu0 %v14223_v39  ;;  %v14351_v39 = vld [vmem:[#allocation11 + $0x1c0] sm:$0xff]  }
 0x59d   :  { %9734 = vmatpush1.bf16.msra.mxu1 %v14219_v42  ;;  %12140 = vmatprep.subr.bf16.mxu0 %v14227_v44  ;;  %v14267_v42 = vld [vmem:[#allocation8 + $0xf70] ss:$40 sps:$4 sm:$0xff]   ;;  %v14274_v44 = vld [vmem:[#allocation8 + $0xfc4] ss:$40 sps:$4 sm:$0xff]  }
 0x59e   :  { %9735 = vmatprep.subr.bf16.mxu1 %v14226_v45  ;;  %v14272_v45 = vld [vmem:[#allocation8 + $0xfc0] ss:$40 sps:$4 sm:$0xff]  }
 0x5a0   :  { %12141 = vmatpush3.bf16.msra.mxu0 %v14228_v47  ;;  %v14279_v47 = vld [vmem:[#allocation8 + $0x1014] ss:$40 sps:$4 sm:$0xff]  }
 0x5a1   :  { %9736 = vmatpush1.bf16.msra.mxu1 %v14224_v48  ;;  %12142 = vmatprep.subr.bf16.mxu0 %v14232_v51  ;;  %v14284_v48 = vld [vmem:[#allocation8 + $0x1064] ss:$40 sps:$4 sm:$0xff]   ;;  %v14282_v51 = vld [vmem:[#allocation8 + $0x1060] ss:$40 sps:$4 sm:$0xff]  }
 0x5a2   :  { %9737 = vmatprep.subr.bf16.mxu1 %v14231_v52  ;;  %v4794_v52 = vrot.slane %v14911_v7, %v645_v34 }
 0x5a4   :  { %12143 = vmatpush3.bf16.msra.mxu0 %v14233_v23  ;;  %v14287_v23 = vld [vmem:[#allocation8 + $0x10b0] ss:$40 sps:$4 sm:$0xff]  }
 0x5a5   :  { %9738 = vmatpush1.bf16.msra.mxu1 %v14229_v59  ;;  %12144 = vmatprep.subr.bf16.mxu0 %v14237_v41 }
 0x5a6   :  { %9739 = vmatprep.subr.bf16.mxu1 %v14236_v61 }
 0x5a8   :  { %12145 = vmatpush3.bf16.msra.mxu0 %v14238_v62 }
 0x5a9   :  { %9740 = vmatpush1.bf16.msra.mxu1 %v14234_v21  ;;  %12152 = vmatprep.subr.bf16.mxu0 %v14260_v0  ;;  %v14292_v21 = vld [vmem:[#allocation8 + $0x1100] ss:$40 sps:$4 sm:$0xff]  }
 0x5aa   :  { %9741 = vmatprep.subr.bf16.mxu1 %v14241_v1 }
 0x5ab   :  { %10586 = vmatmul.mubr.bf16.vlgmr.msra.gmra.mrb[28].mxu0 %v9858_v3 }
 0x5ac   :  { %12153 = vmatpush3.bf16.msra.mxu0 %v14261_v2  ;;  %v14299_v2 = vld [vmem:[#allocation8 + $0x1154] ss:$40 sps:$4 sm:$0xff]  }
 0x5ad   :  { %9742 = vmatpush1.bf16.msra.mxu1 %v14239_v55  ;;  %12154 = vmatprep.subr.bf16.mxu0 %v14265_v4  ;;  %v14297_v55 = vld [vmem:[#allocation8 + $0x1150] ss:$40 sps:$4 sm:$0xff]  }
 0x5ae   :  { %9743 = vmatprep.subr.bf16.mxu1 %v14244_v9  ;;  %v14352_v4 = vld [vmem:[#allocation11 + $0x180] sm:$0xff]  }
 0x5af   :  { %v14302_v9 = vld [vmem:[#allocation8 + $0x11a4] ss:$40 sps:$4 sm:$0xff]  }
 0x5b0   :  { %12155 = vmatpush3.bf16.msra.mxu0 %v14266_v10  ;;  %v14356_v10 = vld [vmem:[#allocation11 + $0x1c8] sm:$0xff]  }
 0x5b1   :  { %9744 = vmatpush1.bf16.msra.mxu1 %v14242_v14  ;;  %12156 = vmatprep.subr.bf16.mxu0 %v14270_v5  ;;  %v14300_v14 = vld [vmem:[#allocation8 + $0x11a0] ss:$40 sps:$4 sm:$0xff]   ;;  %v14357_v5 = vld [vmem:[#allocation11 + $0x188] sm:$0xff]  }
 0x5b2   :  { %9745 = vmatprep.subr.bf16.mxu1 %v14247_v15  ;;  %v14305_v15 = vld [vmem:[#allocation8 + $0x11f4] ss:$40 sps:$4 sm:$0xff]  }
 0x5b4   :  { %12157 = vmatpush3.bf16.msra.mxu0 %v14271_v16  ;;  %v14361_v16 = vld [vmem:[#allocation11 + $0x1d0] sm:$0xff]  }
 0x5b5   :  { %9746 = vmatpush1.bf16.msra.mxu1 %v14245_v13  ;;  %12158 = vmatprep.subr.bf16.mxu0 %v14275_v22  ;;  %v14303_v13 = vld [vmem:[#allocation8 + $0x11f0] ss:$40 sps:$4 sm:$0xff]  }
 0x5b6   :  { %9747 = vmatprep.subr.bf16.mxu1 %v14250_v32  ;;  %v14362_v22 = vld [vmem:[#allocation11 + $0x190] sm:$0xff]   ;;  %v14308_v32 = vld [vmem:[#allocation8 + $0x1244] ss:$40 sps:$4 sm:$0xff]  }
 0x5b8   :  { %12159 = vmatpush3.bf16.msra.mxu0 %v14276_v18  ;;  %v14366_v18 = vld [vmem:[#allocation11 + $0x1d8] sm:$0xff]  }
 0x5b9   :  { %9748 = vmatpush1.bf16.msra.mxu1 %v14248_v27  ;;  %12160 = vmatprep.subr.bf16.mxu0 %v14280_v24  ;;  %v14306_v27 = vld [vmem:[#allocation8 + $0x1240] ss:$40 sps:$4 sm:$0xff]  }
 0x5ba   :  { %9749 = vmatprep.subr.bf16.mxu1 %v14253_v49  ;;  %v14367_v24 = vld [vmem:[#allocation11 + $0x198] sm:$0xff]   ;;  %v14311_v49 = vld [vmem:[#allocation8 + $0x1294] ss:$40 sps:$4 sm:$0xff]  }
 0x5bc   :  { %12161 = vmatpush3.bf16.msra.mxu0 %v14281_v19  ;;  %v14371_v19 = vld [vmem:[#allocation11 + $0x1e0] sm:$0xff]  }
 0x5bd   :  { %9750 = vmatpush1.bf16.msra.mxu1 %v14251_v26  ;;  %12162 = vmatprep.subr.bf16.mxu0 %v14285_v40  ;;  %v14309_v26 = vld [vmem:[#allocation8 + $0x1290] ss:$40 sps:$4 sm:$0xff]  }
 0x5be   :  { %9751 = vmatprep.subr.bf16.mxu1 %v14256_v28  ;;  %v14372_v40 = vld [vmem:[#allocation11 + $0x1a0] sm:$0xff]  }
 0x5bf   :  { %v14314_v28 = vld [vmem:[#allocation8 + $0x12e4] ss:$40 sps:$4 sm:$0xff]  }
 0x5c0   :  { %12163 = vmatpush3.bf16.msra.mxu0 %v14286_v30  ;;  %v14376_v30 = vld [vmem:[#allocation11 + $0x1e8] sm:$0xff]  }
 0x5c1   :  { %9752 = vmatpush1.bf16.msra.mxu1 %v14254_v56  ;;  %12164 = vmatprep.subr.bf16.mxu0 %v14290_v20  ;;  %v14312_v56 = vld [vmem:[#allocation8 + $0x12e0] ss:$40 sps:$4 sm:$0xff]   ;;  %v14377_v20 = vld [vmem:[#allocation11 + $0x1a8] sm:$0xff]  }
 0x5c2   :  { %9753 = vmatprep.subr.bf16.mxu1 %v14259_v12  ;;  %v14317_v12 = vld [vmem:[#allocation8 + $0x1334] ss:$40 sps:$4 sm:$0xff]  }
 0x5c4   :  { %12165 = vmatpush3.bf16.msra.mxu0 %v14291_v54  ;;  %v14381_v54 = vld [vmem:[#allocation11 + $0x1f0] sm:$0xff]  }
 0x5c5   :  { %9754 = vmatpush1.bf16.msra.mxu1 %v14257_v35  ;;  %12166 = vmatprep.subr.bf16.mxu0 %v14295_v36  ;;  %v14315_v35 = vld [vmem:[#allocation8 + $0x1330] ss:$40 sps:$4 sm:$0xff]  }
 0x5c6   :  { %9764 = vmatprep.subr.bf16.mxu1 %v14264_v31  ;;  %v14382_v36 = vld [vmem:[#allocation11 + $0x1b0] sm:$0xff]   ;;  %v14320_v31 = vld [vmem:[#allocation8 + $0x1384] ss:$40 sps:$4 sm:$0xff]  }
 0x5c8   :  { %9756 = vmatmul.mubr.bf16.vlgmr.msra.gmra.mrb[16].mxu1 %v14849_v58  ;;  %12167 = vmatpush3.bf16.msra.mxu0 %v14296_v37  ;;  %v14289_v58 = vld [vmem:[#allocation8 + $0x10b4] ss:$40 sps:$4 sm:$0xff]   ;;  %v14386_v37 = vld [vmem:[#allocation11 + $0x1f8] sm:$0xff]  }
 0x5c9   :  { %9765 = vmatpush1.bf16.msra.mxu1 %v14262_v17  ;;  %9796 = vmatprep.mubr.bf16.mxu1 %v14852_v60  ;;  %v4790_v60 = vrot.slane %v14911_v7, %v641_v33  ;;  %v14318_v17 = vld [vmem:[#allocation8 + $0x1380] ss:$40 sps:$4 sm:$0xff]  }
 0x5ca   :  { %9766 = vmatprep.subr.bf16.mxu1 %v14269_v38  ;;  %12174 = vmatprep.subr.bf16.mxu0 %v14351_v39  ;;  %v14387_v38 = vld [vmem:[#allocation11 + $0x1b8] sm:$0xff]   ;;  %v14323_v39 = vld [vmem:[#allocation8 + $0x13d4] ss:$40 sps:$4 sm:$0xff]  }
 0x5cd   :  { %9767 = vmatpush1.bf16.msra.mxu1 %v14267_v42  ;;  %v14321_v42 = vld [vmem:[#allocation8 + $0x13d0] ss:$40 sps:$4 sm:$0xff]  }
 0x5ce   :  { %9768 = vmatprep.subr.bf16.mxu1 %v14274_v44  ;;  %v14326_v44 = vld [vmem:[#allocation8 + $0x1424] ss:$40 sps:$4 sm:$0xff]  }
 0x5d1   :  { %9769 = vmatpush1.bf16.msra.mxu1 %v14272_v45  ;;  %v14324_v45 = vld [vmem:[#allocation8 + $0x1420] ss:$40 sps:$4 sm:$0xff]  }
 0x5d2   :  { %9770 = vmatprep.subr.bf16.mxu1 %v14279_v47  ;;  %v14329_v47 = vld [vmem:[#allocation8 + $0x1474] ss:$40 sps:$4 sm:$0xff]  }
 0x5d5   :  { %9771 = vmatpush1.bf16.msra.mxu1 %v14277_v50  ;;  %v14327_v50 = vld [vmem:[#allocation8 + $0x1470] ss:$40 sps:$4 sm:$0xff]  }
 0x5d6   :  { %9772 = vmatprep.subr.bf16.mxu1 %v14284_v48  ;;  %v14332_v48 = vld [vmem:[#allocation8 + $0x14c4] ss:$40 sps:$4 sm:$0xff]  }
 0x5d9   :  { %9773 = vmatpush1.bf16.msra.mxu1 %v14282_v51  ;;  %v14330_v51 = vld [vmem:[#allocation8 + $0x14c0] ss:$40 sps:$4 sm:$0xff]  }
 0x5da   :  { %9774 = vmatprep.subr.bf16.mxu1 %v14289_v58  ;;  %v14335_v58 = vld [vmem:[#allocation8 + $0x1514] ss:$40 sps:$4 sm:$0xff]  }
 0x5db   :  { %v9429_v59 = vpop.f32.mrb[12].mxu1 }
 0x5dc   :  { %v12234_v41 = vadd.f32 %v9429_v59, %v4790_v60  ;;  %v9431_v61 = vpop.f32.mrb[13].mxu1  ;;  %v14333_v60 = vld [vmem:[#allocation8 + $0x1510] ss:$40 sps:$4 sm:$0xff]   ;;  %v14344_v59 = vld [vmem:[#allocation8 + $0x1604] ss:$40 sps:$4 sm:$0xff]  }
 0x5dd   :  { %v12235_v62 = vadd.f32 %v9431_v61, %v4794_v52  ;;  %v9433_v63 = vpop.f32.mrb[14].mxu1  ;;  %9775 = vmatpush1.bf16.msra.mxu1 %v14287_v23  ;;  %v14338_v52 = vld [vmem:[#allocation8 + $0x1564] ss:$40 sps:$4 sm:$0xff]   ;;  %v14336_v23 = vld [vmem:[#allocation8 + $0x1560] ss:$40 sps:$4 sm:$0xff]  }
 0x5de   :  { %v9850_v0 = vmax.f32 %v12234_v41, 0.0  ;;  %v9434_v1 = vpop.f32.mrb[15].mxu1  ;;  %9776 = vmatprep.subr.bf16.mxu1 %v14294_v53  ;;  %v14341_v53 = vld [vmem:[#allocation8 + $0x15b4] ss:$40 sps:$4 sm:$0xff]   ;;  %v14345_v61 = vld [vmem:[#allocation8 + $0x1650] ss:$40 sps:$4 sm:$0xff]  }
 0x5df   :  { %v9851_v33 = vmax.f32 %v12235_v62, 0.0  ;;  %v14347_v41 = vld [vmem:[#allocation8 + $0x1654] ss:$40 sps:$4 sm:$0xff]   ;;  %v14350_v62 = vld [vmem:[#allocation8 + $0x16a4] ss:$40 sps:$4 sm:$0xff]  }
 0x5e0   :  { %v9860_v34 = vpack.c.bf16 %v9850_v0, %v9850_v0  ;;  %v14348_v63 = vld [vmem:[#allocation8 + $0x16a0] ss:$40 sps:$4 sm:$0xff]   ;;  %v14353_v0 = vld [vmem:[#allocation8 + $0x16f0] ss:$40 sps:$4 sm:$0xff]   ;;  %v14360_v1 = vld [vmem:[#allocation8 + $0x1744] ss:$40 sps:$4 sm:$0xff]  }
 0x5e1   :  { %v9861_v3 = vpack.c.bf16 %v9851_v33, %v9851_v33  ;;  %9777 = vmatpush1.bf16.msra.mxu1 %v14292_v21  ;;  %v14355_v21 = vld [vmem:[#allocation8 + $0x16f4] ss:$40 sps:$4 sm:$0xff]  }
 0x5e2   :  { %9778 = vmatprep.subr.bf16.mxu1 %v14299_v2  ;;  %v14358_v2 = vld [vmem:[#allocation8 + $0x1740] ss:$40 sps:$4 sm:$0xff]   ;;  %v14365_v33 = vld [vmem:[#allocation8 + $0x1794] ss:$40 sps:$4 sm:$0xff]  }
 0x5e3   :  { %10625 = vmatprep.mubr.bf16.mxu0 %v9861_v3  ;;  %v14363_v3 = vld [vmem:[#allocation8 + $0x1790] ss:$40 sps:$4 sm:$0xff]  }
 0x5e4   :  { %10626 = vmatmul.mubr.bf16.vlgmr.msra.gmra.mrb[32].mxu0 %v9860_v34  ;;  %v14375_v34 = vld [vmem:[#allocation8 + $0x1834] ss:$40 sps:$4 sm:$0xff]  }
 0x5e5   :  { %9779 = vmatpush1.bf16.msra.mxu1 %v14297_v55  ;;  %12175 = vmatpush3.bf16.msra.mxu0 %v14352_v4  ;;  %v14370_v55 = vld [vmem:[#allocation8 + $0x17e4] ss:$40 sps:$4 sm:$0xff]   ;;  %v14368_v4 = vld [vmem:[#allocation8 + $0x17e0] ss:$40 sps:$4 sm:$0xff]  }
 0x5e6   :  { %9780 = vmatprep.subr.bf16.mxu1 %v14302_v9  ;;  %12176 = vmatprep.subr.bf16.mxu0 %v14356_v10  ;;  %v14373_v9 = vld [vmem:[#allocation8 + $0x1830] ss:$40 sps:$4 sm:$0xff]   ;;  %v14380_v10 = vld [vmem:[#allocation8 + $0x1884] ss:$40 sps:$4 sm:$0xff]  }
 0x5e9   :  { %9781 = vmatpush1.bf16.msra.mxu1 %v14300_v14  ;;  %12177 = vmatpush3.bf16.msra.mxu0 %v14357_v5  ;;  %v4798_v14 = vrot.slane %v14911_v7, %v649_v57  ;;  %v4802_v5 = vrot.slane %v14911_v7, %v653_v29  ;;  %v14388_v57 = vld [vmem:[#allocation11 + $0x240] sm:$0xff]   ;;  %v14390_v7 = vld [vmem:[#allocation11 + $0x248] sm:$0xff]  }
 0x5ea   :  { %9782 = vmatprep.subr.bf16.mxu1 %v14305_v15  ;;  %12178 = vmatprep.subr.bf16.mxu0 %v14361_v16  ;;  %v14378_v15 = vld [vmem:[#allocation8 + $0x1880] ss:$40 sps:$4 sm:$0xff]  }
 0x5eb   :  { %v14389_v29 = vld [vmem:[#allocation11 + $0x200] sm:$0xff]  }
 0x5ed   :  { %9783 = vmatpush1.bf16.msra.mxu1 %v14303_v13  ;;  %12179 = vmatpush3.bf16.msra.mxu0 %v14362_v22  ;;  %v14385_v13 = vld [vmem:[#allocation8 + $0x18d4] ss:$40 sps:$4 sm:$0xff]  }
 0x5ee   :  { %9784 = vmatprep.subr.bf16.mxu1 %v14308_v32  ;;  %12180 = vmatprep.subr.bf16.mxu0 %v14366_v18 }
 0x5f1   :  { %9785 = vmatpush1.bf16.msra.mxu1 %v14306_v27  ;;  %12181 = vmatpush3.bf16.msra.mxu0 %v14367_v24 }
 0x5f2   :  { %9786 = vmatprep.subr.bf16.mxu1 %v14311_v49  ;;  %12182 = vmatprep.subr.bf16.mxu0 %v14371_v19  ;;  %v14383_v19 = vld [vmem:[#allocation8 + $0x18d0] ss:$40 sps:$4 sm:$0xff]  }
 0x5f5   :  { %9787 = vmatpush1.bf16.msra.mxu1 %v14309_v26  ;;  %12183 = vmatpush3.bf16.msra.mxu0 %v14372_v40 }
 0x5f6   :  { %9788 = vmatprep.subr.bf16.mxu1 %v14314_v28  ;;  %12184 = vmatprep.subr.bf16.mxu0 %v14376_v30  ;;  %v14391_v28 = vld [vmem:[#allocation11 + $0x208] sm:$0xff]   ;;  %v14392_v30 = vld [vmem:[#allocation11 + $0x250] sm:$0xff]  }
 0x5f9   :  { %9789 = vmatpush1.bf16.msra.mxu1 %v14312_v56  ;;  %12185 = vmatpush3.bf16.msra.mxu0 %v14377_v20  ;;  %v14393_v56 = vld [vmem:[#allocation11 + $0x210] sm:$0xff]   ;;  %v14394_v20 = vld [vmem:[#allocation11 + $0x258] sm:$0xff]  }
 0x5fa   :  { %9790 = vmatprep.subr.bf16.mxu1 %v14317_v12  ;;  %12186 = vmatprep.subr.bf16.mxu0 %v14381_v54  ;;  %v14395_v12 = vld [vmem:[#allocation11 + $0x218] sm:$0xff]   ;;  %v14396_v54 = vld [vmem:[#allocation11 + $0x260] sm:$0xff]  }
 0x5fd   :  { %9791 = vmatpush1.bf16.msra.mxu1 %v14315_v35  ;;  %12187 = vmatpush3.bf16.msra.mxu0 %v14382_v36  ;;  %v14397_v35 = vld [vmem:[#allocation11 + $0x220] sm:$0xff]   ;;  %v14398_v36 = vld [vmem:[#allocation11 + $0x268] sm:$0xff]  }
 0x5fe   :  { %9792 = vmatprep.subr.bf16.mxu1 %v14320_v31  ;;  %12188 = vmatprep.subr.bf16.mxu0 %v14386_v37  ;;  %v14399_v31 = vld [vmem:[#allocation11 + $0x228] sm:$0xff]  }
 0x601   :  { %9793 = vmatpush1.bf16.msra.mxu1 %v14318_v17  ;;  %12189 = vmatpush3.bf16.msra.mxu0 %v14387_v38 }
 0x602   :  { %9794 = vmatprep.subr.bf16.mxu1 %v14323_v39 }
 0x605   :  { %9795 = vmatpush1.bf16.msra.mxu1 %v14321_v42  ;;  %v12027_v42 = vld [vmem:[#allocation13] ss:$0 sm:$0xff] }
 0x606   :  { %9805 = vmatprep.subr.bf16.mxu1 %v14326_v44 }
 0x608   :  { %9797 = vmatmul.mubr.bf16.vlgmr.msra.gmra.mrb[16].mxu1 %v14863_v25  ;;  %v14339_v25 = vld [vmem:[#allocation8 + $0x15b0] ss:$40 sps:$4 sm:$0xff]  }
 0x609   :  { %9806 = vmatpush1.bf16.msra.mxu1 %v14324_v45  ;;  %9837 = vmatprep.mubr.bf16.mxu1 %v14872_v43  ;;  %v14342_v43 = vld [vmem:[#allocation8 + $0x1600] ss:$40 sps:$4 sm:$0xff]  }
 0x60a   :  { %9807 = vmatprep.subr.bf16.mxu1 %v14329_v47 }
 0x60d   :  { %9808 = vmatpush1.bf16.msra.mxu1 %v14327_v50 }
 0x60e   :  { %9809 = vmatprep.subr.bf16.mxu1 %v14332_v48 }
 0x611   :  { %9810 = vmatpush1.bf16.msra.mxu1 %v14330_v51 }
 0x612   :  { %9811 = vmatprep.subr.bf16.mxu1 %v14335_v58 }
 0x615   :  { %9812 = vmatpush1.bf16.msra.mxu1 %v14333_v60  ;;  %v14400_v60 = vld [vmem:[#allocation11 + $0x270] sm:$0xff]  }
 0x616   :  { %9813 = vmatprep.subr.bf16.mxu1 %v14338_v52  ;;  %v14401_v52 = vld [vmem:[#allocation11 + $0x230] sm:$0xff]  }
 0x619   :  { %9814 = vmatpush1.bf16.msra.mxu1 %v14336_v23  ;;  %v14402_v23 = vld [vmem:[#allocation11 + $0x278] sm:$0xff]  }
 0x61a   :  { %9815 = vmatprep.subr.bf16.mxu1 %v14341_v53  ;;  %v14403_v53 = vld [vmem:[#allocation11 + $0x238] sm:$0xff]  }
 0x61d   :  { %9816 = vmatpush1.bf16.msra.mxu1 %v14339_v25 }
 0x61e   :  { %9817 = vmatprep.subr.bf16.mxu1 %v14344_v59 }
 0x621   :  { %9818 = vmatpush1.bf16.msra.mxu1 %v14342_v43 }
 0x622   :  { %9819 = vmatprep.subr.bf16.mxu1 %v14347_v41 }
 0x625   :  { %9820 = vmatpush1.bf16.msra.mxu1 %v14345_v61 }
 0x626   :  { %9821 = vmatprep.subr.bf16.mxu1 %v14350_v62 }
 0x629   :  { %9822 = vmatpush1.bf16.msra.mxu1 %v14348_v63  ;;  %v4768_v63 = vld [vmem:[#allocation10 + $0x8] sm:$0x3] }
 0x62a   :  { %9823 = vmatprep.subr.bf16.mxu1 %v14355_v21  ;;  %v4806_v21 = vrot.slane %v4768_v63, %v14806_v6 }
 0x62d   :  { %9824 = vmatpush1.bf16.msra.mxu1 %v14353_v0  ;;  %v4810_v0 = vrot.slane %v4768_v63, %v14779_v11 }
 0x62e   :  { %9825 = vmatprep.subr.bf16.mxu1 %v14360_v1 }
 0x631   :  { %9826 = vmatpush1.bf16.msra.mxu1 %v14358_v2 }
 0x632   :  { %9827 = vmatprep.subr.bf16.mxu1 %v14365_v33 }
 0x635   :  { %9828 = vmatpush1.bf16.msra.mxu1 %v14363_v3 }
 0x636   :  { %9829 = vmatprep.subr.bf16.mxu1 %v14370_v55 }
 0x639   :  { %9830 = vmatpush1.bf16.msra.mxu1 %v14368_v4 }
 0x63a   :  { %9831 = vmatprep.subr.bf16.mxu1 %v14375_v34 }
 0x63d   :  { %9832 = vmatpush1.bf16.msra.mxu1 %v14373_v9 }
 0x63e   :  { %v9634_v16 = vpop.f32.mrb[20].mxu0  ;;  %9833 = vmatprep.subr.bf16.mxu1 %v14380_v10 }
 0x63f   :  { %v12236_v22 = vadd.f32 %v9634_v16, %v4798_v14  ;;  %v9636_v32 = vpop.f32.mrb[21].mxu0 }
 0x640   :  { %v12237_v18 = vadd.f32 %v9636_v32, %v4802_v5  ;;  %v9638_v27 = vpop.f32.mrb[22].mxu0 }
 0x641   :  { %v9852_v24 = vmax.f32 %v12236_v22, 0.0  ;;  %9834 = vmatpush1.bf16.msra.mxu1 %v14378_v15  ;;  %v9639_v49 = vpop.f32.mrb[23].mxu0 }
 0x642   :  { %v9853_v26 = vmax.f32 %v12237_v18, 0.0  ;;  %9835 = vmatprep.subr.bf16.mxu1 %v14385_v13 }
 0x643   :  { %v9862_v8 = vpack.c.bf16 %v9852_v24, %v9852_v24 }
 0x644   :  { %v9863_v40 = vpack.c.bf16 %v9853_v26, %v9853_v26 }
 0x645   :  { %9836 = vmatpush1.bf16.msra.mxu1 %v14383_v19 }
 0x646   :  { %10665 = vmatprep.mubr.bf16.mxu0 %v9863_v40  ;;  %12196 = vmatprep.subr.bf16.mxu1 %v14388_v57 }
 0x647   :  { %10666 = vmatmul.mubr.bf16.vlgmr.msra.gmra.mrb[36].mxu0 %v9862_v8 }
 0x648   :  { %9838 = vmatmul.mubr.bf16.vlgmr.msra.gmra.mrb[16].mxu1 %v14874_v46 }
 0x649   :  { %12197 = vmatpush3.bf16.msra.mxu1 %v14389_v29 }
 0x64a   :  { %12198 = vmatprep.subr.bf16.mxu1 %v14390_v7 }
 0x64d   :  { %12199 = vmatpush3.bf16.msra.mxu1 %v14391_v28 }
 0x64e   :  { %12200 = vmatprep.subr.bf16.mxu1 %v14392_v30 }
 0x651   :  { %12201 = vmatpush3.bf16.msra.mxu1 %v14393_v56 }
 0x652   :  { %12202 = vmatprep.subr.bf16.mxu1 %v14394_v20 }
 0x655   :  { %12203 = vmatpush3.bf16.msra.mxu1 %v14395_v12 }
 0x656   :  { %12204 = vmatprep.subr.bf16.mxu1 %v14396_v54 }
 0x659   :  { %12205 = vmatpush3.bf16.msra.mxu1 %v14397_v35 }
 0x65a   :  { %12206 = vmatprep.subr.bf16.mxu1 %v14398_v36 }
 0x65d   :  { %12207 = vmatpush3.bf16.msra.mxu1 %v14399_v31 }
 0x65e   :  { %v12124_v46 = vpop.f32.mrb[24].mxu0  ;;  %12208 = vmatprep.subr.bf16.mxu1 %v14400_v60 }
 0x65f   :  { %v12125_v37 = vpop.f32.mrb[25].mxu0 }
 0x660   :  { %v12126_v17 = vadd.f32 %v12125_v37, %v12124_v46  ;;  %v12127_v38 = vpop.f32.mrb[26].mxu0 }
 0x661   :  { %v12128_v39 = vpop.f32.mrb[27].mxu0  ;;  %12209 = vmatpush3.bf16.msra.mxu1 %v14401_v52 }
 0x662   :  { %v10548_v47 = vadd.f32 %v12126_v17, %v12027_v42  ;;  %12210 = vmatprep.subr.bf16.mxu1 %v14402_v23 }
 0x665   :  { %12211 = vmatpush3.bf16.msra.mxu1 %v14403_v53 }
 0x67e   :  { %v12146_v44 = vpop.f32.mrb[28].mxu0 }
 0x67f   :  { %v12147_v45 = vpop.f32.mrb[29].mxu0 }
 0x680   :  { %v12148_v50 = vadd.f32 %v12147_v45, %v12146_v44  ;;  %v12149_v48 = vpop.f32.mrb[30].mxu0 }
 0x681   :  { %v12150_v51 = vpop.f32.mrb[31].mxu0 }
 0x682   :  { %v10588_v58 = vadd.f32 %v12148_v50, %v10548_v47 }
 0x6b7   :  { %v12168_v25 = vpop.f32.mrb[32].mxu0 }
 0x6b8   :  { %v12169_v59 = vpop.f32.mrb[33].mxu0 }
 0x6b9   :  { %v12170_v43 = vadd.f32 %v12169_v59, %v12168_v25  ;;  %v12171_v41 = vpop.f32.mrb[34].mxu0 }
 0x6ba   :  { %v12172_v61 = vpop.f32.mrb[35].mxu0 }
 0x6bb   :  { %v10628_v62 = vadd.f32 %v12170_v43, %v10588_v58 }
 0x71a   :  { %v12190_v1 = vpop.f32.mrb[36].mxu0 }
 0x71b   :  { %v9839_v2 = vpop.f32.mrb[16].mxu1  ;;  %v12191_v33 = vpop.f32.mrb[37].mxu0 }
 0x71c   :  { %v12238_v3 = vadd.f32 %v9839_v2, %v4806_v21  ;;  %v9841_v55 = vpop.f32.mrb[17].mxu1  ;;  %v12192_v4 = vadd.f32 %v12191_v33, %v12190_v1  ;;  %v12193_v34 = vpop.f32.mrb[38].mxu0 }
 0x71d   :  { %v12239_v9 = vadd.f32 %v9841_v55, %v4810_v0  ;;  %v9843_v10 = vpop.f32.mrb[18].mxu1  ;;  %v12194_v14 = vpop.f32.mrb[39].mxu0 }
 0x71e   :  { %v9854_v5 = vmax.f32 %v12238_v3, 0.0  ;;  %v10668_v15 = vadd.f32 %v12192_v4, %v10628_v62  ;;  %v9844_v16 = vpop.f32.mrb[19].mxu1 }
 0x71f   :  { %v9855_v13 = vmax.f32 %v12239_v9, 0.0 }
 0x720   :  { %v9864_v32 = vpack.c.bf16 %v9854_v5, %v9854_v5 }
 0x721   :  { %v9865_v22 = vpack.c.bf16 %v9855_v13, %v9855_v13 }
 0x723   :  { %10705 = vmatprep.mubr.bf16.mxu1 %v9865_v22 }
 0x724   :  { %10706 = vmatmul.mubr.bf16.vlgmr.msra.gmra.mrb[20].mxu1 %v9864_v32 }
 0x7f7   :  { %v12212_v6 = vpop.f32.mrb[20].mxu1 }
 0x7f8   :  { %v12213_v11 = vpop.f32.mrb[21].mxu1 }
 0x7f9   :  { %v12214_v18 = vadd.f32 %v12213_v11, %v12212_v6  ;;  %v12215_v27 = vpop.f32.mrb[22].mxu1 }
 0x7fa   :  { %v12216_v24 = vpop.f32.mrb[23].mxu1 }
 0x7fb   :  { %v10708_v49 = vadd.f32 %v12214_v18, %v10668_v15 }
 0x7fd   :  { %10713 = vst [vmem:[#allocation14] sm:$0xff] %v10708_v49 }
 0x7fe   :  { %14570 = shalt.err (!%p14567_p4)
}
 0x7ff   :  { %s14571_s11 = scalar_lea.hbm %s14968_s7, 128 }
 0x800   :  { %p14572_p5 = scmp.ne.s32.totalorder %s14968_s7, %s14571_s11  ;;  %p14575_p6 = scmp.lt.u32.totalorder %s14571_s11, %s14968_s7 }
 0x802   :  { %p14577_p7 = pnand %p14575_p6, %p14572_p5 }
 0x804   :  { %14580 = shalt.err (!%p14577_p7)
}
 0x805   :  { %10723 = dma.vmem_to_hbm [thread:$0]  %s10721_s13, 128, %s14968_s7, [#allocation4]  }
 0x806   :  { %14589 = dma.done.wait [#allocation4], 128  }
 0x807   :  { %14590 = vsyncadd [#allocation4], 4294967168 }
 0x808   :  { %10727 = vsyncpa [#allocation3], 1 }
 0x809   :  { %10728 = vsyncpa [#allocation6], 1 }
 0x80a   :  { %10729 = vsyncpa [#allocation9], 1 }
 0x80b   :  { %10730 = vsyncpa [#allocation12], 1 }
 0x80c   :  { %10731 = vsyncpa [#allocation4], 1 }

</bundles_post_ra>
